<compile_context>
chip_gen: v5e
topology: v5e:2x2
jax: 0.10.0
libtpu: 0.0.40
codegen_flags: <defaults>
</compile_context>

<pallas_src>
import functools

import jax
import jax.numpy as jnp
from jax.experimental import pallas as pl
from jax.experimental.pallas import tpu as pltpu


# ----------------------------- Pallas kernel --------------------------------
def actor_kernel(x_ref,
                 t1_ref, cb1_ref, t2_ref, cb2_ref, t3_ref, cb3_ref,
                 w1_ref, b1_ref, w2_ref, b2_ref, w3_ref, b3_ref,
                 w4_ref, b4_ref,
                 out_ref, feat_sc):
    """One grid step == TILE_B samples.

    x_ref   : (Cin*H, W*TILE_B)  columns ordered w-major, batch-minor
    tN/cbN  : banded Toeplitz conv weights / (rows, 1) biases
    wN/bN   : Linear weights in PyTorch (out, in) layout / (out, 1) biases
    out_ref : (action_dim, TILE_B)  batch on the lane axis
    feat_sc : (W, TILE_B) VMEM scratch used to relayout the conv output
    """
    def mm(w, x):
        return jnp.dot(w, x, preferred_element_type=jnp.float32)

    x = x_ref[...]

    # cd2 conv stack — one banded (Toeplitz) matmul per layer (+ bias, ReLU).
    y = jnp.maximum(mm(t1_ref[...], x) + cb1_ref[...], 0.0)
    y = jnp.maximum(mm(t2_ref[...], y) + cb2_ref[...], 0.0)
    y = jnp.maximum(mm(t3_ref[...], y) + cb3_ref[...], 0.0)   # (1, W*TILE_B)

    # Relayout (1, W*TILE_B) -> (W, TILE_B).  Columns are w-major / batch-minor,
    # so row w of the feature matrix is the contiguous lane chunk
    # [w*TILE_B, (w+1)*TILE_B) of y.  Static slices + row stores only.
    w_feat, tb = feat_sc.shape
    assert y.shape == (1, w_feat * tb)
    for w in range(w_feat):
        feat_sc[w:w + 1, :] = y[:, w * tb:(w + 1) * tb]
    feat = feat_sc[...]                                        # (W, TILE_B)

    # MLP head in transposed (feature, batch) layout — batch stays on lanes.
    h = jnp.maximum(mm(w1_ref[...], feat) + b1_ref[...], 0.0)
    h = jnp.maximum(mm(w2_ref[...], h) + b2_ref[...], 0.0)
    h = mm(w3_ref[...], h) + b3_ref[...]
    h = h * jnp.clip(h + 3.0, 0.0, 6.0) * (1.0 / 6.0)          # Hardswish
    h = mm(w4_ref[...], h) + b4_ref[...]

    out_ref[...] = jnp.tanh(h).astype(out_ref.dtype)


# ------------------------- parameter preparation -----------------------------
def _conv_toeplitz(w, h_in, stride):
    """(Cout, Cin, K) conv filter -> banded (Cout*Hout, Cin*Hin) matrix."""
    cout, cin, k = w.shape
    h_out = (h_in - k) // stride + 1
    t = jnp.zeros((cout * h_out, cin * h_in), jnp.float32)
    for ho in range(h_out):
        for kk in range(k):
            # rows: cout-major (c*h_out + ho); cols: cin-major (ci*h_in + h)
            t = t.at[ho::h_out, ho * stride + kk::h_in].set(w[:, :, kk])
    return t, h_out


def prepare_kernel_params(params, H, W):
    """Convert PyTorch-layout params into the kernel's matmul form (do once)."""
    (c1w, c1b, c2w, c2b, c3w, c3b,
     f1w, f1b, f2w, f2b, f3w, f3b, f4w, f4b) = params

    def conv_block(w, b, h_in, stride):
        t, h_out = _conv_toeplitz(w, h_in, stride)
        b_col = jnp.repeat(b.reshape(-1), h_out).reshape(-1, 1)   # row c*h_out+ho -> b[c]
        return t.astype(jnp.float32), b_col.astype(jnp.float32), h_out

    t1, cb1, h1 = conv_block(c1w, c1b, H, 2)
    t2, cb2, h2 = conv_block(c2w, c2b, h1, 3)
    t3, cb3, h3 = conv_block(c3w, c3b, h2, 3)
    # The module's reshape((B, state.shape[3])) silently requires the conv stack
    # to reduce (C, H) exactly to (1, 1); make that an explicit error.
    assert c3w.shape[0] == 1 and h3 == 1, (
        "cd2 conv stack must reduce (channels, height) to (1, 1); got "
        f"({c3w.shape[0]}, {h3}) for H={H} with strides (2, 3, 3)")
    assert f1w.shape[1] == W, "net's first Linear must take state_dim[1]==W inputs"

    def col(b):
        return b.reshape(-1, 1).astype(jnp.float32)

    return (t1, cb1, t2, cb2, t3, cb3,
            f1w.astype(jnp.float32), col(f1b),
            f2w.astype(jnp.float32), col(f2b),
            f3w.astype(jnp.float32), col(f3b),
            f4w.astype(jnp.float32), col(f4b))


# ------------------------------- wrapper -------------------------------------
@functools.partial(jax.jit, static_argnames=("tile_b",))
def actor_forward(state, kparams, *, tile_b=128):
    """state: (B, 1, H, W) float32 (NCHW, like the PyTorch module)."""
    B, C, H, W = state.shape
    assert C == 1
    action_dim = kparams[-1].shape[0]

    tb = int(tile_b)
    if B < tb:
        tb = B                      # single tile; full-extent block is legal
    else:
        assert tb % 128 == 0, "tile_b must be a multiple of 128 (lane width)"
    n_tiles = pl.cdiv(B, tb)
    bp = tb * n_tiles

    # Column layout: tile t owns columns [t*W*tb, (t+1)*W*tb), ordered w-major,
    # batch-minor:  col = t*W*tb + w*tb + b_local.
    # Zero-padded batch columns (bp > B) flow through the full net (matmuls,
    # biases, relu/hardswish/tanh — no divisions), so they are harmless and are
    # sliced off at the end.
    x = state.reshape(B, H, W)
    if bp != B:
        x = jnp.pad(x, ((0, bp - B), (0, 0), (0, 0)))
    x = x.reshape(n_tiles, tb, H, W).transpose(2, 0, 3, 1)      # (H, nt, W, tb)
    x_cols = x.reshape(H, n_tiles * W * tb)

    def const_spec(arr):            # weights: resident, constant block index
        return pl.BlockSpec(arr.shape, lambda t: (0, 0))

    out_t = pl.pallas_call(
        actor_kernel,
        out_shape=jax.ShapeDtypeStruct((action_dim, bp), jnp.float32),
        grid_spec=pltpu.PrefetchScalarGridSpec(
            num_scalar_prefetch=0,
            grid=(n_tiles,),
            in_specs=[pl.BlockSpec((H, W * tb), lambda t: (0, t))]
                     + [const_spec(p) for p in kparams],
            out_specs=pl.BlockSpec((action_dim, tb), lambda t: (0, t)),
            scratch_shapes=[pltpu.VMEM((W, tb), jnp.float32)]),
        compiler_params=pltpu.CompilerParams(
            dimension_semantics=("parallel",)),   # megacore sharding on v7x
    )(x_cols, *kparams)

    return out_t.T[:B]                                          # (B, action_dim)


# ------------------------- pure-JAX reference --------------------------------
def actor_reference(state, params):
    (c1w, c1b, c2w, c2b, c3w, c3b,
     f1w, f1b, f2w, f2b, f3w, f3b, f4w, f4b) = params

    def conv(x, w, b, stride):
        y = jax.lax.conv_general_dilated(
            x, w[..., None], window_strides=(stride, 1), padding="VALID",
            dimension_numbers=("NCHW", "OIHW", "NCHW"))
        return y + b.reshape(1, -1, 1, 1)

    y = jax.nn.relu(conv(state, c1w, c1b, 2))
    y = jax.nn.relu(conv(y, c2w, c2b, 3))
    y = jax.nn.relu(conv(y, c3w, c3b, 3))
    feat = y.reshape(state.shape[0], state.shape[3])
    h = jax.nn.relu(feat @ f1w.T + f1b)
    h = jax.nn.relu(h @ f2w.T + f2b)
    h = h @ f3w.T + f3b
    h = h * jnp.clip(h + 3.0, 0.0, 6.0) / 6.0
    h = h @ f4w.T + f4b
    return jnp.tanh(h)


# ------------------------------ param init -----------------------------------
def init_params(key, w_feat, mid_dim, action_dim):
    """PyTorch-layout parameters: conv (Cout,Cin,K)+(Cout,), Linear (out,in)+(out,)."""
    ks = jax.random.split(key, 14)

    def u(k, shape, scale=0.2):
        return jax.random.uniform(k, shape, jnp.float32, -scale, scale)

    c1w = u(ks[0], (8, 1, 3));        c1b = u(ks[1], (8,))
    c2w = u(ks[2], (16, 8, 3));       c2b = u(ks[3], (16,))
    c3w = u(ks[4], (1, 16, 3));       c3b = u(ks[5], (1,))
    f1w = u(ks[6], (mid_dim, w_feat));      f1b = u(ks[7], (mid_dim,))
    f2w = u(ks[8], (mid_dim, mid_dim));     f2b = u(ks[9], (mid_dim,))
    f3w = u(ks[10], (mid_dim, mid_dim));    f3b = u(ks[11], (mid_dim,))
    f4w = u(ks[12], (action_dim, mid_dim)); f4b = u(ks[13], (action_dim,))
    return (c1w, c1b, c2w, c2b, c3w, c3b,
            f1w, f1b, f2w, f2b, f3w, f3b, f4w, f4b)


if __name__ == "__main__":
    # cd2_dim (history / conv height) = 20 -> 9 -> 3 -> 1 under strides (2, 3, 3)
    # state_dim = (20, 16): Linear input = state_dim[1] = 16 = W
    # B = 512 with TILE_B = 128 -> grid=(4,): lane-dense tiles and >= 2 steps
    # per v7x TensorCore, so the (tiny, ~25 KB) weight DMA hides in the pipeline.
    B, H, W = 512, 20, 16
    mid_dim, action_dim = 32, 4

    key = jax.random.PRNGKey(0)
    k_state, k_params = jax.random.split(key)
    state = jax.random.normal(k_state, (B, 1, H, W), jnp.float32)   # NCHW
    params = init_params(k_params, W, mid_dim, action_dim)

    # One-time conversion to the kernel's banded-matmul parameter form.
    kparams = prepare_kernel_params(params, H, W)

    out = actor_forward(state, kparams, tile_b=128)
    out = jax.block_until_ready(out)

    ref = jax.block_until_ready(actor_reference(state, params))
    assert out.shape == (B, action_dim), out.shape
    assert jnp.allclose(out, ref, atol=2e-3, rtol=2e-3), (
        float(jnp.max(jnp.abs(out - ref))))

    # TODO(synk): get_action()'s Gaussian-noise sampling is not part of forward();
    # it can be added with pltpu.prng_seed/stateful_normal if needed.
    print("KERNEL_OK")
</pallas_src>

<mosaic_0001>
module attributes {stable_mosaic.version = 11 : i64} {
  func.func @actor_kernel(%arg0: i32, %arg1: memref<20x2048xf32, #tpu.memory_space<vmem>>, %arg2: memref<72x20xf32, #tpu.memory_space<vmem>>, %arg3: memref<72x1xf32, #tpu.memory_space<vmem>>, %arg4: memref<48x72xf32, #tpu.memory_space<vmem>>, %arg5: memref<48x1xf32, #tpu.memory_space<vmem>>, %arg6: memref<1x48xf32, #tpu.memory_space<vmem>>, %arg7: memref<1x1xf32, #tpu.memory_space<vmem>>, %arg8: memref<32x16xf32, #tpu.memory_space<vmem>>, %arg9: memref<32x1xf32, #tpu.memory_space<vmem>>, %arg10: memref<32x32xf32, #tpu.memory_space<vmem>>, %arg11: memref<32x1xf32, #tpu.memory_space<vmem>>, %arg12: memref<32x32xf32, #tpu.memory_space<vmem>>, %arg13: memref<32x1xf32, #tpu.memory_space<vmem>>, %arg14: memref<4x32xf32, #tpu.memory_space<vmem>>, %arg15: memref<4x1xf32, #tpu.memory_space<vmem>>, %arg16: memref<4x128xf32, #tpu.memory_space<vmem>>, %arg17: memref<16x128xf32, #tpu.memory_space<vmem>>) attributes {dimension_semantics = [#tpu.dimension_semantics<parallel>], iteration_bounds = array<i64: 4>, scalar_prefetch = 0 : i64, scratch_operands = 1 : i64, tpu.core_type = #tpu.core_type<tc>, window_params = [{transform_indices = @transform_0, window_bounds = array<i64: 20, 2048>}, {pipeline_mode = #tpu.pipeline_mode<synchronous>, transform_indices = @transform_1, window_bounds = array<i64: 72, 20>}, {pipeline_mode = #tpu.pipeline_mode<synchronous>, transform_indices = @transform_2, window_bounds = array<i64: 72, 1>}, {pipeline_mode = #tpu.pipeline_mode<synchronous>, transform_indices = @transform_3, window_bounds = array<i64: 48, 72>}, {pipeline_mode = #tpu.pipeline_mode<synchronous>, transform_indices = @transform_4, window_bounds = array<i64: 48, 1>}, {pipeline_mode = #tpu.pipeline_mode<synchronous>, transform_indices = @transform_5, window_bounds = array<i64: 1, 48>}, {pipeline_mode = #tpu.pipeline_mode<synchronous>, transform_indices = @transform_6, window_bounds = array<i64: 1, 1>}, {pipeline_mode = #tpu.pipeline_mode<synchronous>, transform_indices = @transform_7, window_bounds = array<i64: 32, 16>}, {pipeline_mode = #tpu.pipeline_mode<synchronous>, transform_indices = @transform_8, window_bounds = array<i64: 32, 1>}, {pipeline_mode = #tpu.pipeline_mode<synchronous>, transform_indices = @transform_9, window_bounds = array<i64: 32, 32>}, {pipeline_mode = #tpu.pipeline_mode<synchronous>, transform_indices = @transform_10, window_bounds = array<i64: 32, 1>}, {pipeline_mode = #tpu.pipeline_mode<synchronous>, transform_indices = @transform_11, window_bounds = array<i64: 32, 32>}, {pipeline_mode = #tpu.pipeline_mode<synchronous>, transform_indices = @transform_12, window_bounds = array<i64: 32, 1>}, {pipeline_mode = #tpu.pipeline_mode<synchronous>, transform_indices = @transform_13, window_bounds = array<i64: 4, 32>}, {pipeline_mode = #tpu.pipeline_mode<synchronous>, transform_indices = @transform_14, window_bounds = array<i64: 4, 1>}, {transform_indices = @transform_15, window_bounds = array<i64: 4, 128>}]} {
    %c0 = arith.constant 0 : index
    %c0_0 = arith.constant 0 : index
    %0 = vector.load %arg1[%c0, %c0_0] : memref<20x2048xf32, #tpu.memory_space<vmem>>, vector<20x2048xf32>
    %c0_1 = arith.constant 0 : index
    %c0_2 = arith.constant 0 : index
    %1 = vector.load %arg2[%c0_1, %c0_2] : memref<72x20xf32, #tpu.memory_space<vmem>>, vector<72x20xf32>
    %cst = arith.constant dense<0.000000e+00> : vector<72x2048xf32>
    %2 = tpu.matmul %1, %0, %cst {dimension_numbers = #tpu.dot_dimension_numbers<[1], [0], [0], [1], [0, 0, 1, 1], [], []>} : vector<72x20xf32>, vector<20x2048xf32>, vector<72x2048xf32> -> vector<72x2048xf32>
    %c0_3 = arith.constant 0 : index
    %c0_4 = arith.constant 0 : index
    %3 = vector.load %arg3[%c0_3, %c0_4] : memref<72x1xf32, #tpu.memory_space<vmem>>, vector<72x1xf32>
    %4 = vector.broadcast %3 : vector<72x1xf32> to vector<72x2048xf32>
    %5 = arith.addf %2, %4 : vector<72x2048xf32>
    %cst_5 = arith.constant 0.000000e+00 : f32
    %6 = vector.broadcast %cst_5 : f32 to vector<72x2048xf32>
    %7 = arith.maximumf %5, %6 : vector<72x2048xf32>
    %c0_6 = arith.constant 0 : index
    %c0_7 = arith.constant 0 : index
    %8 = vector.load %arg4[%c0_6, %c0_7] : memref<48x72xf32, #tpu.memory_space<vmem>>, vector<48x72xf32>
    %cst_8 = arith.constant dense<0.000000e+00> : vector<48x2048xf32>
    %9 = tpu.matmul %8, %7, %cst_8 {dimension_numbers = #tpu.dot_dimension_numbers<[1], [0], [0], [1], [0, 0, 1, 1], [], []>} : vector<48x72xf32>, vector<72x2048xf32>, vector<48x2048xf32> -> vector<48x2048xf32>
    %c0_9 = arith.constant 0 : index
    %c0_10 = arith.constant 0 : index
    %10 = vector.load %arg5[%c0_9, %c0_10] : memref<48x1xf32, #tpu.memory_space<vmem>>, vector<48x1xf32>
    %11 = vector.broadcast %10 : vector<48x1xf32> to vector<48x2048xf32>
    %12 = arith.addf %9, %11 : vector<48x2048xf32>
    %cst_11 = arith.constant 0.000000e+00 : f32
    %13 = vector.broadcast %cst_11 : f32 to vector<48x2048xf32>
    %14 = arith.maximumf %12, %13 : vector<48x2048xf32>
    %c0_12 = arith.constant 0 : index
    %c0_13 = arith.constant 0 : index
    %15 = vector.load %arg6[%c0_12, %c0_13] : memref<1x48xf32, #tpu.memory_space<vmem>>, vector<1x48xf32>
    %cst_14 = arith.constant dense<0.000000e+00> : vector<1x2048xf32>
    %16 = tpu.matmul %15, %14, %cst_14 {dimension_numbers = #tpu.dot_dimension_numbers<[1], [0], [0], [1], [0, 0, 1, 1], [], []>} : vector<1x48xf32>, vector<48x2048xf32>, vector<1x2048xf32> -> vector<1x2048xf32>
    %c0_15 = arith.constant 0 : index
    %c0_16 = arith.constant 0 : index
    %17 = vector.load %arg7[%c0_15, %c0_16] : memref<1x1xf32, #tpu.memory_space<vmem>>, vector<1x1xf32>
    %18 = vector.broadcast %17 : vector<1x1xf32> to vector<1x2048xf32>
    %19 = arith.addf %16, %18 : vector<1x2048xf32>
    %cst_17 = arith.constant 0.000000e+00 : f32
    %20 = vector.broadcast %cst_17 : f32 to vector<1x2048xf32>
    %21 = arith.maximumf %19, %20 : vector<1x2048xf32>
    %22 = vector.extract_strided_slice %21 {offsets = [0, 0], sizes = [1, 128], strides = [1, 1]} : vector<1x2048xf32> to vector<1x128xf32>
    %c0_18 = arith.constant 0 : index
    %c0_19 = arith.constant 0 : index
    %23 = vector.load %arg17[%c0_18, %c0_19] : memref<16x128xf32, #tpu.memory_space<vmem>>, vector<1x128xf32>
    tpu.vector_store %arg17[%c0_18, %c0_19], %22 {strides = array<i32>} : memref<16x128xf32, #tpu.memory_space<vmem>>, vector<1x128xf32>,
    %24 = vector.extract_strided_slice %21 {offsets = [0, 128], sizes = [1, 128], strides = [1, 1]} : vector<1x2048xf32> to vector<1x128xf32>
    %c1 = arith.constant 1 : index
    %c0_20 = arith.constant 0 : index
    %25 = vector.load %arg17[%c1, %c0_20] : memref<16x128xf32, #tpu.memory_space<vmem>>, vector<1x128xf32>
    tpu.vector_store %arg17[%c1, %c0_20], %24 {strides = array<i32>} : memref<16x128xf32, #tpu.memory_space<vmem>>, vector<1x128xf32>,
    %26 = vector.extract_strided_slice %21 {offsets = [0, 256], sizes = [1, 128], strides = [1, 1]} : vector<1x2048xf32> to vector<1x128xf32>
    %c2 = arith.constant 2 : index
    %c0_21 = arith.constant 0 : index
    %27 = vector.load %arg17[%c2, %c0_21] : memref<16x128xf32, #tpu.memory_space<vmem>>, vector<1x128xf32>
    tpu.vector_store %arg17[%c2, %c0_21], %26 {strides = array<i32>} : memref<16x128xf32, #tpu.memory_space<vmem>>, vector<1x128xf32>,
    %28 = vector.extract_strided_slice %21 {offsets = [0, 384], sizes = [1, 128], strides = [1, 1]} : vector<1x2048xf32> to vector<1x128xf32>
    %c3 = arith.constant 3 : index
    %c0_22 = arith.constant 0 : index
    %29 = vector.load %arg17[%c3, %c0_22] : memref<16x128xf32, #tpu.memory_space<vmem>>, vector<1x128xf32>
    tpu.vector_store %arg17[%c3, %c0_22], %28 {strides = array<i32>} : memref<16x128xf32, #tpu.memory_space<vmem>>, vector<1x128xf32>,
    %30 = vector.extract_strided_slice %21 {offsets = [0, 512], sizes = [1, 128], strides = [1, 1]} : vector<1x2048xf32> to vector<1x128xf32>
    %c4 = arith.constant 4 : index
    %c0_23 = arith.constant 0 : index
    %31 = vector.load %arg17[%c4, %c0_23] : memref<16x128xf32, #tpu.memory_space<vmem>>, vector<1x128xf32>
    tpu.vector_store %arg17[%c4, %c0_23], %30 {strides = array<i32>} : memref<16x128xf32, #tpu.memory_space<vmem>>, vector<1x128xf32>,
    %32 = vector.extract_strided_slice %21 {offsets = [0, 640], sizes = [1, 128], strides = [1, 1]} : vector<1x2048xf32> to vector<1x128xf32>
    %c5 = arith.constant 5 : index
    %c0_24 = arith.constant 0 : index
    %33 = vector.load %arg17[%c5, %c0_24] : memref<16x128xf32, #tpu.memory_space<vmem>>, vector<1x128xf32>
    tpu.vector_store %arg17[%c5, %c0_24], %32 {strides = array<i32>} : memref<16x128xf32, #tpu.memory_space<vmem>>, vector<1x128xf32>,
    %34 = vector.extract_strided_slice %21 {offsets = [0, 768], sizes = [1, 128], strides = [1, 1]} : vector<1x2048xf32> to vector<1x128xf32>
    %c6 = arith.constant 6 : index
    %c0_25 = arith.constant 0 : index
    %35 = vector.load %arg17[%c6, %c0_25] : memref<16x128xf32, #tpu.memory_space<vmem>>, vector<1x128xf32>
    tpu.vector_store %arg17[%c6, %c0_25], %34 {strides = array<i32>} : memref<16x128xf32, #tpu.memory_space<vmem>>, vector<1x128xf32>,
    %36 = vector.extract_strided_slice %21 {offsets = [0, 896], sizes = [1, 128], strides = [1, 1]} : vector<1x2048xf32> to vector<1x128xf32>
    %c7 = arith.constant 7 : index
    %c0_26 = arith.constant 0 : index
    %37 = vector.load %arg17[%c7, %c0_26] : memref<16x128xf32, #tpu.memory_space<vmem>>, vector<1x128xf32>
    tpu.vector_store %arg17[%c7, %c0_26], %36 {strides = array<i32>} : memref<16x128xf32, #tpu.memory_space<vmem>>, vector<1x128xf32>,
    %38 = vector.extract_strided_slice %21 {offsets = [0, 1024], sizes = [1, 128], strides = [1, 1]} : vector<1x2048xf32> to vector<1x128xf32>
    %c8 = arith.constant 8 : index
    %c0_27 = arith.constant 0 : index
    %39 = vector.load %arg17[%c8, %c0_27] : memref<16x128xf32, #tpu.memory_space<vmem>>, vector<1x128xf32>
    tpu.vector_store %arg17[%c8, %c0_27], %38 {strides = array<i32>} : memref<16x128xf32, #tpu.memory_space<vmem>>, vector<1x128xf32>,
    %40 = vector.extract_strided_slice %21 {offsets = [0, 1152], sizes = [1, 128], strides = [1, 1]} : vector<1x2048xf32> to vector<1x128xf32>
    %c9 = arith.constant 9 : index
    %c0_28 = arith.constant 0 : index
    %41 = vector.load %arg17[%c9, %c0_28] : memref<16x128xf32, #tpu.memory_space<vmem>>, vector<1x128xf32>
    tpu.vector_store %arg17[%c9, %c0_28], %40 {strides = array<i32>} : memref<16x128xf32, #tpu.memory_space<vmem>>, vector<1x128xf32>,
    %42 = vector.extract_strided_slice %21 {offsets = [0, 1280], sizes = [1, 128], strides = [1, 1]} : vector<1x2048xf32> to vector<1x128xf32>
    %c10 = arith.constant 10 : index
    %c0_29 = arith.constant 0 : index
    %43 = vector.load %arg17[%c10, %c0_29] : memref<16x128xf32, #tpu.memory_space<vmem>>, vector<1x128xf32>
    tpu.vector_store %arg17[%c10, %c0_29], %42 {strides = array<i32>} : memref<16x128xf32, #tpu.memory_space<vmem>>, vector<1x128xf32>,
    %44 = vector.extract_strided_slice %21 {offsets = [0, 1408], sizes = [1, 128], strides = [1, 1]} : vector<1x2048xf32> to vector<1x128xf32>
    %c11 = arith.constant 11 : index
    %c0_30 = arith.constant 0 : index
    %45 = vector.load %arg17[%c11, %c0_30] : memref<16x128xf32, #tpu.memory_space<vmem>>, vector<1x128xf32>
    tpu.vector_store %arg17[%c11, %c0_30], %44 {strides = array<i32>} : memref<16x128xf32, #tpu.memory_space<vmem>>, vector<1x128xf32>,
    %46 = vector.extract_strided_slice %21 {offsets = [0, 1536], sizes = [1, 128], strides = [1, 1]} : vector<1x2048xf32> to vector<1x128xf32>
    %c12 = arith.constant 12 : index
    %c0_31 = arith.constant 0 : index
    %47 = vector.load %arg17[%c12, %c0_31] : memref<16x128xf32, #tpu.memory_space<vmem>>, vector<1x128xf32>
    tpu.vector_store %arg17[%c12, %c0_31], %46 {strides = array<i32>} : memref<16x128xf32, #tpu.memory_space<vmem>>, vector<1x128xf32>,
    %48 = vector.extract_strided_slice %21 {offsets = [0, 1664], sizes = [1, 128], strides = [1, 1]} : vector<1x2048xf32> to vector<1x128xf32>
    %c13 = arith.constant 13 : index
    %c0_32 = arith.constant 0 : index
    %49 = vector.load %arg17[%c13, %c0_32] : memref<16x128xf32, #tpu.memory_space<vmem>>, vector<1x128xf32>
    tpu.vector_store %arg17[%c13, %c0_32], %48 {strides = array<i32>} : memref<16x128xf32, #tpu.memory_space<vmem>>, vector<1x128xf32>,
    %50 = vector.extract_strided_slice %21 {offsets = [0, 1792], sizes = [1, 128], strides = [1, 1]} : vector<1x2048xf32> to vector<1x128xf32>
    %c14 = arith.constant 14 : index
    %c0_33 = arith.constant 0 : index
    %51 = vector.load %arg17[%c14, %c0_33] : memref<16x128xf32, #tpu.memory_space<vmem>>, vector<1x128xf32>
    tpu.vector_store %arg17[%c14, %c0_33], %50 {strides = array<i32>} : memref<16x128xf32, #tpu.memory_space<vmem>>, vector<1x128xf32>,
    %52 = vector.extract_strided_slice %21 {offsets = [0, 1920], sizes = [1, 128], strides = [1, 1]} : vector<1x2048xf32> to vector<1x128xf32>
    %c15 = arith.constant 15 : index
    %c0_34 = arith.constant 0 : index
    %53 = vector.load %arg17[%c15, %c0_34] : memref<16x128xf32, #tpu.memory_space<vmem>>, vector<1x128xf32>
    tpu.vector_store %arg17[%c15, %c0_34], %52 {strides = array<i32>} : memref<16x128xf32, #tpu.memory_space<vmem>>, vector<1x128xf32>,
    %c0_35 = arith.constant 0 : index
    %c0_36 = arith.constant 0 : index
    %54 = vector.load %arg17[%c0_35, %c0_36] : memref<16x128xf32, #tpu.memory_space<vmem>>, vector<16x128xf32>
    %c0_37 = arith.constant 0 : index
    %c0_38 = arith.constant 0 : index
    %55 = vector.load %arg8[%c0_37, %c0_38] : memref<32x16xf32, #tpu.memory_space<vmem>>, vector<32x16xf32>
    %cst_39 = arith.constant dense<0.000000e+00> : vector<32x128xf32>
    %56 = tpu.matmul %55, %54, %cst_39 {dimension_numbers = #tpu.dot_dimension_numbers<[1], [0], [0], [1], [0, 0, 1, 1], [], []>} : vector<32x16xf32>, vector<16x128xf32>, vector<32x128xf32> -> vector<32x128xf32>
    %c0_40 = arith.constant 0 : index
    %c0_41 = arith.constant 0 : index
    %57 = vector.load %arg9[%c0_40, %c0_41] : memref<32x1xf32, #tpu.memory_space<vmem>>, vector<32x1xf32>
    %58 = vector.broadcast %57 : vector<32x1xf32> to vector<32x128xf32>
    %59 = arith.addf %56, %58 : vector<32x128xf32>
    %cst_42 = arith.constant 0.000000e+00 : f32
    %60 = vector.broadcast %cst_42 : f32 to vector<32x128xf32>
    %61 = arith.maximumf %59, %60 : vector<32x128xf32>
    %c0_43 = arith.constant 0 : index
    %c0_44 = arith.constant 0 : index
    %62 = vector.load %arg10[%c0_43, %c0_44] : memref<32x32xf32, #tpu.memory_space<vmem>>, vector<32x32xf32>
    %cst_45 = arith.constant dense<0.000000e+00> : vector<32x128xf32>
    %63 = tpu.matmul %62, %61, %cst_45 {dimension_numbers = #tpu.dot_dimension_numbers<[1], [0], [0], [1], [0, 0, 1, 1], [], []>} : vector<32x32xf32>, vector<32x128xf32>, vector<32x128xf32> -> vector<32x128xf32>
    %c0_46 = arith.constant 0 : index
    %c0_47 = arith.constant 0 : index
    %64 = vector.load %arg11[%c0_46, %c0_47] : memref<32x1xf32, #tpu.memory_space<vmem>>, vector<32x1xf32>
    %65 = vector.broadcast %64 : vector<32x1xf32> to vector<32x128xf32>
    %66 = arith.addf %63, %65 : vector<32x128xf32>
    %cst_48 = arith.constant 0.000000e+00 : f32
    %67 = vector.broadcast %cst_48 : f32 to vector<32x128xf32>
    %68 = arith.maximumf %66, %67 : vector<32x128xf32>
    %c0_49 = arith.constant 0 : index
    %c0_50 = arith.constant 0 : index
    %69 = vector.load %arg12[%c0_49, %c0_50] : memref<32x32xf32, #tpu.memory_space<vmem>>, vector<32x32xf32>
    %cst_51 = arith.constant dense<0.000000e+00> : vector<32x128xf32>
    %70 = tpu.matmul %69, %68, %cst_51 {dimension_numbers = #tpu.dot_dimension_numbers<[1], [0], [0], [1], [0, 0, 1, 1], [], []>} : vector<32x32xf32>, vector<32x128xf32>, vector<32x128xf32> -> vector<32x128xf32>
    %c0_52 = arith.constant 0 : index
    %c0_53 = arith.constant 0 : index
    %71 = vector.load %arg13[%c0_52, %c0_53] : memref<32x1xf32, #tpu.memory_space<vmem>>, vector<32x1xf32>
    %72 = vector.broadcast %71 : vector<32x1xf32> to vector<32x128xf32>
    %73 = arith.addf %70, %72 : vector<32x128xf32>
    %cst_54 = arith.constant 3.000000e+00 : f32
    %74 = vector.broadcast %cst_54 : f32 to vector<32x128xf32>
    %75 = arith.addf %73, %74 : vector<32x128xf32>
    %cst_55 = arith.constant 0.000000e+00 : f32
    %cst_56 = arith.constant 6.000000e+00 : f32
    %76 = vector.broadcast %cst_55 : f32 to vector<32x128xf32>
    %77 = arith.maximumf %76, %75 : vector<32x128xf32>
    %78 = vector.broadcast %cst_56 : f32 to vector<32x128xf32>
    %79 = arith.minimumf %78, %77 : vector<32x128xf32>
    %80 = arith.mulf %73, %79 : vector<32x128xf32>
    %cst_57 = arith.constant 0.166666672 : f32
    %81 = vector.broadcast %cst_57 : f32 to vector<32x128xf32>
    %82 = arith.mulf %80, %81 : vector<32x128xf32>
    %c0_58 = arith.constant 0 : index
    %c0_59 = arith.constant 0 : index
    %83 = vector.load %arg14[%c0_58, %c0_59] : memref<4x32xf32, #tpu.memory_space<vmem>>, vector<4x32xf32>
    %cst_60 = arith.constant dense<0.000000e+00> : vector<4x128xf32>
    %84 = tpu.matmul %83, %82, %cst_60 {dimension_numbers = #tpu.dot_dimension_numbers<[1], [0], [0], [1], [0, 0, 1, 1], [], []>} : vector<4x32xf32>, vector<32x128xf32>, vector<4x128xf32> -> vector<4x128xf32>
    %c0_61 = arith.constant 0 : index
    %c0_62 = arith.constant 0 : index
    %85 = vector.load %arg15[%c0_61, %c0_62] : memref<4x1xf32, #tpu.memory_space<vmem>>, vector<4x1xf32>
    %86 = vector.broadcast %85 : vector<4x1xf32> to vector<4x128xf32>
    %87 = arith.addf %84, %86 : vector<4x128xf32>
    %88 = math.tanh %87 : vector<4x128xf32>
    %c0_63 = arith.constant 0 : index
    %c0_64 = arith.constant 0 : index
    %89 = vector.load %arg16[%c0_63, %c0_64] : memref<4x128xf32, #tpu.memory_space<vmem>>, vector<4x128xf32>
    tpu.vector_store %arg16[%c0_63, %c0_64], %88 {strides = array<i32>} : memref<4x128xf32, #tpu.memory_space<vmem>>, vector<4x128xf32>,
    return
  }
  func.func @transform_0(%arg0: i32) -> (i32, i32) {
    %c0_i32 = arith.constant 0 : i32
    %c0_i32_0 = arith.constant 0 : i32
    return %c0_i32, %arg0 : i32, i32
  }
  func.func @transform_1(%arg0: i32) -> (i32, i32) {
    %c0_i32 = arith.constant 0 : i32
    %c0_i32_0 = arith.constant 0 : i32
    %c0_i32_1 = arith.constant 0 : i32
    return %c0_i32, %c0_i32_0 : i32, i32
  }
  func.func @transform_2(%arg0: i32) -> (i32, i32) {
    %c0_i32 = arith.constant 0 : i32
    %c0_i32_0 = arith.constant 0 : i32
    %c0_i32_1 = arith.constant 0 : i32
    return %c0_i32, %c0_i32_0 : i32, i32
  }
  func.func @transform_3(%arg0: i32) -> (i32, i32) {
    %c0_i32 = arith.constant 0 : i32
    %c0_i32_0 = arith.constant 0 : i32
    %c0_i32_1 = arith.constant 0 : i32
    return %c0_i32, %c0_i32_0 : i32, i32
  }
  func.func @transform_4(%arg0: i32) -> (i32, i32) {
    %c0_i32 = arith.constant 0 : i32
    %c0_i32_0 = arith.constant 0 : i32
    %c0_i32_1 = arith.constant 0 : i32
    return %c0_i32, %c0_i32_0 : i32, i32
  }
  func.func @transform_5(%arg0: i32) -> (i32, i32) {
    %c0_i32 = arith.constant 0 : i32
    %c0_i32_0 = arith.constant 0 : i32
    %c0_i32_1 = arith.constant 0 : i32
    return %c0_i32, %c0_i32_0 : i32, i32
  }
  func.func @transform_6(%arg0: i32) -> (i32, i32) {
    %c0_i32 = arith.constant 0 : i32
    %c0_i32_0 = arith.constant 0 : i32
    %c0_i32_1 = arith.constant 0 : i32
    return %c0_i32, %c0_i32_0 : i32, i32
  }
  func.func @transform_7(%arg0: i32) -> (i32, i32) {
    %c0_i32 = arith.constant 0 : i32
    %c0_i32_0 = arith.constant 0 : i32
    %c0_i32_1 = arith.constant 0 : i32
    return %c0_i32, %c0_i32_0 : i32, i32
  }
  func.func @transform_8(%arg0: i32) -> (i32, i32) {
    %c0_i32 = arith.constant 0 : i32
    %c0_i32_0 = arith.constant 0 : i32
    %c0_i32_1 = arith.constant 0 : i32
    return %c0_i32, %c0_i32_0 : i32, i32
  }
  func.func @transform_9(%arg0: i32) -> (i32, i32) {
    %c0_i32 = arith.constant 0 : i32
    %c0_i32_0 = arith.constant 0 : i32
    %c0_i32_1 = arith.constant 0 : i32
    return %c0_i32, %c0_i32_0 : i32, i32
  }
  func.func @transform_10(%arg0: i32) -> (i32, i32) {
    %c0_i32 = arith.constant 0 : i32
    %c0_i32_0 = arith.constant 0 : i32
    %c0_i32_1 = arith.constant 0 : i32
    return %c0_i32, %c0_i32_0 : i32, i32
  }
  func.func @transform_11(%arg0: i32) -> (i32, i32) {
    %c0_i32 = arith.constant 0 : i32
    %c0_i32_0 = arith.constant 0 : i32
    %c0_i32_1 = arith.constant 0 : i32
    return %c0_i32, %c0_i32_0 : i32, i32
  }
  func.func @transform_12(%arg0: i32) -> (i32, i32) {
    %c0_i32 = arith.constant 0 : i32
    %c0_i32_0 = arith.constant 0 : i32
    %c0_i32_1 = arith.constant 0 : i32
    return %c0_i32, %c0_i32_0 : i32, i32
  }
  func.func @transform_13(%arg0: i32) -> (i32, i32) {
    %c0_i32 = arith.constant 0 : i32
    %c0_i32_0 = arith.constant 0 : i32
    %c0_i32_1 = arith.constant 0 : i32
    return %c0_i32, %c0_i32_0 : i32, i32
  }
  func.func @transform_14(%arg0: i32) -> (i32, i32) {
    %c0_i32 = arith.constant 0 : i32
    %c0_i32_0 = arith.constant 0 : i32
    %c0_i32_1 = arith.constant 0 : i32
    return %c0_i32, %c0_i32_0 : i32, i32
  }
  func.func @transform_15(%arg0: i32) -> (i32, i32) {
    %c0_i32 = arith.constant 0 : i32
    %c0_i32_0 = arith.constant 0 : i32
    return %c0_i32, %arg0 : i32, i32
  }
}

</mosaic_0001>

<bundles_post_ra>
// kernel: actor_forward.1
= control target key start
LH: loop header
LB: loop body
LE: loop exit
PB: predicated region body
PF: predicated region fallthrough
CT: control target
= control target key end

     0   :  { %s5186_s0 = inlined_call_operand.vmem [shape: f32[20,8192], index: 0, kind: input, shape index: {}]   ;;  %s5187_s1 = inlined_call_operand.vmem [shape: f32[72,20], index: 1, kind: input, shape index: {}]   ;;  %s5188_s2 = inlined_call_operand.vmem [shape: f32[72,1], index: 2, kind: input, shape index: {}]   ;;  %s5189_s3 = inlined_call_operand.vmem [shape: f32[48,72], index: 3, kind: input, shape index: {}]   ;;  %s5190_s4 = inlined_call_operand.vmem [shape: f32[48,1], index: 4, kind: input, shape index: {}]   ;;  %s5191_s5 = inlined_call_operand.vmem [shape: f32[1,48], index: 5, kind: input, shape index: {}]   ;;  %s5192_s6 = inlined_call_operand.<no memory space> [shape: f32[1,1], index: 6, kind: input, shape index: {}]   ;;  %s5193_s7 = inlined_call_operand.vmem [shape: f32[32,16], index: 7, kind: input, shape index: {}]   ;;  %s5194_s8 = inlined_call_operand.vmem [shape: f32[32,1], index: 8, kind: input, shape index: {}]   ;;  %s5195_s9 = inlined_call_operand.vmem [shape: f32[32,32], index: 9, kind: input, shape index: {}]   ;;  %s5196_s10 = inlined_call_operand.vmem [shape: f32[32,1], index: 10, kind: input, shape index: {}]   ;;  %s5197_s11 = inlined_call_operand.vmem [shape: f32[32,32], index: 11, kind: input, shape index: {}]   ;;  %s5198_s12 = inlined_call_operand.vmem [shape: f32[32,1], index: 12, kind: input, shape index: {}]   ;;  %s5199_s13 = inlined_call_operand.vmem [shape: f32[4,32], index: 13, kind: input, shape index: {}]   ;;  %s5200_s14 = inlined_call_operand.vmem [shape: f32[4,1], index: 14, kind: input, shape index: {}]   ;;  %s5201_s15 = inlined_call_operand.hbm [shape: f32[4,512], index: 15, kind: output, shape index: {}]  }
   0x1   :  { %5203 = sst [smem:[#allocation9_spill]] %s5186_s0  ;;  %v20_v0 = vstv %s5192_s6 }
   0x2   :  { %5204 = sst [smem:[#allocation10_spill]] %s5187_s1  ;;  %21 = vst [vmem:[#allocation3] sm:$0x1] %v20_v0 }
   0x3   :  { %5205 = sst [smem:[#allocation11_spill]] %s5188_s2 }
   0x4   :  { %5206 = sst [smem:[#allocation12_spill]] %s5189_s3 }
   0x5   :  { %5207 = sst [smem:[#allocation13_spill]] %s5190_s4 }
   0x6   :  { %22 = vsyncpa [#allocation6], 0 }
   0x7   :  { %24 = vsyncpa [#allocation6 + $0x1], 0  ;;  %s3571_s20 = smov 0   ;;  %s3573_s21 = smov 0  }
   0x8   :  { %s3575_s22 = smov 0   ;;  %s3577_s23 = smov 0  }
   0x9 LB: > { %s5202_s6 = sadd.s32 4294967295, %s3485_s23   ;;  %s3079_s24 = sadd.s32 4294967294, %s3485_s23   ;;  %s3485_s23 = sphi %s3577_s23, %s5221_s23   ;;  %s3481_s22 = sphi %s3575_s22, %s5220_s22   ;;  %s3477_s21 = sphi %s3573_s21, %s5219_s21   ;;  %s3473_s20 = sphi %s3571_s20, %s5218_s20  }
   0xa   : > { %s3594_s25 = sadd.s32 1, %s3485_s23   ;;  %s37_s26 = sadd.s32 1, %s3481_s22 }
   0xb   : > { %s34_s27 = ssub.s32 %s3485_s23, %s3594_s25  ;;  %p44_p0 = scmp.ne.s32.totalorder %s3481_s22, %s3477_s21 }
   0xc   : > { %p35_p1 = scmp.eq.s32.totalorder %s34_s27, 0  ;;  %p45_p2 = scmp.eq.s32.totalorder %s3485_s23, 0 }
   0xd   : > { %p368_p3 = scmp.eq.s32.totalorder %s5202_s6, 3  ;;  %p373_p4 = scmp.ne.s32.totalorder %s3477_s21, %s3473_s20 }
   0xe   : > { %s3607_s28 = scalar_select %p35_p1, %s3481_s22, %s37_s26  }
   0xf   : > { %p46_p5 = por %p45_p2, %p44_p0  ;;  %p3609_p6 = por %p368_p3, %p44_p0 }
  0x10   : > { %5208 = sst [smem:[#allocation8_spill]] %s3607_s28  ;;  %p374_p7 = scmp.eq.s32.totalorder %s3079_s24, 3 }
  0x11   : > { %p3081_p9 = scmp.ge.s32.totalorder %s3485_s23, 4 }
  0x12   : > { %p3613_p8 = por %p374_p7, %p373_p4 }
  0x13   : > { %432 = sbr.rel (%p3081_p9) target bundleno = 82 (0x52), region = 72 }
  0x18   : > { %435 = sbr.rel (!%p46_p5) target bundleno = 82 (0x52), region = 76  ;;  %s437_s16 = sand.u32 (%p46_p5), 1, %s3481_s22  }
  0x19   : > { %s3375_s17 = sshll.u32 (%p46_p5), %s3485_s23, 7  ;;  %s3376_s18 = smul.u32 (%p46_p5), 384, %s437_s16 }
  0x1a   : > { %s5211_s0 = sld [smem:[#allocation9_spill]] (%p46_p5) }
  0x1b   : > { %s3628_s24 = scalar_lea.vmem (%p46_p5), [#allocation4], %s3376_s18 }
  0x20   : > { %s3623_s27 = scalar_lea.vmem %s5211_s0, %s3375_s17 }
  0x21   : > { %v455_v1 = vld [vmem:[%s3623_s27] sm:$0xff]  ;;  %v457_v2 = vld [vmem:[%s3623_s27 + $0x8] sm:$0xff]  ;;  %v459_v3 = vld [vmem:[%s3623_s27 + $0x10] sm:$0xff] }
  0x22   : > { %456 = vst [vmem:[%s3628_s24] sm:$0xff] %v455_v1  ;;  %v461_v4 = vld [vmem:[%s3623_s27 + $0x18] sm:$0xff]  ;;  %v463_v5 = vld [vmem:[%s3623_s27 + $0x20] sm:$0xff]  ;;  %v465_v6 = vld [vmem:[%s3623_s27 + $0x28] sm:$0xff] }
  0x23   : > { %458 = vst [vmem:[%s3628_s24 + $0x8] sm:$0xff] %v457_v2  ;;  %v467_v7 = vld [vmem:[%s3623_s27 + $0x30] sm:$0xff]  ;;  %v469_v8 = vld [vmem:[%s3623_s27 + $0x38] sm:$0xff]  ;;  %v471_v9 = vld [vmem:[%s3623_s27 + $0x40] sm:$0xff] }
  0x24   : > { %460 = vst [vmem:[%s3628_s24 + $0x10] sm:$0xff] %v459_v3  ;;  %v473_v10 = vld [vmem:[%s3623_s27 + $0x48] sm:$0xff]  ;;  %v475_v11 = vld [vmem:[%s3623_s27 + $0x50] sm:$0xff]  ;;  %v477_v12 = vld [vmem:[%s3623_s27 + $0x58] sm:$0xff] }
  0x25   : > { %462 = vst [vmem:[%s3628_s24 + $0x18] sm:$0xff] %v461_v4  ;;  %v479_v13 = vld [vmem:[%s3623_s27 + $0x60] sm:$0xff]  ;;  %v481_v14 = vld [vmem:[%s3623_s27 + $0x68] sm:$0xff]  ;;  %v483_v15 = vld [vmem:[%s3623_s27 + $0x70] sm:$0xff] }
  0x26   : > { %464 = vst [vmem:[%s3628_s24 + $0x20] sm:$0xff] %v463_v5  ;;  %v485_v16 = vld [vmem:[%s3623_s27 + $0x78] sm:$0xff]  ;;  %v487_v17 = vld [vmem:[%s3623_s27 + $0x200] sm:$0xff]  ;;  %v489_v18 = vld [vmem:[%s3623_s27 + $0x208] sm:$0xff] }
  0x27   : > { %466 = vst [vmem:[%s3628_s24 + $0x28] sm:$0xff] %v465_v6  ;;  %v491_v19 = vld [vmem:[%s3623_s27 + $0x210] sm:$0xff]  ;;  %v493_v20 = vld [vmem:[%s3623_s27 + $0x218] sm:$0xff]  ;;  %v495_v21 = vld [vmem:[%s3623_s27 + $0x220] sm:$0xff] }
  0x28   : > { %468 = vst [vmem:[%s3628_s24 + $0x30] sm:$0xff] %v467_v7  ;;  %v497_v22 = vld [vmem:[%s3623_s27 + $0x228] sm:$0xff]  ;;  %v499_v23 = vld [vmem:[%s3623_s27 + $0x230] sm:$0xff]  ;;  %v501_v24 = vld [vmem:[%s3623_s27 + $0x238] sm:$0xff] }
  0x29   : > { %470 = vst [vmem:[%s3628_s24 + $0x38] sm:$0xff] %v469_v8  ;;  %v503_v25 = vld [vmem:[%s3623_s27 + $0x240] sm:$0xff]  ;;  %v505_v26 = vld [vmem:[%s3623_s27 + $0x248] sm:$0xff]  ;;  %v507_v27 = vld [vmem:[%s3623_s27 + $0x250] sm:$0xff] }
  0x2a   : > { %472 = vst [vmem:[%s3628_s24 + $0x40] sm:$0xff] %v471_v9  ;;  %v509_v28 = vld [vmem:[%s3623_s27 + $0x258] sm:$0xff]  ;;  %v511_v29 = vld [vmem:[%s3623_s27 + $0x260] sm:$0xff]  ;;  %v513_v30 = vld [vmem:[%s3623_s27 + $0x268] sm:$0xff] }
  0x2b   : > { %474 = vst [vmem:[%s3628_s24 + $0x48] sm:$0xff] %v473_v10  ;;  %v515_v31 = vld [vmem:[%s3623_s27 + $0x270] sm:$0xff]  ;;  %v517_v32 = vld [vmem:[%s3623_s27 + $0x278] sm:$0xff]  ;;  %v519_v33 = vld [vmem:[%s3623_s27 + $0x400] sm:$0xff] }
  0x2c   : > { %476 = vst [vmem:[%s3628_s24 + $0x50] sm:$0xff] %v475_v11  ;;  %v521_v34 = vld [vmem:[%s3623_s27 + $0x408] sm:$0xff]  ;;  %v523_v35 = vld [vmem:[%s3623_s27 + $0x410] sm:$0xff]  ;;  %v525_v36 = vld [vmem:[%s3623_s27 + $0x418] sm:$0xff] }
  0x2d   : > { %478 = vst [vmem:[%s3628_s24 + $0x58] sm:$0xff] %v477_v12  ;;  %v527_v37 = vld [vmem:[%s3623_s27 + $0x420] sm:$0xff]  ;;  %v529_v38 = vld [vmem:[%s3623_s27 + $0x428] sm:$0xff]  ;;  %v531_v39 = vld [vmem:[%s3623_s27 + $0x430] sm:$0xff] }
  0x2e   : > { %480 = vst [vmem:[%s3628_s24 + $0x60] sm:$0xff] %v479_v13  ;;  %v533_v40 = vld [vmem:[%s3623_s27 + $0x438] sm:$0xff]  ;;  %v535_v41 = vld [vmem:[%s3623_s27 + $0x440] sm:$0xff]  ;;  %v537_v42 = vld [vmem:[%s3623_s27 + $0x448] sm:$0xff] }
  0x2f   : > { %482 = vst [vmem:[%s3628_s24 + $0x68] sm:$0xff] %v481_v14  ;;  %v539_v43 = vld [vmem:[%s3623_s27 + $0x450] sm:$0xff]  ;;  %v541_v44 = vld [vmem:[%s3623_s27 + $0x458] sm:$0xff]  ;;  %v543_v45 = vld [vmem:[%s3623_s27 + $0x460] sm:$0xff] }
  0x30   : > { %484 = vst [vmem:[%s3628_s24 + $0x70] sm:$0xff] %v483_v15  ;;  %v545_v46 = vld [vmem:[%s3623_s27 + $0x468] sm:$0xff]  ;;  %v547_v47 = vld [vmem:[%s3623_s27 + $0x470] sm:$0xff]  ;;  %v549_v48 = vld [vmem:[%s3623_s27 + $0x478] sm:$0xff] }
  0x31   : > { %486 = vst [vmem:[%s3628_s24 + $0x78] sm:$0xff] %v485_v16 }
  0x32   : > { %488 = vst [vmem:[%s3628_s24 + $0x80] sm:$0xff] %v487_v17 }
  0x33   : > { %490 = vst [vmem:[%s3628_s24 + $0x88] sm:$0xff] %v489_v18 }
  0x34   : > { %492 = vst [vmem:[%s3628_s24 + $0x90] sm:$0xff] %v491_v19 }
  0x35   : > { %494 = vst [vmem:[%s3628_s24 + $0x98] sm:$0xff] %v493_v20 }
  0x36   : > { %496 = vst [vmem:[%s3628_s24 + $0xa0] sm:$0xff] %v495_v21 }
  0x37   : > { %498 = vst [vmem:[%s3628_s24 + $0xa8] sm:$0xff] %v497_v22 }
  0x38   : > { %500 = vst [vmem:[%s3628_s24 + $0xb0] sm:$0xff] %v499_v23 }
  0x39   : > { %502 = vst [vmem:[%s3628_s24 + $0xb8] sm:$0xff] %v501_v24 }
  0x3a   : > { %504 = vst [vmem:[%s3628_s24 + $0xc0] sm:$0xff] %v503_v25 }
  0x3b   : > { %506 = vst [vmem:[%s3628_s24 + $0xc8] sm:$0xff] %v505_v26 }
  0x3c   : > { %508 = vst [vmem:[%s3628_s24 + $0xd0] sm:$0xff] %v507_v27 }
  0x3d   : > { %510 = vst [vmem:[%s3628_s24 + $0xd8] sm:$0xff] %v509_v28 }
  0x3e   : > { %512 = vst [vmem:[%s3628_s24 + $0xe0] sm:$0xff] %v511_v29 }
  0x3f   : > { %514 = vst [vmem:[%s3628_s24 + $0xe8] sm:$0xff] %v513_v30 }
  0x40   : > { %516 = vst [vmem:[%s3628_s24 + $0xf0] sm:$0xff] %v515_v31 }
  0x41   : > { %518 = vst [vmem:[%s3628_s24 + $0xf8] sm:$0xff] %v517_v32 }
  0x42   : > { %520 = vst [vmem:[%s3628_s24 + $0x100] sm:$0xff] %v519_v33 }
  0x43   : > { %522 = vst [vmem:[%s3628_s24 + $0x108] sm:$0xff] %v521_v34 }
  0x44   : > { %524 = vst [vmem:[%s3628_s24 + $0x110] sm:$0xff] %v523_v35 }
  0x45   : > { %526 = vst [vmem:[%s3628_s24 + $0x118] sm:$0xff] %v525_v36 }
  0x46   : > { %528 = vst [vmem:[%s3628_s24 + $0x120] sm:$0xff] %v527_v37 }
  0x47   : > { %530 = vst [vmem:[%s3628_s24 + $0x128] sm:$0xff] %v529_v38 }
  0x48   : > { %532 = vst [vmem:[%s3628_s24 + $0x130] sm:$0xff] %v531_v39 }
  0x49   : > { %534 = vst [vmem:[%s3628_s24 + $0x138] sm:$0xff] %v533_v40 }
  0x4a   : > { %536 = vst [vmem:[%s3628_s24 + $0x140] sm:$0xff] %v535_v41 }
  0x4b   : > { %538 = vst [vmem:[%s3628_s24 + $0x148] sm:$0xff] %v537_v42 }
  0x4c   : > { %540 = vst [vmem:[%s3628_s24 + $0x150] sm:$0xff] %v539_v43 }
  0x4d   : > { %542 = vst [vmem:[%s3628_s24 + $0x158] sm:$0xff] %v541_v44 }
  0x4e   : > { %544 = vst [vmem:[%s3628_s24 + $0x160] sm:$0xff] %v543_v45 }
  0x4f   : > { %546 = vst [vmem:[%s3628_s24 + $0x168] sm:$0xff] %v545_v46 }
  0x50   : > { %548 = vst [vmem:[%s3628_s24 + $0x170] sm:$0xff] %v547_v47 }
  0x51   : > { %550 = vst [vmem:[%s3628_s24 + $0x178] sm:$0xff] %v549_v48 }
  0x52 PF: > { %p3084_p10 = scmp.ge.s32.totalorder %s3485_s23, 1  ;;  %p555_p11 = scmp.lt.s32.totalorder %s3485_s23, 5 }
  0x54   : > { %p556_p12 = pnand %p3084_p10, %p555_p11 }
  0x55   : > { %s3726_s16 = sand.u32 (!%p556_p12), 1, %s3477_s21   ;;  %s5212_s2 = sld [smem:[#allocation11_spill]] (!%p556_p12) }
  0x56   : > { %559 = sbr.rel (%p556_p12) target bundleno = 1518 (0x5ee), region = 99  ;;  %s5213_s1 = sld [smem:[#allocation10_spill]] (!%p556_p12) }
  0x57   : > { %s3377_s17 = smul.u32 (!%p556_p12), 384, %s3726_s16  ;;  %s5214_s4 = sld [smem:[#allocation13_spill]] (!%p556_p12) }
  0x58   : > { %s5215_s3 = sld [smem:[#allocation12_spill]] (!%p556_p12)  ;;  %s3085_s0 = sshll.u32 (!%p556_p12), %s3726_s16, 2 }
  0x59   : > { %s3735_s24 = scalar_lea.vmem (!%p556_p12), [#allocation4], %s3377_s17  ;;  %s5216_s28 = sadd.s32 (!%p556_p12), 4294967295, %s3485_s23  }
  0x5a   : > { %s3372_s19 = sshll.u32 (!%p556_p12), %s5216_s28, 2  ;;  %s608_s17 = scalar_lea.vmem (!%p556_p12), [#allocation5], %s3085_s0 }
  0x5b   : > { %v3487_v49 = vmov 0   ;;  %v673_v50 = vld [vmem:[%s5212_s2 + $0x30] sm:$0xff]  ;;  %v675_v51 = vld [vmem:[%s5212_s2 + $0x40] sm:$0xff]  ;;  %vm749_vm0 = vcmask 1043456   ;;  %v643_v53 = vld [vmem:[%s3735_s24 + $0x108] sm:$0xf] }
  0x5c   : > { %3419 = vset.pattern.permute.xlu1 %v3487_v49  ;;  %3418 = vset.pattern.permute.xlu0 %v3487_v49  ;;  %v642_v52 = vld [vmem:[%s3735_s24 + $0x100] sm:$0xf]  ;;  %v644_v54 = vld [vmem:[%s3735_s24 + $0x110] sm:$0xf]  ;;  %v645_v55 = vld [vmem:[%s3735_s24 + $0x118] sm:$0xf] }
  0x5d   : > { %708 = vperm.xlu1 %3419, %v673_v50   ;;  %718 = vperm.xlu0 %3418, %v675_v51   ;;  %v626_v56 = vld [vmem:[%s3735_s24 + $0x80] sm:$0xff]  ;;  %v627_v57 = vld [vmem:[%s3735_s24 + $0x88] sm:$0xff]  ;;  %v628_v58 = vld [vmem:[%s3735_s24 + $0x90] sm:$0xff]  ;;  %vm721_vm1 = vcmask 162816   ;;  %vm1688_vm2 = vcmask 588800   ;;  %vm2371_vm3 = vcmask 392192  }
  0x5e   : > { %3420 = vset.pattern.permute.xlu2 %v3487_v49  ;;  %3086 = vmatpush.msk.msra.mxu0 %vm749_vm0, %v642_v52  ;;  %v629_v59 = vld [vmem:[%s3735_s24 + $0x98] sm:$0xff]  ;;  %v610_v60 = vld [vmem:[%s3735_s24] sm:$0xff]  ;;  %v611_v61 = vld [vmem:[%s3735_s24 + $0x8] sm:$0xff]  ;;  %vm2757_vm4 = vcmask 130048   ;;  %vm2831_vm5 = vcmask 261120   ;;  %s2999_s6 = scalar_lea.sflag [#allocation6], %s3726_s16 }
  0x5f   : > { %3096 = vmatpush.msk.msra.mxu1 %vm749_vm0, %v643_v53  ;;  %3106 = vmatpush.msk.msra.mxu2 %vm749_vm0, %v644_v54  ;;  %v612_v62 = vld [vmem:[%s3735_s24 + $0x10] sm:$0xff]  ;;  %v613_v63 = vld [vmem:[%s3735_s24 + $0x18] sm:$0xff]  ;;  %v674_v2 = vld [vmem:[%s5212_s2 + $0x38] sm:$0xff] }
  0x60   : > { %3116 = vmatpush.msk.msra.mxu3 %vm749_vm0, %v645_v55  ;;  %812 = vmatpush.msra.mxu0 %v626_v56  ;;  %v3756_v0 = vld [vmem:[%s5213_s1] sm:$0xff]  ;;  %v672_v1 = vld [vmem:[%s5212_s2 + $0x28] sm:$0xff]  ;;  %v669_v8 = vld [vmem:[%s5212_s2 + $0x10] sm:$0xff] }
  0x61   : > { %856 = vmatpush.msra.mxu1 %v627_v57  ;;  %900 = vmatpush.msra.mxu2 %v628_v58  ;;  %v671_v3 = vld [vmem:[%s5212_s2 + $0x20] sm:$0xff]  ;;  %v649_v5 = vld [vmem:[%s3735_s24 + $0x138] sm:$0xf]  ;;  %v670_v9 = vld [vmem:[%s5212_s2 + $0x18] sm:$0xff] }
  0x62   : > { %944 = vmatpush.msra.mxu3 %v629_v59  ;;  %813 = vmatpush.msra.mxu0 %v610_v60  ;;  %v648_v4 = vld [vmem:[%s3735_s24 + $0x130] sm:$0xf]  ;;  %v3782_v6 = vld [vmem:[%s5213_s1 + $0x8] sm:$0xff]  ;;  %v646_v10 = vld [vmem:[%s3735_s24 + $0x120] sm:$0xf] }
  0x63   : > { %857 = vmatpush.msra.mxu1 %v611_v61  ;;  %901 = vmatpush.msra.mxu2 %v612_v62  ;;  %v668_v7 = vld [vmem:[%s5212_s2 + $0x8] sm:$0xff]  ;;  %v647_v11 = vld [vmem:[%s3735_s24 + $0x128] sm:$0xf]  ;;  %v3808_v12 = vld [vmem:[%s5213_s1 + $0x10] sm:$0xff] }
  0x64   : > { %945 = vmatpush.msra.mxu3 %v613_v63  ;;  %3087 = vmatmul.msk.f32.vlgmr.msra.gmra.mxu0 %vm721_vm1, %v3756_v0  ;;  %v667_v13 = vld [vmem:[%s5212_s2] sm:$0xff]  ;;  %v633_v15 = vld [vmem:[%s3735_s24 + $0xb8] sm:$0xff]  ;;  %v3826_v16 = vld [vmem:[%s5213_s1 + $0x18] sm:$0xff] }
  0x65   : > { %3097 = vmatmul.msk.f32.vlgmr.msra.gmra.mxu1 %vm721_vm1, %v3756_v0  ;;  %3107 = vmatmul.msk.f32.vlgmr.msra.gmra.mxu2 %vm721_vm1, %v3756_v0  ;;  %v632_v14 = vld [vmem:[%s3735_s24 + $0xb0] sm:$0xff]  ;;  %v630_v18 = vld [vmem:[%s3735_s24 + $0xa0] sm:$0xff]  ;;  %v631_v19 = vld [vmem:[%s3735_s24 + $0xa8] sm:$0xff] }
  0x66   : > { %3117 = vmatmul.msk.f32.vlgmr.msra.gmra.mxu3 %vm721_vm1, %v3756_v0  ;;  %703 = vperm.xlu1 %3419, %v672_v1   ;;  %v3839_v17 = vld [vmem:[%s5213_s1 + $0x20] sm:$0xff]  ;;  %v614_v20 = vld [vmem:[%s3735_s24 + $0x20] sm:$0xff]  ;;  %v617_v23 = vld [vmem:[%s3735_s24 + $0x38] sm:$0xff] }
  0x67   : > { %713 = vperm.xlu0 %3418, %v674_v2   ;;  %698 = vperm.xlu2 %3420, %v671_v3   ;;  %v615_v21 = vld [vmem:[%s3735_s24 + $0x28] sm:$0xff]  ;;  %v616_v22 = vld [vmem:[%s3735_s24 + $0x30] sm:$0xff]  ;;  %v3871_v25 = vld [vmem:[%s5213_s1 + $0x30] sm:$0xff] }
  0x68   : > { %3146 = vmatpush.msk.msrb.mxu2 %vm749_vm0, %v648_v4  ;;  %3156 = vmatpush.msk.msrb.mxu3 %vm749_vm0, %v649_v5  ;;  %v3858_v24 = vld [vmem:[%s5213_s1 + $0x28] sm:$0xff]  ;;  %v3887_v27 = vld [vmem:[%s5213_s1 + $0x38] sm:$0xff]  ;;  %v1654_v28 = vld [vmem:[%s5214_s4 + $0x10] sm:$0xff] }
  0x69   : > { %3126 = vmatpush.msk.msrb.mxu0 %vm749_vm0, %v646_v10  ;;  %3136 = vmatpush.msk.msrb.mxu1 %vm749_vm0, %v647_v11  ;;  %v1657_v26 = vld [vmem:[%s5214_s4 + $0x28] sm:$0xff]  ;;  %v3903_v29 = vld [vmem:[%s5213_s1 + $0x40] sm:$0xff]  ;;  %v2364_v30 = vld [vmem:[#allocation3] sm:$0x1]  ;;  %s3011_s1 = sshll.u32 %s608_s17, 4  ;;  %s3012_s1 = int_to_ptr.vmem [resolvable:$true] %s3011_s1 }
  0x6a   : > { %1076 = vmatpush.msrb.mxu2 %v632_v14  ;;  %1120 = vmatpush.msrb.mxu3 %v633_v15  ;;  %v1656_v31 = vld [vmem:[%s5214_s4 + $0x20] sm:$0xff]  ;;  %v653_v33 = vld [vmem:[%s3735_s24 + $0x158] sm:$0xf]  ;;  %v2809_v36 = vld [vmem:[%s5196_s10 + $0x10] sm:$0xff] }
  0x6b   : > { %988 = vmatpush.msrb.mxu0 %v630_v18  ;;  %1032 = vmatpush.msrb.mxu1 %v631_v19  ;;  %v652_v32 = vld [vmem:[%s3735_s24 + $0x150] sm:$0xf]  ;;  %v2734_v34 = vld [vmem:[%s5194_s8 + $0x8] sm:$0xff]  ;;  %v2736_v37 = vld [vmem:[%s5194_s8 + $0x18] sm:$0xff] }
  0x6c   : > { %3088 = vmatmul.msk.f32.gmra.mxu0 %vm721_vm1, %v3782_v6  ;;  %1077 = vmatpush.msrb.mxu2 %v616_v22  ;;  %v1653_v35 = vld [vmem:[%s5214_s4 + $0x8] sm:$0xff]  ;;  %v650_v38 = vld [vmem:[%s3735_s24 + $0x140] sm:$0xf]  ;;  %v651_v39 = vld [vmem:[%s3735_s24 + $0x148] sm:$0xf] }
  0x6d   : > { %3098 = vmatmul.msk.f32.gmra.mxu1 %vm721_vm1, %v3782_v6  ;;  %3108 = vmatmul.msk.f32.gmra.mxu2 %vm721_vm1, %v3782_v6  ;;  %v2884_v40 = vld [vmem:[%s5198_s12 + $0x18] sm:$0xff]  ;;  %v2733_v41 = vld [vmem:[%s5194_s8] sm:$0xff]  ;;  %v637_v43 = vld [vmem:[%s3735_s24 + $0xd8] sm:$0xff] }
  0x6e   : > { %3118 = vmatmul.msk.f32.gmra.mxu3 %vm721_vm1, %v3782_v6  ;;  %683 = vperm.xlu1 %3419, %v668_v7   ;;  %v636_v42 = vld [vmem:[%s3735_s24 + $0xd0] sm:$0xff]  ;;  %v2883_v46 = vld [vmem:[%s5198_s12 + $0x10] sm:$0xff]  ;;  %v1655_v47 = vld [vmem:[%s5214_s4 + $0x18] sm:$0xff] }
  0x6f   : > { %688 = vperm.xlu0 %3418, %v669_v8   ;;  %693 = vperm.xlu2 %3420, %v670_v9   ;;  %v2881_v44 = vld [vmem:[%s5198_s12] sm:$0xff]  ;;  %v2808_v45 = vld [vmem:[%s5196_s10 + $0x8] sm:$0xff]  ;;  %v634_v48 = vld [vmem:[%s3735_s24 + $0xc0] sm:$0xff] }
  0x70   : > { %1121 = vmatpush.msrb.mxu3 %v617_v23  ;;  %989 = vmatpush.msrb.mxu0 %v614_v20  ;;  %v635_v49 = vld [vmem:[%s3735_s24 + $0xc8] sm:$0xff]  ;;  %v618_v50 = vld [vmem:[%s3735_s24 + $0x40] sm:$0xff]  ;;  %v620_v52 = vld [vmem:[%s3735_s24 + $0x50] sm:$0xff] }
  0x71   : > { %1033 = vmatpush.msrb.mxu1 %v615_v21  ;;  %3186 = vmatpush.msk.msra.mxu2 %vm749_vm0, %v652_v32  ;;  %v619_v51 = vld [vmem:[%s3735_s24 + $0x48] sm:$0xff]  ;;  %v621_v53 = vld [vmem:[%s3735_s24 + $0x58] sm:$0xff]  ;;  %v656_v7 = vld [vmem:[%s3735_s24 + $0x170] sm:$0xf] }
  0x72   : > { %3196 = vmatpush.msk.msra.mxu3 %vm749_vm0, %v653_v33  ;;  %3166 = vmatpush.msk.msra.mxu0 %vm749_vm0, %v650_v38  ;;  %v2967_v54 = vld [vmem:[%s5200_s14] sm:$0xf]  ;;  %v2735_v56 = vld [vmem:[%s5194_s8 + $0x10] sm:$0xff]  ;;  %v2810_v59 = vld [vmem:[%s5196_s10 + $0x18] sm:$0xff] }
  0x73   : > { %3176 = vmatpush.msk.msra.mxu1 %vm749_vm0, %v651_v39  ;;  %1252 = vmatpush.msra.mxu2 %v636_v42  ;;  %v1652_v55 = vld [vmem:[%s5214_s4] sm:$0xff]  ;;  %v657_v8 = vld [vmem:[%s3735_s24 + $0x178] sm:$0xf]  ;;  %v654_v21 = vld [vmem:[%s3735_s24 + $0x160] sm:$0xf] }
  0x74   : > { %3089 = vmatmul.msk.f32.gmra.mxu0 %vm721_vm1, %v3808_v12  ;;  %1296 = vmatpush.msra.mxu3 %v637_v43  ;;  %v2807_v1 = vld [vmem:[%s5196_s10] sm:$0xff]  ;;  %v2882_v9 = vld [vmem:[%s5198_s12 + $0x8] sm:$0xff]  ;;  %v655_v22 = vld [vmem:[%s3735_s24 + $0x168] sm:$0xf] }
  0x75   : > { %3099 = vmatmul.msk.f32.gmra.mxu1 %vm721_vm1, %v3808_v12  ;;  %3109 = vmatmul.msk.f32.gmra.mxu2 %vm721_vm1, %v3808_v12  ;;  %v638_v23 = vld [vmem:[%s3735_s24 + $0xe0] sm:$0xff]  ;;  %v625_v38 = vld [vmem:[%s3735_s24 + $0x78] sm:$0xff] }
  0x76   : > { %3119 = vmatmul.msk.f32.gmra.mxu3 %vm721_vm1, %v3808_v12  ;;  %1680 = vperm.xlu1 %3419, %v1656_v31  }
  0x77   : > { %678 = vperm.xlu2 %3420, %v667_v13   ;;  %1685 = vperm.xlu0 %3418, %v1657_v26   ;;  %v639_v26 = vld [vmem:[%s3735_s24 + $0xe8] sm:$0xff] }
  0x78   : > { %1164 = vmatpush.msra.mxu0 %v634_v48  ;;  %1208 = vmatpush.msra.mxu1 %v635_v49 }
  0x79   : > { %1253 = vmatpush.msra.mxu2 %v620_v52  ;;  %1297 = vmatpush.msra.mxu3 %v621_v53 }
  0x7a   : > { %1165 = vmatpush.msra.mxu0 %v618_v50  ;;  %1209 = vmatpush.msra.mxu1 %v619_v51 }
  0x7c   : > { %3090 = vmatmul.msk.f32.gmra.mxu0 %vm721_vm1, %v3826_v16 }
  0x7d   : > { %3100 = vmatmul.msk.f32.gmra.mxu1 %vm721_vm1, %v3826_v16  ;;  %3110 = vmatmul.msk.f32.gmra.mxu2 %vm721_vm1, %v3826_v16 }
  0x7e   : > { %3120 = vmatmul.msk.f32.gmra.mxu3 %vm721_vm1, %v3826_v16  ;;  %1665 = vperm.xlu1 %3419, %v1653_v35   ;;  %v640_v35 = vld [vmem:[%s3735_s24 + $0xf0] sm:$0xff] }
  0x7f   : > { %1670 = vperm.xlu0 %3418, %v1654_v28   ;;  %1675 = vperm.xlu2 %3420, %v1655_v47   ;;  %v622_v28 = vld [vmem:[%s3735_s24 + $0x60] sm:$0xff] }
  0x84   : > { %3091 = vmatmul.msk.f32.gmra.mxu0 %vm721_vm1, %v3839_v17 }
  0x85   : > { %3101 = vmatmul.msk.f32.gmra.mxu1 %vm721_vm1, %v3839_v17  ;;  %3111 = vmatmul.msk.f32.gmra.mxu2 %vm721_vm1, %v3839_v17 }
  0x86   : > { %3121 = vmatmul.msk.f32.gmra.mxu3 %vm721_vm1, %v3839_v17  ;;  %2754 = vperm.xlu1 %3419, %v2736_v37   ;;  %v624_v37 = vld [vmem:[%s3735_s24 + $0x70] sm:$0xff] }
  0x87   : > { %2367 = vperm.xlu0 %3418, %v2364_v30   ;;  %1660 = vperm.xlu2 %3420, %v1652_v55   ;;  %v623_v30 = vld [vmem:[%s3735_s24 + $0x68] sm:$0xff] }
  0x8c   : > { %3092 = vmatmul.msk.f32.gmra.mxu0 %vm721_vm1, %v3858_v24 }
  0x8d   : > { %3102 = vmatmul.msk.f32.gmra.mxu1 %vm721_vm1, %v3858_v24  ;;  %3112 = vmatmul.msk.f32.gmra.mxu2 %vm721_vm1, %v3858_v24 }
  0x8e   : > { %3122 = vmatmul.msk.f32.gmra.mxu3 %vm721_vm1, %v3858_v24  ;;  %2739 = vperm.xlu1 %3419, %v2733_v41  }
  0x8f   : > { %2744 = vperm.xlu0 %3418, %v2734_v34   ;;  %2749 = vperm.xlu2 %3420, %v2735_v56  }
  0x94   : > { %3093 = vmatmul.msk.f32.gmra.mxu0 %vm721_vm1, %v3871_v25 }
  0x95   : > { %3103 = vmatmul.msk.f32.gmra.mxu1 %vm721_vm1, %v3871_v25  ;;  %3113 = vmatmul.msk.f32.gmra.mxu2 %vm721_vm1, %v3871_v25 }
  0x96   : > { %3123 = vmatmul.msk.f32.gmra.mxu3 %vm721_vm1, %v3871_v25  ;;  %2818 = vperm.xlu1 %3419, %v2808_v45  }
  0x97   : > { %2823 = vperm.xlu0 %3418, %v2809_v36   ;;  %2828 = vperm.xlu2 %3420, %v2810_v59   ;;  %v641_v36 = vld [vmem:[%s3735_s24 + $0xf8] sm:$0xff]  ;;  %s3009_s24 = scalar_lea.hbm %s5201_s15, %s3372_s19  ;;  %s3443_s19 = scalar_lea.hbm %s5201_s15, 16 }
  0x98   : > { %s3013_s18 = sshll.u32 %s3009_s24, 4  ;;  %s3014_s18 = int_to_ptr.hbm [resolvable:$true] %s3013_s18 }
  0x99   : > { %s3437_s2 = sshra.s32 %s3014_s18, 4  ;;  %s3438_s2 = int_to_ptr.hbm [resolvable:$true] %s3437_s2 }
  0x9a   : > { %s3439_s28 = scalar_lea.hbm %s3438_s2, 4  ;;  %p3444_p2 = scmp.lt.s32.totalorder %s3438_s2, %s5201_s15 }
  0x9b   : > { %p3440_p13 = scmp.ne.s32.totalorder %s3438_s2, %s3439_s28  ;;  %p3445_p3 = scmp.lt.s32.totalorder %s3443_s19, %s3439_s28 }
  0x9c   : > { %3094 = vmatmul.msk.f32.gmra.mxu0 %vm721_vm1, %v3887_v27 }
  0x9d   : > { %3104 = vmatmul.msk.f32.gmra.mxu1 %vm721_vm1, %v3887_v27  ;;  %3114 = vmatmul.msk.f32.gmra.mxu2 %vm721_vm1, %v3887_v27  ;;  %p3441_p0 = pnand %p3440_p13, %p3609_p6  ;;  %p3446_p4 = por %p3445_p3, %p3444_p2 }
  0x9e   : > { %3124 = vmatmul.msk.f32.gmra.mxu3 %vm721_vm1, %v3887_v27  ;;  %2897 = vperm.xlu1 %3419, %v2883_v46  }
  0x9f   : > { %2902 = vperm.xlu0 %3418, %v2884_v40   ;;  %2813 = vperm.xlu2 %3420, %v2807_v1   ;;  %p3442_p1 = pneg %p3441_p0 }
  0xa1   : > { %p3447_p5 = pnand %p3446_p4, %p3442_p1 }
  0xa4   : > { %3095 = vmatmul.msk.f32.gmra.mxu0 %vm721_vm1, %v3903_v29 }
  0xa5   : > { %3105 = vmatmul.msk.f32.gmra.mxu1 %vm721_vm1, %v3903_v29  ;;  %3115 = vmatmul.msk.f32.gmra.mxu2 %vm721_vm1, %v3903_v29 }
  0xa6   : > { %3125 = vmatmul.msk.f32.gmra.mxu3 %vm721_vm1, %v3903_v29  ;;  %2970 = vperm.xlu1 %3419, %v2967_v54  }
  0xa7   : > { %2887 = vperm.xlu0 %3418, %v2881_v44   ;;  %2892 = vperm.xlu2 %3420, %v2882_v9  }
  0xac   : > { %3127 = vmatmul.msk.f32.vlgmr.msrb.gmra.mxu0 %vm721_vm1, %v3756_v0 }
  0xad   : > { %3137 = vmatmul.msk.f32.vlgmr.msrb.gmra.mxu1 %vm721_vm1, %v3756_v0  ;;  %3147 = vmatmul.msk.f32.vlgmr.msrb.gmra.mxu2 %vm721_vm1, %v3756_v0 }
  0xae   : > { %3157 = vmatmul.msk.f32.vlgmr.msrb.gmra.mxu3 %vm721_vm1, %v3756_v0  ;;  %3226 = vmatpush.msk.msrb.mxu2 %vm749_vm0, %v656_v7 }
  0xaf   : > { %3236 = vmatpush.msk.msrb.mxu3 %vm749_vm0, %v657_v8  ;;  %3206 = vmatpush.msk.msrb.mxu0 %vm749_vm0, %v654_v21 }
  0xb0   : > { %3216 = vmatpush.msk.msrb.mxu1 %vm749_vm0, %v655_v22  ;;  %1428 = vmatpush.msrb.mxu2 %v640_v35 }
  0xb1   : > { %1340 = vmatpush.msrb.mxu0 %v638_v23  ;;  %1472 = vmatpush.msrb.mxu3 %v641_v36 }
  0xb2   : > { %1384 = vmatpush.msrb.mxu1 %v639_v26  ;;  %1429 = vmatpush.msrb.mxu2 %v624_v37 }
  0xb3   : > { %1341 = vmatpush.msrb.mxu0 %v622_v28  ;;  %1473 = vmatpush.msrb.mxu3 %v625_v38 }
  0xb4   : > { %3128 = vmatmul.msk.f32.gmra.mxu0 %vm721_vm1, %v3782_v6  ;;  %1385 = vmatpush.msrb.mxu1 %v623_v30 }
  0xb5   : > { %3138 = vmatmul.msk.f32.gmra.mxu1 %vm721_vm1, %v3782_v6  ;;  %3148 = vmatmul.msk.f32.gmra.mxu2 %vm721_vm1, %v3782_v6 }
  0xb6   : > { %3158 = vmatmul.msk.f32.gmra.mxu3 %vm721_vm1, %v3782_v6 }
  0xbc   : > { %3129 = vmatmul.msk.f32.gmra.mxu0 %vm721_vm1, %v3808_v12 }
  0xbd   : > { %3139 = vmatmul.msk.f32.gmra.mxu1 %vm721_vm1, %v3808_v12  ;;  %3149 = vmatmul.msk.f32.gmra.mxu2 %vm721_vm1, %v3808_v12 }
  0xbe   : > { %3159 = vmatmul.msk.f32.gmra.mxu3 %vm721_vm1, %v3808_v12 }
  0xc1   : > { %v4160_v49 = vpop.permute.xlu2 %698 }
  0xc4   : > { %3130 = vmatmul.msk.f32.gmra.mxu0 %vm721_vm1, %v3826_v16 }
  0xc5   : > { %3140 = vmatmul.msk.f32.gmra.mxu1 %vm721_vm1, %v3826_v16  ;;  %3150 = vmatmul.msk.f32.gmra.mxu2 %vm721_vm1, %v3826_v16 }
  0xc6   : > { %3160 = vmatmul.msk.f32.gmra.mxu3 %vm721_vm1, %v3826_v16 }
  0xc9   : > { %v4184_v28 = vpop.permute.xlu2 %693 }
  0xcc   : > { %3131 = vmatmul.msk.f32.gmra.mxu0 %vm721_vm1, %v3839_v17 }
  0xcd   : > { %3141 = vmatmul.msk.f32.gmra.mxu1 %vm721_vm1, %v3839_v17  ;;  %3151 = vmatmul.msk.f32.gmra.mxu2 %vm721_vm1, %v3839_v17 }
  0xce   : > { %3161 = vmatmul.msk.f32.gmra.mxu3 %vm721_vm1, %v3839_v17 }
  0xcf   : > { %v4148_v43 = vpop.permute.xlu0 %718  ;;  %v4154_v48 = vpop.permute.xlu1 %708 }
  0xd4   : > { %3132 = vmatmul.msk.f32.gmra.mxu0 %vm721_vm1, %v3858_v24 }
  0xd5   : > { %3142 = vmatmul.msk.f32.gmra.mxu1 %vm721_vm1, %v3858_v24  ;;  %3152 = vmatmul.msk.f32.gmra.mxu2 %vm721_vm1, %v3858_v24 }
  0xd6   : > { %3162 = vmatmul.msk.f32.gmra.mxu3 %vm721_vm1, %v3858_v24 }
  0xd8   : > { %v4178_v26 = vpop.permute.xlu1 %703 }
  0xd9   : > { %v4166_v50 = vpop.permute.xlu0 %713 }
  0xdc   : > { %3133 = vmatmul.msk.f32.gmra.mxu0 %vm721_vm1, %v3871_v25 }
  0xdd   : > { %3143 = vmatmul.msk.f32.gmra.mxu1 %vm721_vm1, %v3871_v25  ;;  %3153 = vmatmul.msk.f32.gmra.mxu2 %vm721_vm1, %v3871_v25 }
  0xde   : > { %3163 = vmatmul.msk.f32.gmra.mxu3 %vm721_vm1, %v3871_v25 }
  0xe1   : > { %v4027_v57 = vpop.f32.mrf.mxu0 }
  0xe2   : > { %v4029_v58 = vpop.f32.mrf.mxu1 }
  0xe4   : > { %3134 = vmatmul.msk.f32.gmra.mxu0 %vm721_vm1, %v3887_v27 }
  0xe5   : > { %3144 = vmatmul.msk.f32.gmra.mxu1 %vm721_vm1, %v3887_v27  ;;  %3154 = vmatmul.msk.f32.gmra.mxu2 %vm721_vm1, %v3887_v27 }
  0xe6   : > { %3164 = vmatmul.msk.f32.gmra.mxu3 %vm721_vm1, %v3887_v27 }
  0xe8   : > { %v4042_v60 = vpop.f32.mrf.mxu2 }
  0xe9   : > { %v4044_v61 = vpop.f32.mrf.mxu3  ;;  %v4046_v62 = vpop.f32.mrf.mxu0 }
  0xea   : > { %v4048_v63 = vpop.f32.mrf.mxu1 }
  0xec   : > { %3135 = vmatmul.msk.f32.gmra.mxu0 %vm721_vm1, %v3903_v29 }
  0xed   : > { %3145 = vmatmul.msk.f32.gmra.mxu1 %vm721_vm1, %v3903_v29  ;;  %3155 = vmatmul.msk.f32.gmra.mxu2 %vm721_vm1, %v3903_v29 }
  0xee   : > { %3165 = vmatmul.msk.f32.gmra.mxu3 %vm721_vm1, %v3903_v29 }
  0xf0   : > { %v4061_v2 = vpop.f32.mrf.mxu2 }
  0xf1   : > { %v4063_v3 = vpop.f32.mrf.mxu3  ;;  %v4065_v4 = vpop.f32.mrf.mxu0 }
  0xf2   : > { %v4067_v5 = vpop.f32.mrf.mxu1 }
  0xf4   : > { %3167 = vmatmul.msk.f32.vlgmr.msra.gmra.mxu0 %vm721_vm1, %v3756_v0 }
  0xf5   : > { %3177 = vmatmul.msk.f32.vlgmr.msra.gmra.mxu1 %vm721_vm1, %v3756_v0  ;;  %3187 = vmatmul.msk.f32.vlgmr.msra.gmra.mxu2 %vm721_vm1, %v3756_v0 }
  0xf6   : > { %3197 = vmatmul.msk.f32.vlgmr.msra.gmra.mxu3 %vm721_vm1, %v3756_v0 }
  0xf8   : > { %v4084_v10 = vpop.f32.mrf.mxu2 }
  0xf9   : > { %v4086_v11 = vpop.f32.mrf.mxu3  ;;  %v4088_v13 = vpop.f32.mrf.mxu0 }
  0xfa   : > { %v4090_v14 = vpop.f32.mrf.mxu1 }
  0xfc   : > { %3168 = vmatmul.msk.f32.gmra.mxu0 %vm721_vm1, %v3782_v6 }
  0xfd   : > { %3178 = vmatmul.msk.f32.gmra.mxu1 %vm721_vm1, %v3782_v6  ;;  %3188 = vmatmul.msk.f32.gmra.mxu2 %vm721_vm1, %v3782_v6 }
  0xfe   : > { %3198 = vmatmul.msk.f32.gmra.mxu3 %vm721_vm1, %v3782_v6 }
 0x100   : > { %v4100_v15 = vpop.f32.mrf.mxu2 }
 0x101   : > { %v4102_v18 = vpop.f32.mrf.mxu3  ;;  %v4104_v19 = vpop.f32.mrf.mxu0 }
 0x102   : > { %v4106_v20 = vpop.f32.mrf.mxu1 }
 0x104   : > { %3169 = vmatmul.msk.f32.gmra.mxu0 %vm721_vm1, %v3808_v12 }
 0x105   : > { %3179 = vmatmul.msk.f32.gmra.mxu1 %vm721_vm1, %v3808_v12  ;;  %3189 = vmatmul.msk.f32.gmra.mxu2 %vm721_vm1, %v3808_v12 }
 0x106   : > { %3199 = vmatmul.msk.f32.gmra.mxu3 %vm721_vm1, %v3808_v12 }
 0x108   : > { %v4124_v31 = vpop.f32.mrf.mxu2 }
 0x109   : > { %v4126_v32 = vpop.f32.mrf.mxu3  ;;  %v830_v33 = vpop.f32.mrf.mxu0 }
 0x10a   : > { %v874_v34 = vpop.f32.mrf.mxu1  ;;  %v831_v30 = vadd.f32 %v830_v33, %v4178_v26  ;;  %v872_v33 = vadd.f32 %v4106_v20, %v4160_v49 }
 0x10b   : > { %v875_v35 = vadd.f32 %v874_v34, %v4178_v26 }
 0x10c   : > { %3170 = vmatmul.msk.f32.gmra.mxu0 %vm721_vm1, %v3826_v16 }
 0x10d   : > { %3180 = vmatmul.msk.f32.gmra.mxu1 %vm721_vm1, %v3826_v16  ;;  %3190 = vmatmul.msk.f32.gmra.mxu2 %vm721_vm1, %v3826_v16 }
 0x10e   : > { %3200 = vmatmul.msk.f32.gmra.mxu3 %vm721_vm1, %v3826_v16 }
 0x110   : > { %v4140_v39 = vpop.f32.mrf.mxu2 }
 0x111   : > { %v4142_v40 = vpop.f32.mrf.mxu3  ;;  %v833_v41 = vpop.f32.mrf.mxu0 }
 0x112   : > { %v877_v42 = vpop.f32.mrf.mxu1  ;;  %v834_v7 = vadd.f32 %v833_v41, %v4154_v48 }
 0x113   : > { %v878_v8 = vadd.f32 %v877_v42, %v4154_v48 }
 0x114   : > { %3171 = vmatmul.msk.f32.gmra.mxu0 %vm721_vm1, %v3839_v17  ;;  %v1598_v36 = vmax.f32 %v834_v7, 0.0  ;;  %v869_v7 = vadd.f32 %v4090_v14, %v4184_v28  ;;  %v1567_v14 = vmax.f32 %v872_v33, 0.0  ;;  %v4238_v33 = vpop.permute.xlu2 %678 }
 0x115   : > { %3181 = vmatmul.msk.f32.gmra.mxu1 %vm721_vm1, %v3839_v17  ;;  %3191 = vmatmul.msk.f32.gmra.mxu2 %vm721_vm1, %v3839_v17  ;;  %v1599_v37 = vmax.f32 %v878_v8, 0.0  ;;  %v1582_v8 = vmax.f32 %v831_v30, 0.0 }
 0x116   : > { %3201 = vmatmul.msk.f32.gmra.mxu3 %vm721_vm1, %v3839_v17 }
 0x118   : > { %v921_v44 = vpop.f32.mrf.mxu2 }
 0x119   : > { %v965_v45 = vpop.f32.mrf.mxu3  ;;  %v836_v46 = vpop.f32.mrf.mxu0  ;;  %v922_v20 = vadd.f32 %v921_v44, %v4154_v48  ;;  %v919_v44 = vadd.f32 %v4140_v39, %v4178_v26 }
 0x11a   : > { %v880_v47 = vpop.f32.mrf.mxu1  ;;  %v837_v51 = vadd.f32 %v836_v46, %v4166_v50 }
 0x11b   : > { %v881_v52 = vadd.f32 %v880_v47, %v4166_v50 }
 0x11c   : > { %3172 = vmatmul.msk.f32.gmra.mxu0 %vm721_vm1, %v3858_v24  ;;  %v1614_v9 = vmax.f32 %v837_v51, 0.0 }
 0x11d   : > { %3182 = vmatmul.msk.f32.gmra.mxu1 %vm721_vm1, %v3858_v24  ;;  %3192 = vmatmul.msk.f32.gmra.mxu2 %vm721_vm1, %v3858_v24  ;;  %v1615_v21 = vmax.f32 %v881_v52, 0.0  ;;  %v828_v52 = vadd.f32 %v4104_v19, %v4160_v49  ;;  %v4208_v19 = vpop.permute.xlu0 %688 }
 0x11e   : > { %3202 = vmatmul.msk.f32.gmra.mxu3 %vm721_vm1, %v3858_v24 }
 0x120   : > { %v924_v53 = vpop.f32.mrf.mxu2 }
 0x121   : > { %v968_v54 = vpop.f32.mrf.mxu3  ;;  %v839_v55 = vpop.f32.mrf.mxu0  ;;  %v925_v34 = vadd.f32 %v924_v53, %v4166_v50  ;;  %v966_v53 = vadd.f32 %v965_v45, %v4154_v48  ;;  %v963_v45 = vadd.f32 %v4142_v40, %v4178_v26 }
 0x122   : > { %v883_v56 = vpop.f32.mrf.mxu1  ;;  %v840_v59 = vadd.f32 %v839_v55, %v4148_v43  ;;  %v969_v55 = vadd.f32 %v968_v54, %v4166_v50  ;;  %v822_v54 = vadd.f32 %v4065_v4, %v4208_v19 }
 0x123   : > { %v884_v1 = vadd.f32 %v883_v56, %v4148_v43 }
 0x124   : > { %v1630_v22 = vmax.f32 %v840_v59, 0.0  ;;  %3173 = vmatmul.msk.f32.gmra.mxu0 %vm721_vm1, %v3871_v25  ;;  %v1617_v30 = vmax.f32 %v969_v55, 0.0  ;;  %v1534_v40 = vmax.f32 %v822_v54, 0.0  ;;  %v960_v55 = vadd.f32 %v4126_v32, %v4160_v49 }
 0x125   : > { %v1631_v23 = vmax.f32 %v884_v1, 0.0  ;;  %3183 = vmatmul.msk.f32.gmra.mxu1 %vm721_vm1, %v3871_v25  ;;  %3193 = vmatmul.msk.f32.gmra.mxu2 %vm721_vm1, %v3871_v25  ;;  %v825_v1 = vadd.f32 %v4088_v13, %v4184_v28  ;;  %v1566_v13 = vmax.f32 %v828_v52, 0.0 }
 0x126   : > { %3203 = vmatmul.msk.f32.gmra.mxu3 %vm721_vm1, %v3871_v25  ;;  %1714 = vmatpush.msra.mxu0 %v1630_v22  ;;  %v4220_v22 = vpop.permute.xlu1 %683 }
 0x127   : > { %1749 = vmatpush.msra.mxu1 %v1631_v23  ;;  %v1616_v23 = vmax.f32 %v925_v34, 0.0  ;;  %v863_v52 = vadd.f32 %v4048_v63, %v4220_v22  ;;  %v916_v34 = vadd.f32 %v4124_v31, %v4160_v49  ;;  %v860_v63 = vadd.f32 %v4029_v58, %v4238_v33 }
 0x128   : > { %v927_v38 = vpop.f32.mrf.mxu2  ;;  %1715 = vmatpush.msra.mxu0 %v1614_v9  ;;  %v1583_v9 = vmax.f32 %v875_v35, 0.0  ;;  %v1550_v35 = vmax.f32 %v825_v1, 0.0  ;;  %v913_v1 = vadd.f32 %v4100_v15, %v4184_v28  ;;  %v957_v31 = vadd.f32 %v4102_v18, %v4184_v28 }
 0x129   : > { %v971_v41 = vpop.f32.mrf.mxu3  ;;  %1750 = vmatpush.msra.mxu1 %v1615_v21  ;;  %v928_v42 = vadd.f32 %v927_v38, %v4148_v43  ;;  %v4190_v47 = vpop.f32.mrf.mxu0  ;;  %v866_v21 = vadd.f32 %v4067_v5, %v4208_v19  ;;  %v1600_v5 = vmax.f32 %v922_v20, 0.0  ;;  %v1601_v38 = vmax.f32 %v966_v53, 0.0 }
 0x12a   : > { %v972_v46 = vadd.f32 %v971_v41, %v4148_v43  ;;  %v4192_v51 = vpop.f32.mrf.mxu1  ;;  %1716 = vmatpush.msra.mxu0 %v1598_v36  ;;  %v1551_v36 = vmax.f32 %v869_v7, 0.0  ;;  %v1519_v7 = vmax.f32 %v863_v52, 0.0  ;;  %v954_v58 = vadd.f32 %v4086_v11, %v4208_v19 }
 0x12b   : > { %1751 = vmatpush.msra.mxu1 %v1599_v37  ;;  %v1632_v56 = vmax.f32 %v928_v42, 0.0  ;;  %v1535_v42 = vmax.f32 %v866_v21, 0.0  ;;  %v1568_v15 = vmax.f32 %v916_v34, 0.0  ;;  %v951_v11 = vadd.f32 %v4063_v3, %v4220_v22 }
 0x12c   : > { %v1633_v59 = vmax.f32 %v972_v46, 0.0  ;;  %3174 = vmatmul.msk.f32.gmra.mxu0 %vm721_vm1, %v3887_v27  ;;  %v819_v46 = vadd.f32 %v4046_v62, %v4220_v22  ;;  %v816_v62 = vadd.f32 %v4027_v57, %v4238_v33  ;;  %v910_v57 = vadd.f32 %v4084_v10, %v4208_v19 }
 0x12d   : > { %3184 = vmatmul.msk.f32.gmra.mxu1 %vm721_vm1, %v3887_v27  ;;  %3194 = vmatmul.msk.f32.gmra.mxu2 %vm721_vm1, %v3887_v27  ;;  %v907_v10 = vadd.f32 %v4061_v2, %v4220_v22 }
 0x12e   : > { %3204 = vmatmul.msk.f32.gmra.mxu3 %vm721_vm1, %v3887_v27  ;;  %1717 = vmatpush.msra.mxu0 %v1582_v8  ;;  %v1518_v32 = vmax.f32 %v819_v46, 0.0  ;;  %v1569_v8 = vmax.f32 %v960_v55, 0.0  ;;  %v1502_v18 = vmax.f32 %v816_v62, 0.0  ;;  %v1536_v2 = vmax.f32 %v910_v57, 0.0 }
 0x12f   : > { %1752 = vmatpush.msra.mxu1 %v1583_v9  ;;  %1784 = vmatpush.msra.mxu2 %v1632_v56  ;;  %v1584_v56 = vmax.f32 %v919_v44, 0.0  ;;  %v1503_v9 = vmax.f32 %v860_v63, 0.0  ;;  %v904_v44 = vadd.f32 %v4042_v60, %v4238_v33  ;;  %v1520_v3 = vmax.f32 %v907_v10, 0.0 }
 0x130   : > { %1819 = vmatpush.msra.mxu3 %v1633_v59  ;;  %1718 = vmatpush.msra.mxu0 %v1566_v13  ;;  %v4226_v4 = vpop.f32.mrf.mxu2  ;;  %v1585_v59 = vmax.f32 %v963_v45, 0.0  ;;  %v1552_v13 = vmax.f32 %v913_v1, 0.0  ;;  %v948_v45 = vadd.f32 %v4044_v61, %v4238_v33 }
 0x131   : > { %1753 = vmatpush.msra.mxu1 %v1567_v14  ;;  %v4228_v37 = vpop.f32.mrf.mxu3  ;;  %1785 = vmatpush.msra.mxu2 %v1616_v23  ;;  %v4230_v39 = vpop.f32.mrf.mxu0  ;;  %v1553_v14 = vmax.f32 %v957_v31, 0.0  ;;  %v1537_v23 = vmax.f32 %v954_v58, 0.0 }
 0x132   : > { %1820 = vmatpush.msra.mxu3 %v1617_v30  ;;  %v4232_v41 = vpop.f32.mrf.mxu1  ;;  %1719 = vmatpush.msra.mxu0 %v1550_v35  ;;  %v1521_v30 = vmax.f32 %v951_v11, 0.0  ;;  %v1504_v35 = vmax.f32 %v904_v44, 0.0 }
 0x133   : > { %1754 = vmatpush.msra.mxu1 %v1551_v36  ;;  %1786 = vmatpush.msra.mxu2 %v1600_v5  ;;  %v1505_v36 = vmax.f32 %v948_v45, 0.0 }
 0x134   : > { %1821 = vmatpush.msra.mxu3 %v1601_v38  ;;  %1720 = vmatpush.msra.mxu0 %v1534_v40 }
 0x135   : > { %1755 = vmatpush.msra.mxu1 %v1535_v42  ;;  %1787 = vmatpush.msra.mxu2 %v1584_v56 }
 0x136   : > { %1822 = vmatpush.msra.mxu3 %v1585_v59  ;;  %3175 = vmatmul.msk.f32.gmra.mxu0 %vm721_vm1, %v3903_v29 }
 0x137   : > { %3185 = vmatmul.msk.f32.gmra.mxu1 %vm721_vm1, %v3903_v29  ;;  %3195 = vmatmul.msk.f32.gmra.mxu2 %vm721_vm1, %v3903_v29 }
 0x138   : > { %3205 = vmatmul.msk.f32.gmra.mxu3 %vm721_vm1, %v3903_v29  ;;  %1721 = vmatpush.msra.mxu0 %v1518_v32  ;;  %v4264_v20 = vpop.f32.mrf.mxu2 }
 0x139   : > { %1756 = vmatpush.msra.mxu1 %v1519_v7  ;;  %v4266_v53 = vpop.f32.mrf.mxu3  ;;  %1788 = vmatpush.msra.mxu2 %v1568_v15  ;;  %v4272_v54 = vpop.f32.mrf.mxu0 }
 0x13a   : > { %1823 = vmatpush.msra.mxu3 %v1569_v8  ;;  %v4274_v21 = vpop.f32.mrf.mxu1  ;;  %1722 = vmatpush.msra.mxu0 %v1502_v18 }
 0x13b   : > { %1757 = vmatpush.msra.mxu1 %v1503_v9  ;;  %1789 = vmatpush.msra.mxu2 %v1552_v13 }
 0x13c   : > { %1824 = vmatpush.msra.mxu3 %v1553_v14 }
 0x13d   : > { %1790 = vmatpush.msra.mxu2 %v1536_v2 }
 0x13e   : > { %1825 = vmatpush.msra.mxu3 %v1537_v23  ;;  %3207 = vmatmul.msk.f32.vlgmr.msrb.gmra.mxu0 %vm721_vm1, %v3756_v0 }
 0x13f   : > { %3217 = vmatmul.msk.f32.vlgmr.msrb.gmra.mxu1 %vm721_vm1, %v3756_v0  ;;  %1791 = vmatpush.msra.mxu2 %v1520_v3 }
 0x140   : > { %1826 = vmatpush.msra.mxu3 %v1521_v30  ;;  %3227 = vmatmul.msk.f32.vlgmr.msrb.gmra.mxu2 %vm721_vm1, %v3756_v0  ;;  %v4288_v60 = vpop.f32.mrf.mxu2 }
 0x141   : > { %3237 = vmatmul.msk.f32.vlgmr.msrb.gmra.mxu3 %vm721_vm1, %v3756_v0  ;;  %v4290_v61 = vpop.f32.mrf.mxu3  ;;  %1792 = vmatpush.msra.mxu2 %v1504_v35  ;;  %v4292_v5 = vpop.f32.mrf.mxu0 }
 0x142   : > { %1827 = vmatpush.msra.mxu3 %v1505_v36  ;;  %v4294_v38 = vpop.f32.mrf.mxu1 }
 0x146   : > { %3208 = vmatmul.msk.f32.gmra.mxu0 %vm721_vm1, %v3782_v6 }
 0x147   : > { %3218 = vmatmul.msk.f32.gmra.mxu1 %vm721_vm1, %v3782_v6 }
 0x148   : > { %3228 = vmatmul.msk.f32.gmra.mxu2 %vm721_vm1, %v3782_v6  ;;  %v4304_v0 = vpop.f32.mrf.mxu2 }
 0x149   : > { %3238 = vmatmul.msk.f32.gmra.mxu3 %vm721_vm1, %v3782_v6  ;;  %v4306_v40 = vpop.f32.mrf.mxu3  ;;  %v1003_v42 = vpop.f32.mrf.mxu0 }
 0x14a   : > { %v1047_v46 = vpop.f32.mrf.mxu1 }
 0x14e   : > { %3209 = vmatmul.msk.f32.gmra.mxu0 %vm721_vm1, %v3808_v12 }
 0x14f   : > { %3219 = vmatmul.msk.f32.gmra.mxu1 %vm721_vm1, %v3808_v12 }
 0x150   : > { %3229 = vmatmul.msk.f32.gmra.mxu2 %vm721_vm1, %v3808_v12  ;;  %v4316_v52 = vpop.f32.mrf.mxu2 }
 0x151   : > { %3239 = vmatmul.msk.f32.gmra.mxu3 %vm721_vm1, %v3808_v12  ;;  %v4318_v6 = vpop.f32.mrf.mxu3  ;;  %v1006_v34 = vpop.f32.mrf.mxu0 }
 0x152   : > { %v1050_v55 = vpop.f32.mrf.mxu1 }
 0x153   : > { %v1051_v14 = vadd.f32 %v1050_v55, %v4178_v26 }
 0x156   : > { %3210 = vmatmul.msk.f32.gmra.mxu0 %vm721_vm1, %v3826_v16 }
 0x157   : > { %3220 = vmatmul.msk.f32.gmra.mxu1 %vm721_vm1, %v3826_v16 }
 0x158   : > { %3230 = vmatmul.msk.f32.gmra.mxu2 %vm721_vm1, %v3826_v16  ;;  %v4328_v56 = vpop.f32.mrf.mxu2 }
 0x159   : > { %3240 = vmatmul.msk.f32.gmra.mxu3 %vm721_vm1, %v3826_v16  ;;  %v4330_v12 = vpop.f32.mrf.mxu3  ;;  %v1009_v59 = vpop.f32.mrf.mxu0 }
 0x15a   : > { %v1053_v62 = vpop.f32.mrf.mxu1  ;;  %v1010_v11 = vadd.f32 %v1009_v59, %v4154_v48  ;;  %v1004_v59 = vadd.f32 %v1003_v42, %v4160_v49 }
 0x15b   : > { %v1054_v13 = vadd.f32 %v1053_v62, %v4154_v48  ;;  %v1048_v62 = vadd.f32 %v1047_v46, %v4160_v49 }
 0x15c   : > { %v1602_v3 = vmax.f32 %v1010_v11, 0.0 }
 0x15d   : > { %v1603_v30 = vmax.f32 %v1054_v13, 0.0 }
 0x15e   : > { %3211 = vmatmul.msk.f32.gmra.mxu0 %vm721_vm1, %v3839_v17 }
 0x15f   : > { %3221 = vmatmul.msk.f32.gmra.mxu1 %vm721_vm1, %v3839_v17 }
 0x160   : > { %3231 = vmatmul.msk.f32.gmra.mxu2 %vm721_vm1, %v3839_v17  ;;  %v1097_v63 = vpop.f32.mrf.mxu2 }
 0x161   : > { %3241 = vmatmul.msk.f32.gmra.mxu3 %vm721_vm1, %v3839_v17  ;;  %v1141_v16 = vpop.f32.mrf.mxu3  ;;  %v1012_v1 = vpop.f32.mrf.mxu0  ;;  %v1098_v42 = vadd.f32 %v1097_v63, %v4154_v48  ;;  %v1095_v63 = vadd.f32 %v4328_v56, %v4178_v26 }
 0x162   : > { %v1056_v31 = vpop.f32.mrf.mxu1  ;;  %v1013_v8 = vadd.f32 %v1012_v1, %v4166_v50  ;;  %v1142_v46 = vadd.f32 %v1141_v16, %v4154_v48  ;;  %v1139_v16 = vadd.f32 %v4330_v12, %v4178_v26 }
 0x163   : > { %v1057_v18 = vadd.f32 %v1056_v31, %v4166_v50  ;;  %v1604_v12 = vmax.f32 %v1098_v42, 0.0 }
 0x164   : > { %v1618_v44 = vmax.f32 %v1013_v8, 0.0  ;;  %v1045_v8 = vadd.f32 %v4294_v38, %v4184_v28  ;;  %v1571_v38 = vmax.f32 %v1048_v62, 0.0 }
 0x165   : > { %v1619_v45 = vmax.f32 %v1057_v18, 0.0 }
 0x166   : > { %3212 = vmatmul.msk.f32.gmra.mxu0 %vm721_vm1, %v3858_v24  ;;  %v1555_v11 = vmax.f32 %v1045_v8, 0.0 }
 0x167   : > { %3222 = vmatmul.msk.f32.gmra.mxu1 %vm721_vm1, %v3858_v24 }
 0x168   : > { %3232 = vmatmul.msk.f32.gmra.mxu2 %vm721_vm1, %v3858_v24  ;;  %v1100_v32 = vpop.f32.mrf.mxu2 }
 0x169   : > { %3242 = vmatmul.msk.f32.gmra.mxu3 %vm721_vm1, %v3858_v24  ;;  %v1144_v7 = vpop.f32.mrf.mxu3  ;;  %v1015_v57 = vpop.f32.mrf.mxu0  ;;  %v1007_v24 = vadd.f32 %v1006_v34, %v4178_v26 }
 0x16a   : > { %v1059_v17 = vpop.f32.mrf.mxu1  ;;  %v1016_v58 = vadd.f32 %v1015_v57, %v4148_v43 }
 0x16b   : > { %v1060_v15 = vadd.f32 %v1059_v17, %v4148_v43  ;;  %v1586_v1 = vmax.f32 %v1007_v24, 0.0  ;;  %v1101_v17 = vadd.f32 %v1100_v32, %v4166_v50  ;;  %v998_v32 = vadd.f32 %v4272_v54, %v4208_v19 }
 0x16c   : > { %v1634_v9 = vmax.f32 %v1016_v58, 0.0  ;;  %v1145_v58 = vadd.f32 %v1144_v7, %v4166_v50  ;;  %v1570_v7 = vmax.f32 %v1004_v59, 0.0  ;;  %v1605_v24 = vmax.f32 %v1142_v46, 0.0 }
 0x16d   : > { %v1635_v10 = vmax.f32 %v1060_v15, 0.0  ;;  %v1001_v15 = vadd.f32 %v4292_v5, %v4184_v28  ;;  %v1042_v5 = vadd.f32 %v4274_v21, %v4208_v19  ;;  %v1620_v18 = vmax.f32 %v1101_v17, 0.0 }
 0x16e   : > { %3213 = vmatmul.msk.f32.gmra.mxu0 %vm721_vm1, %v3871_v25 }
 0x16f   : > { %3223 = vmatmul.msk.f32.gmra.mxu1 %vm721_vm1, %v3871_v25  ;;  %1854 = vmatpush.msrb.mxu0 %v1634_v9  ;;  %v1621_v9 = vmax.f32 %v1145_v58, 0.0  ;;  %v1080_v58 = vadd.f32 %v4226_v4, %v4238_v33 }
 0x170   : > { %1889 = vmatpush.msrb.mxu1 %v1635_v10  ;;  %3233 = vmatmul.msk.f32.gmra.mxu2 %vm721_vm1, %v3871_v25  ;;  %v1103_v2 = vpop.f32.mrf.mxu2  ;;  %v1554_v10 = vmax.f32 %v1001_v15, 0.0  ;;  %v1124_v15 = vadd.f32 %v4228_v37, %v4238_v33 }
 0x171   : > { %3243 = vmatmul.msk.f32.gmra.mxu3 %vm721_vm1, %v3871_v25  ;;  %v1147_v23 = vpop.f32.mrf.mxu3  ;;  %v1104_v35 = vadd.f32 %v1103_v2, %v4148_v43  ;;  %1855 = vmatpush.msrb.mxu0 %v1618_v44  ;;  %v4366_v34 = vpop.f32.mrf.mxu0  ;;  %v1587_v25 = vmax.f32 %v1051_v14, 0.0  ;;  %v995_v14 = vadd.f32 %v4230_v39, %v4220_v22  ;;  %v1538_v44 = vmax.f32 %v998_v32, 0.0 }
 0x172   : > { %v1148_v36 = vadd.f32 %v1147_v23, %v4148_v43  ;;  %1890 = vmatpush.msrb.mxu1 %v1619_v45  ;;  %v4368_v55 = vpop.f32.mrf.mxu1  ;;  %v1539_v45 = vmax.f32 %v1042_v5, 0.0  ;;  %v1092_v2 = vadd.f32 %v4316_v52, %v4160_v49  ;;  %v1136_v23 = vadd.f32 %v4318_v6, %v4160_v49 }
 0x173   : > { %v1636_v31 = vmax.f32 %v1104_v35, 0.0  ;;  %1856 = vmatpush.msrb.mxu0 %v1602_v3  ;;  %v1588_v3 = vmax.f32 %v1095_v63, 0.0  ;;  %v992_v39 = vadd.f32 %v4190_v47, %v4238_v33  ;;  %v1089_v35 = vadd.f32 %v4304_v0, %v4184_v28  ;;  %v4472_v63 = vld [vmem:[%s5215_s3 + $0x8] sm:$0xff] }
 0x174   : > { %v1637_v57 = vmax.f32 %v1148_v36, 0.0  ;;  %1891 = vmatpush.msrb.mxu1 %v1603_v30  ;;  %v1589_v30 = vmax.f32 %v1139_v16, 0.0  ;;  %v1133_v52 = vadd.f32 %v4306_v40, %v4184_v28  ;;  %v1522_v6 = vmax.f32 %v995_v14, 0.0 }
 0x175   : > { %1857 = vmatpush.msrb.mxu0 %v1586_v1  ;;  %1924 = vmatpush.msrb.mxu2 %v1636_v31  ;;  %v1086_v47 = vadd.f32 %v4288_v60, %v4208_v19  ;;  %v1572_v0 = vmax.f32 %v1092_v2, 0.0  ;;  %v1573_v59 = vmax.f32 %v1136_v23, 0.0  ;;  %v1506_v1 = vmax.f32 %v992_v39, 0.0 }
 0x176   : > { %1892 = vmatpush.msrb.mxu1 %v1587_v25  ;;  %3214 = vmatmul.msk.f32.gmra.mxu0 %vm721_vm1, %v3887_v27  ;;  %v1556_v17 = vmax.f32 %v1089_v35, 0.0  ;;  %v1508_v4 = vmax.f32 %v1080_v58, 0.0  ;;  %v1509_v37 = vmax.f32 %v1124_v15, 0.0 }
 0x177   : > { %3224 = vmatmul.msk.f32.gmra.mxu1 %vm721_vm1, %v3887_v27  ;;  %1959 = vmatpush.msrb.mxu3 %v1637_v57  ;;  %v1127_v57 = vadd.f32 %v4266_v53, %v4220_v22  ;;  %v1540_v8 = vmax.f32 %v1086_v47, 0.0 }
 0x178   : > { %3234 = vmatmul.msk.f32.gmra.mxu2 %vm721_vm1, %v3887_v27  ;;  %v4396_v54 = vpop.f32.mrf.mxu2  ;;  %1858 = vmatpush.msrb.mxu0 %v1570_v7 }
 0x179   : > { %3244 = vmatmul.msk.f32.gmra.mxu3 %vm721_vm1, %v3887_v27  ;;  %v4398_v21 = vpop.f32.mrf.mxu3  ;;  %1893 = vmatpush.msrb.mxu1 %v1571_v38  ;;  %v4400_v56 = vpop.f32.mrf.mxu0  ;;  %v1039_v27 = vadd.f32 %v4232_v41, %v4220_v22  ;;  %v1036_v41 = vadd.f32 %v4192_v51, %v4238_v33  ;;  %v1130_v51 = vadd.f32 %v4290_v61, %v4208_v19  ;;  %v1525_v46 = vmax.f32 %v1127_v57, 0.0 }
 0x17a   : > { %v4402_v13 = vpop.f32.mrf.mxu1  ;;  %1925 = vmatpush.msrb.mxu2 %v1620_v18  ;;  %1960 = vmatpush.msrb.mxu3 %v1621_v9  ;;  %v1083_v61 = vadd.f32 %v4264_v20, %v4220_v22  ;;  %v4451_v20 = vld [vmem:[%s5215_s3] sm:$0xff] }
 0x17b   : > { %1859 = vmatpush.msrb.mxu0 %v1554_v10  ;;  %1894 = vmatpush.msrb.mxu1 %v1555_v11  ;;  %v1523_v36 = vmax.f32 %v1039_v27, 0.0  ;;  %v1507_v25 = vmax.f32 %v1036_v41, 0.0  ;;  %v1541_v42 = vmax.f32 %v1130_v51, 0.0  ;;  %v4493_v11 = vld [vmem:[%s5215_s3 + $0x10] sm:$0xff] }
 0x17c   : > { %1926 = vmatpush.msrb.mxu2 %v1604_v12  ;;  %1961 = vmatpush.msrb.mxu3 %v1605_v24  ;;  %v1524_v53 = vmax.f32 %v1083_v61, 0.0 }
 0x17d   : > { %1860 = vmatpush.msrb.mxu0 %v1538_v44  ;;  %1895 = vmatpush.msrb.mxu1 %v1539_v45  ;;  %v4510_v44 = vld [vmem:[%s5215_s3 + $0x18] sm:$0xff] }
 0x17e   : > { %1927 = vmatpush.msrb.mxu2 %v1588_v3  ;;  %1962 = vmatpush.msrb.mxu3 %v1589_v30  ;;  %v4527_v30 = vld [vmem:[%s5215_s3 + $0x20] sm:$0xff] }
 0x17f   : > { %3215 = vmatmul.msk.f32.gmra.mxu0 %vm721_vm1, %v3903_v29  ;;  %3225 = vmatmul.msk.f32.gmra.mxu1 %vm721_vm1, %v3903_v29 }
 0x180   : > { %3235 = vmatmul.msk.f32.gmra.mxu2 %vm721_vm1, %v3903_v29  ;;  %v4432_v40 = vpop.f32.mrf.mxu2  ;;  %1861 = vmatpush.msrb.mxu0 %v1522_v6  ;;  %v4540_v6 = vld [vmem:[%s5215_s3 + $0x28] sm:$0xff] }
 0x181   : > { %3245 = vmatmul.msk.f32.gmra.mxu3 %vm721_vm1, %v3903_v29  ;;  %v4434_v62 = vpop.f32.mrf.mxu3  ;;  %1896 = vmatpush.msrb.mxu1 %v1523_v36  ;;  %v4436_v60 = vpop.f32.mrf.mxu0  ;;  %v1557_v29 = vmax.f32 %v1133_v52, 0.0 }
 0x182   : > { %v4438_v31 = vpop.f32.mrf.mxu1  ;;  %1928 = vmatpush.msrb.mxu2 %v1572_v0  ;;  %1963 = vmatpush.msrb.mxu3 %v1573_v59 }
 0x183   : > { %1862 = vmatpush.msrb.mxu0 %v1506_v1  ;;  %1897 = vmatpush.msrb.mxu1 %v1507_v25 }
 0x184   : > { %1929 = vmatpush.msrb.mxu2 %v1556_v17  ;;  %1964 = vmatpush.msrb.mxu3 %v1557_v29 }
 0x186   : > { %1930 = vmatpush.msrb.mxu2 %v1540_v8  ;;  %1965 = vmatpush.msrb.mxu3 %v1541_v42 }
 0x187   : > { %3246 = vmatmul.msk.f32.vlgmr.msra.gmra.mxu0 %vm1688_vm2, %v4451_v20  ;;  %3252 = vmatmul.msk.f32.vlgmr.msra.gmra.mxu1 %vm1688_vm2, %v4451_v20 }
 0x188   : > { %1931 = vmatpush.msrb.mxu2 %v1524_v53  ;;  %1966 = vmatpush.msrb.mxu3 %v1525_v46  ;;  %v4457_v32 = vpop.f32.mrf.mxu2 }
 0x189   : > { %v4459_v5 = vpop.f32.mrf.mxu3  ;;  %3258 = vmatmul.msk.f32.vlgmr.msra.gmra.mxu2 %vm1688_vm2, %v4451_v20  ;;  %3264 = vmatmul.msk.f32.vlgmr.msra.gmra.mxu3 %vm1688_vm2, %v4451_v20  ;;  %v4465_v7 = vpop.f32.mrf.mxu0 }
 0x18a   : > { %v4467_v38 = vpop.f32.mrf.mxu1  ;;  %1932 = vmatpush.msrb.mxu2 %v1508_v4  ;;  %1967 = vmatpush.msrb.mxu3 %v1509_v37 }
 0x18f   : > { %3247 = vmatmul.msk.f32.gmra.mxu0 %vm1688_vm2, %v4472_v63  ;;  %3253 = vmatmul.msk.f32.gmra.mxu1 %vm1688_vm2, %v4472_v63 }
 0x190   : > { %v4478_v16 = vpop.f32.mrf.mxu2 }
 0x191   : > { %v4480_v18 = vpop.f32.mrf.mxu3  ;;  %3259 = vmatmul.msk.f32.gmra.mxu2 %vm1688_vm2, %v4472_v63  ;;  %3265 = vmatmul.msk.f32.gmra.mxu3 %vm1688_vm2, %v4472_v63  ;;  %v4486_v9 = vpop.f32.mrf.mxu0 }
 0x192   : > { %v4488_v10 = vpop.f32.mrf.mxu1 }
 0x197   : > { %3248 = vmatmul.msk.f32.gmra.mxu0 %vm1688_vm2, %v4493_v11  ;;  %3254 = vmatmul.msk.f32.gmra.mxu1 %vm1688_vm2, %v4493_v11 }
 0x198   : > { %v4499_v12 = vpop.f32.mrf.mxu2 }
 0x199   : > { %v4501_v24 = vpop.f32.mrf.mxu3  ;;  %3260 = vmatmul.msk.f32.gmra.mxu2 %vm1688_vm2, %v4493_v11  ;;  %3266 = vmatmul.msk.f32.gmra.mxu3 %vm1688_vm2, %v4493_v11  ;;  %v1182_v14 = vpop.f32.mrf.mxu0 }
 0x19a   : > { %v1226_v27 = vpop.f32.mrf.mxu1  ;;  %v1183_v15 = vadd.f32 %v1182_v14, %v4178_v26 }
 0x19b   : > { %v1227_v8 = vadd.f32 %v1226_v27, %v4178_v26 }
 0x19f   : > { %3249 = vmatmul.msk.f32.gmra.mxu0 %vm1688_vm2, %v4510_v44  ;;  %3255 = vmatmul.msk.f32.gmra.mxu1 %vm1688_vm2, %v4510_v44 }
 0x1a0   : > { %v4516_v45 = vpop.f32.mrf.mxu2 }
 0x1a1   : > { %v4518_v2 = vpop.f32.mrf.mxu3  ;;  %3261 = vmatmul.msk.f32.gmra.mxu2 %vm1688_vm2, %v4510_v44  ;;  %3267 = vmatmul.msk.f32.gmra.mxu3 %vm1688_vm2, %v4510_v44  ;;  %v1185_v23 = vpop.f32.mrf.mxu0 }
 0x1a2   : > { %v1229_v3 = vpop.f32.mrf.mxu1  ;;  %v1186_v57 = vadd.f32 %v1185_v23, %v4154_v48 }
 0x1a3   : > { %v1230_v17 = vadd.f32 %v1229_v3, %v4154_v48 }
 0x1a4   : > { %v1606_v46 = vmax.f32 %v1186_v57, 0.0 }
 0x1a5   : > { %v1607_v4 = vmax.f32 %v1230_v17, 0.0  ;;  %v1177_v17 = vadd.f32 %v4465_v7, %v4184_v28  ;;  %v1218_v7 = vadd.f32 %v4438_v31, %v4208_v19 }
 0x1a7   : > { %3250 = vmatmul.msk.f32.gmra.mxu0 %vm1688_vm2, %v4527_v30  ;;  %3256 = vmatmul.msk.f32.gmra.mxu1 %vm1688_vm2, %v4527_v30 }
 0x1a8   : > { %v1273_v39 = vpop.f32.mrf.mxu2 }
 0x1a9   : > { %v1317_v41 = vpop.f32.mrf.mxu3  ;;  %3262 = vmatmul.msk.f32.gmra.mxu2 %vm1688_vm2, %v4527_v30  ;;  %3268 = vmatmul.msk.f32.gmra.mxu3 %vm1688_vm2, %v4527_v30  ;;  %v1188_v35 = vpop.f32.mrf.mxu0 }
 0x1aa   : > { %v1232_v52 = vpop.f32.mrf.mxu1  ;;  %v1189_v59 = vadd.f32 %v1188_v35, %v4166_v50 }
 0x1ab   : > { %v1233_v1 = vadd.f32 %v1232_v52, %v4166_v50  ;;  %v1180_v52 = vadd.f32 %v4486_v9, %v4160_v49  ;;  %v1274_v9 = vadd.f32 %v1273_v39, %v4154_v48  ;;  %v1271_v39 = vadd.f32 %v4516_v45, %v4178_v26 }
 0x1ac   : > { %v1622_v42 = vmax.f32 %v1189_v59, 0.0  ;;  %v1591_v59 = vmax.f32 %v1227_v8, 0.0 }
 0x1ad   : > { %v1623_v53 = vmax.f32 %v1233_v1, 0.0  ;;  %v1608_v8 = vmax.f32 %v1274_v9, 0.0 }
 0x1af   : > { %3251 = vmatmul.msk.f32.gmra.mxu0 %vm1688_vm2, %v4540_v6  ;;  %3257 = vmatmul.msk.f32.gmra.mxu1 %vm1688_vm2, %v4540_v6 }
 0x1b0   : > { %v1276_v36 = vpop.f32.mrf.mxu2 }
 0x1b1   : > { %v1320_v47 = vpop.f32.mrf.mxu3  ;;  %3263 = vmatmul.msk.f32.gmra.mxu2 %vm1688_vm2, %v4540_v6  ;;  %3269 = vmatmul.msk.f32.gmra.mxu3 %vm1688_vm2, %v4540_v6  ;;  %v1277_v1 = vadd.f32 %v1276_v36, %v4166_v50  ;;  %v1174_v36 = vadd.f32 %v4436_v60, %v4208_v19  ;;  %v1558_v60 = vmax.f32 %v1177_v17, 0.0 }
 0x1b3   : > { %v1191_v51 = vpop.f32.mrf.mxu0 }
 0x1b4   : > { %v1235_v0 = vpop.f32.mrf.mxu1  ;;  %v1192_v25 = vadd.f32 %v1191_v51, %v4148_v43  ;;  %v1224_v51 = vadd.f32 %v4488_v10, %v4160_v49  ;;  %v1318_v10 = vadd.f32 %v1317_v41, %v4154_v48  ;;  %v1315_v41 = vadd.f32 %v4518_v2, %v4178_v26 }
 0x1b5   : > { %v1236_v61 = vadd.f32 %v1235_v0, %v4148_v43  ;;  %v1590_v0 = vmax.f32 %v1183_v15, 0.0  ;;  %v1171_v2 = vadd.f32 %v4400_v56, %v4220_v22  ;;  %v1168_v56 = vadd.f32 %v4366_v34, %v4238_v33 }
 0x1b6   : > { %v1638_v29 = vmax.f32 %v1192_v25, 0.0  ;;  %v1321_v25 = vadd.f32 %v1320_v47, %v4166_v50  ;;  %v1574_v47 = vmax.f32 %v1180_v52, 0.0  ;;  %v1312_v52 = vadd.f32 %v4501_v24, %v4160_v49 }
 0x1b7   : > { %v1639_v58 = vmax.f32 %v1236_v61, 0.0  ;;  %3270 = vmatmul.msk.f32.vlgmr.msrb.gmra.mxu0 %vm1688_vm2, %v4451_v20  ;;  %3276 = vmatmul.msk.f32.vlgmr.msrb.gmra.mxu1 %vm1688_vm2, %v4451_v20  ;;  %v1526_v24 = vmax.f32 %v1171_v2, 0.0  ;;  %v1262_v34 = vadd.f32 %v4457_v32, %v4208_v19  ;;  %v1303_v32 = vadd.f32 %v4434_v62, %v4220_v22 }
 0x1b8   : > { %1994 = vmatpush.msra.mxu0 %v1638_v29  ;;  %v1221_v29 = vadd.f32 %v4467_v38, %v4184_v28  ;;  %v1575_v38 = vmax.f32 %v1224_v51, 0.0  ;;  %v1625_v15 = vmax.f32 %v1321_v25, 0.0  ;;  %v1592_v51 = vmax.f32 %v1271_v39, 0.0 }
 0x1b9   : > { %2029 = vmatpush.msra.mxu1 %v1639_v58  ;;  %3282 = vmatmul.msk.f32.vlgmr.msrb.gmra.mxu2 %vm1688_vm2, %v4451_v20  ;;  %v1624_v58 = vmax.f32 %v1277_v1, 0.0  ;;  %v1577_v25 = vmax.f32 %v1312_v52, 0.0  ;;  %v1300_v62 = vadd.f32 %v4398_v21, %v4238_v33  ;;  %v1529_v39 = vmax.f32 %v1303_v32, 0.0 }
 0x1ba   : > { %3288 = vmatmul.msk.f32.vlgmr.msrb.gmra.mxu3 %vm1688_vm2, %v4451_v20  ;;  %v1279_v37 = vpop.f32.mrf.mxu2  ;;  %1995 = vmatpush.msra.mxu0 %v1622_v42  ;;  %v1559_v31 = vmax.f32 %v1221_v29, 0.0  ;;  %v1609_v42 = vmax.f32 %v1318_v10, 0.0 }
 0x1bb   : > { %v1323_v23 = vpop.f32.mrf.mxu3  ;;  %2030 = vmatpush.msra.mxu1 %v1623_v53  ;;  %v1280_v14 = vadd.f32 %v1279_v37, %v4148_v43  ;;  %v4568_v3 = vpop.f32.mrf.mxu0  ;;  %v1543_v37 = vmax.f32 %v1218_v7, 0.0  ;;  %v1544_v7 = vmax.f32 %v1262_v34, 0.0 }
 0x1bc   : > { %v1324_v27 = vadd.f32 %v1323_v23, %v4148_v43  ;;  %v4570_v35 = vpop.f32.mrf.mxu1  ;;  %1996 = vmatpush.msra.mxu0 %v1606_v46  ;;  %v1215_v46 = vadd.f32 %v4402_v13, %v4220_v22  ;;  %v1212_v13 = vadd.f32 %v4368_v55, %v4238_v33  ;;  %v1306_v55 = vadd.f32 %v4459_v5, %v4208_v19 }
 0x1bd   : > { %2031 = vmatpush.msra.mxu1 %v1607_v4  ;;  %v1640_v61 = vmax.f32 %v1280_v14, 0.0  ;;  %v1542_v4 = vmax.f32 %v1174_v36, 0.0 }
 0x1be   : > { %v1641_v57 = vmax.f32 %v1324_v27, 0.0  ;;  %1997 = vmatpush.msra.mxu0 %v1590_v0  ;;  %v1268_v27 = vadd.f32 %v4499_v12, %v4160_v49  ;;  %v1593_v0 = vmax.f32 %v1315_v41, 0.0  ;;  %v1309_v12 = vadd.f32 %v4480_v18, %v4184_v28 }
 0x1bf   : > { %2032 = vmatpush.msra.mxu1 %v1591_v59  ;;  %3271 = vmatmul.msk.f32.gmra.mxu0 %vm1688_vm2, %v4472_v63  ;;  %v1265_v59 = vadd.f32 %v4478_v16, %v4184_v28  ;;  %v1527_v1 = vmax.f32 %v1215_v46, 0.0  ;;  %v1510_v18 = vmax.f32 %v1168_v56, 0.0 }
 0x1c0   : > { %3277 = vmatmul.msk.f32.gmra.mxu1 %vm1688_vm2, %v4472_v63  ;;  %2064 = vmatpush.msra.mxu2 %v1640_v61  ;;  %v1576_v16 = vmax.f32 %v1268_v27, 0.0  ;;  %v1511_v61 = vmax.f32 %v1212_v13, 0.0  ;;  %v1561_v5 = vmax.f32 %v1309_v12, 0.0 }
 0x1c1   : > { %2099 = vmatpush.msra.mxu3 %v1641_v57  ;;  %3283 = vmatmul.msk.f32.gmra.mxu2 %vm1688_vm2, %v4472_v63  ;;  %v1259_v57 = vadd.f32 %v4432_v40, %v4220_v22  ;;  %v1560_v17 = vmax.f32 %v1265_v59, 0.0  ;;  %v1256_v40 = vadd.f32 %v4396_v54, %v4238_v33 }
 0x1c2   : > { %3289 = vmatmul.msk.f32.gmra.mxu3 %vm1688_vm2, %v4472_v63  ;;  %1998 = vmatpush.msra.mxu0 %v1574_v47  ;;  %v1545_v47 = vmax.f32 %v1306_v55, 0.0 }
 0x1c3   : > { %2033 = vmatpush.msra.mxu1 %v1575_v38  ;;  %2065 = vmatpush.msra.mxu2 %v1624_v58  ;;  %v4600_v45 = vpop.f32.mrf.mxu2  ;;  %v4608_v23 = vpop.f32.mrf.mxu0  ;;  %v1528_v38 = vmax.f32 %v1259_v57, 0.0  ;;  %v1512_v41 = vmax.f32 %v1256_v40, 0.0  ;;  %v1513_v58 = vmax.f32 %v1300_v62, 0.0 }
 0x1c4   : > { %2100 = vmatpush.msra.mxu3 %v1625_v15  ;;  %v4602_v53 = vpop.f32.mrf.mxu3  ;;  %1999 = vmatpush.msra.mxu0 %v1558_v60  ;;  %v4610_v14 = vpop.f32.mrf.mxu1 }
 0x1c5   : > { %2034 = vmatpush.msra.mxu1 %v1559_v31  ;;  %2066 = vmatpush.msra.mxu2 %v1608_v8 }
 0x1c6   : > { %2101 = vmatpush.msra.mxu3 %v1609_v42  ;;  %2000 = vmatpush.msra.mxu0 %v1542_v4 }
 0x1c7   : > { %2035 = vmatpush.msra.mxu1 %v1543_v37  ;;  %2067 = vmatpush.msra.mxu2 %v1592_v51 }
 0x1c8   : > { %2102 = vmatpush.msra.mxu3 %v1593_v0  ;;  %3272 = vmatmul.msk.f32.gmra.mxu0 %vm1688_vm2, %v4493_v11 }
 0x1c9   : > { %3278 = vmatmul.msk.f32.gmra.mxu1 %vm1688_vm2, %v4493_v11  ;;  %3284 = vmatmul.msk.f32.gmra.mxu2 %vm1688_vm2, %v4493_v11 }
 0x1ca   : > { %3290 = vmatmul.msk.f32.gmra.mxu3 %vm1688_vm2, %v4493_v11  ;;  %2001 = vmatpush.msra.mxu0 %v1526_v24 }
 0x1cb   : > { %2036 = vmatpush.msra.mxu1 %v1527_v1  ;;  %2068 = vmatpush.msra.mxu2 %v1576_v16  ;;  %v4640_v29 = vpop.f32.mrf.mxu2  ;;  %v4644_v10 = vpop.f32.mrf.mxu0 }
 0x1cc   : > { %2103 = vmatpush.msra.mxu3 %v1577_v25  ;;  %v4642_v9 = vpop.f32.mrf.mxu3  ;;  %2002 = vmatpush.msra.mxu0 %v1510_v18  ;;  %v4646_v36 = vpop.f32.mrf.mxu1 }
 0x1cd   : > { %2037 = vmatpush.msra.mxu1 %v1511_v61  ;;  %2069 = vmatpush.msra.mxu2 %v1560_v17 }
 0x1ce   : > { %2104 = vmatpush.msra.mxu3 %v1561_v5 }
 0x1cf   : > { %2070 = vmatpush.msra.mxu2 %v1544_v7 }
 0x1d0   : > { %2105 = vmatpush.msra.mxu3 %v1545_v47  ;;  %3273 = vmatmul.msk.f32.gmra.mxu0 %vm1688_vm2, %v4510_v44 }
 0x1d1   : > { %3279 = vmatmul.msk.f32.gmra.mxu1 %vm1688_vm2, %v4510_v44  ;;  %2071 = vmatpush.msra.mxu2 %v1528_v38 }
 0x1d2   : > { %2106 = vmatpush.msra.mxu3 %v1529_v39  ;;  %3285 = vmatmul.msk.f32.gmra.mxu2 %vm1688_vm2, %v4510_v44 }
 0x1d3   : > { %3291 = vmatmul.msk.f32.gmra.mxu3 %vm1688_vm2, %v4510_v44  ;;  %2072 = vmatpush.msra.mxu2 %v1512_v41  ;;  %v4660_v54 = vpop.f32.mrf.mxu2  ;;  %v4664_v15 = vpop.f32.mrf.mxu0 }
 0x1d4   : > { %2107 = vmatpush.msra.mxu3 %v1513_v58  ;;  %v4662_v21 = vpop.f32.mrf.mxu3  ;;  %v4666_v60 = vpop.f32.mrf.mxu1 }
 0x1d8   : > { %3274 = vmatmul.msk.f32.gmra.mxu0 %vm1688_vm2, %v4527_v30 }
 0x1d9   : > { %3280 = vmatmul.msk.f32.gmra.mxu1 %vm1688_vm2, %v4527_v30 }
 0x1da   : > { %3286 = vmatmul.msk.f32.gmra.mxu2 %vm1688_vm2, %v4527_v30 }
 0x1db   : > { %3292 = vmatmul.msk.f32.gmra.mxu3 %vm1688_vm2, %v4527_v30  ;;  %v4676_v31 = vpop.f32.mrf.mxu2  ;;  %v1355_v42 = vpop.f32.mrf.mxu0 }
 0x1dc   : > { %v4678_v8 = vpop.f32.mrf.mxu3  ;;  %v1399_v2 = vpop.f32.mrf.mxu1 }
 0x1e0   : > { %3275 = vmatmul.msk.f32.gmra.mxu0 %vm1688_vm2, %v4540_v6 }
 0x1e1   : > { %3281 = vmatmul.msk.f32.gmra.mxu1 %vm1688_vm2, %v4540_v6 }
 0x1e2   : > { %3287 = vmatmul.msk.f32.gmra.mxu2 %vm1688_vm2, %v4540_v6 }
 0x1e3   : > { %3293 = vmatmul.msk.f32.gmra.mxu3 %vm1688_vm2, %v4540_v6  ;;  %v4688_v46 = vpop.f32.mrf.mxu2  ;;  %v1358_v37 = vpop.f32.mrf.mxu0 }
 0x1e4   : > { %v4690_v4 = vpop.f32.mrf.mxu3  ;;  %v1402_v27 = vpop.f32.mrf.mxu1  ;;  %v1359_v62 = vadd.f32 %v1358_v37, %v4178_v26 }
 0x1e5   : > { %v1403_v7 = vadd.f32 %v1402_v27, %v4178_v26 }
 0x1e8   : > { %3294 = vmatmul.msk.f32.vlgmr.msra.gmra.mxu0 %vm1688_vm2, %v4451_v20 }
 0x1e9   : > { %3300 = vmatmul.msk.f32.vlgmr.msra.gmra.mxu1 %vm1688_vm2, %v4451_v20 }
 0x1ea   : > { %3306 = vmatmul.msk.f32.vlgmr.msra.gmra.mxu2 %vm1688_vm2, %v4451_v20 }
 0x1eb   : > { %3312 = vmatmul.msk.f32.vlgmr.msra.gmra.mxu3 %vm1688_vm2, %v4451_v20  ;;  %v4700_v52 = vpop.f32.mrf.mxu2  ;;  %v1361_v0 = vpop.f32.mrf.mxu0 }
 0x1ec   : > { %v4702_v51 = vpop.f32.mrf.mxu3  ;;  %v1405_v56 = vpop.f32.mrf.mxu1  ;;  %v1362_v32 = vadd.f32 %v1361_v0, %v4154_v48 }
 0x1ed   : > { %v1406_v17 = vadd.f32 %v1405_v56, %v4154_v48 }
 0x1ee   : > { %v1610_v39 = vmax.f32 %v1362_v32, 0.0 }
 0x1ef   : > { %v1611_v41 = vmax.f32 %v1406_v17, 0.0  ;;  %v1397_v17 = vadd.f32 %v4666_v60, %v4184_v28 }
 0x1f0   : > { %3295 = vmatmul.msk.f32.gmra.mxu0 %vm1688_vm2, %v4472_v63 }
 0x1f1   : > { %3301 = vmatmul.msk.f32.gmra.mxu1 %vm1688_vm2, %v4472_v63 }
 0x1f2   : > { %3307 = vmatmul.msk.f32.gmra.mxu2 %vm1688_vm2, %v4472_v63 }
 0x1f3   : > { %3313 = vmatmul.msk.f32.gmra.mxu3 %vm1688_vm2, %v4472_v63  ;;  %v1449_v13 = vpop.f32.mrf.mxu2  ;;  %v1364_v12 = vpop.f32.mrf.mxu0 }
 0x1f4   : > { %v1493_v59 = vpop.f32.mrf.mxu3  ;;  %v1408_v24 = vpop.f32.mrf.mxu1  ;;  %v1365_v25 = vadd.f32 %v1364_v12, %v4166_v50 }
 0x1f5   : > { %v1409_v18 = vadd.f32 %v1408_v24, %v4166_v50  ;;  %v1356_v24 = vadd.f32 %v1355_v42, %v4160_v49  ;;  %v1450_v42 = vadd.f32 %v1449_v13, %v4154_v48  ;;  %v1447_v13 = vadd.f32 %v4700_v52, %v4178_v26 }
 0x1f6   : > { %v1626_v47 = vmax.f32 %v1365_v25, 0.0  ;;  %v1595_v25 = vmax.f32 %v1403_v7, 0.0 }
 0x1f7   : > { %v1627_v38 = vmax.f32 %v1409_v18, 0.0 }
 0x1f8   : > { %3296 = vmatmul.msk.f32.gmra.mxu0 %vm1688_vm2, %v4493_v11 }
 0x1f9   : > { %3302 = vmatmul.msk.f32.gmra.mxu1 %vm1688_vm2, %v4493_v11 }
 0x1fa   : > { %3308 = vmatmul.msk.f32.gmra.mxu2 %vm1688_vm2, %v4493_v11 }
 0x1fb   : > { %3314 = vmatmul.msk.f32.gmra.mxu3 %vm1688_vm2, %v4493_v11  ;;  %v1452_v1 = vpop.f32.mrf.mxu2 }
 0x1fc   : > { %v1496_v34 = vpop.f32.mrf.mxu3  ;;  %v1367_v55 = vpop.f32.mrf.mxu0  ;;  %v1453_v18 = vadd.f32 %v1452_v1, %v4166_v50  ;;  %v1578_v1 = vmax.f32 %v1356_v24, 0.0 }
 0x1fd   : > { %v1411_v16 = vpop.f32.mrf.mxu1  ;;  %v1368_v61 = vadd.f32 %v1367_v55, %v4148_v43  ;;  %v1400_v55 = vadd.f32 %v1399_v2, %v4160_v49  ;;  %v1494_v2 = vadd.f32 %v1493_v59, %v4154_v48  ;;  %v1491_v48 = vadd.f32 %v4702_v51, %v4178_v26 }
 0x1fe   : > { %v1412_v57 = vadd.f32 %v1411_v16, %v4148_v43  ;;  %v1594_v16 = vmax.f32 %v1359_v62, 0.0  ;;  %v1628_v59 = vmax.f32 %v1453_v18, 0.0  ;;  %v1347_v26 = vadd.f32 %v4608_v23, %v4220_v22 }
 0x1ff   : > { %v1642_v5 = vmax.f32 %v1368_v61, 0.0  ;;  %v1497_v61 = vadd.f32 %v1496_v34, %v4166_v50  ;;  %v1350_v50 = vadd.f32 %v4644_v10, %v4208_v19  ;;  %v1579_v60 = vmax.f32 %v1400_v55, 0.0 }
 0x200   : > { %v1643_v40 = vmax.f32 %v1412_v57, 0.0  ;;  %3297 = vmatmul.msk.f32.gmra.mxu0 %vm1688_vm2, %v4510_v44  ;;  %v1391_v51 = vadd.f32 %v4610_v14, %v4220_v22  ;;  %v1344_v23 = vadd.f32 %v4568_v3, %v4238_v33  ;;  %v1388_v14 = vadd.f32 %v4570_v35, %v4238_v33 }
 0x201   : > { %3303 = vmatmul.msk.f32.gmra.mxu1 %vm1688_vm2, %v4510_v44  ;;  %2134 = vmatpush.msrb.mxu0 %v1642_v5  ;;  %v1629_v34 = vmax.f32 %v1497_v61, 0.0  ;;  %v1612_v5 = vmax.f32 %v1450_v42, 0.0  ;;  %v1546_v7 = vmax.f32 %v1350_v50, 0.0  ;;  %v1438_v3 = vadd.f32 %v4660_v54, %v4208_v19 }
 0x202   : > { %2169 = vmatpush.msrb.mxu1 %v1643_v40  ;;  %3309 = vmatmul.msk.f32.gmra.mxu2 %vm1688_vm2, %v4510_v44  ;;  %v1613_v40 = vmax.f32 %v1494_v2, 0.0  ;;  %v1482_v35 = vadd.f32 %v4662_v21, %v4208_v19  ;;  %v1435_v55 = vadd.f32 %v4640_v29, %v4220_v22  ;;  %v1479_v54 = vadd.f32 %v4642_v9, %v4220_v22 }
 0x203   : > { %3315 = vmatmul.msk.f32.gmra.mxu3 %vm1688_vm2, %v4510_v44  ;;  %v1455_v58 = vpop.f32.mrf.mxu2  ;;  %2135 = vmatpush.msrb.mxu0 %v1626_v47  ;;  %v1476_v29 = vadd.f32 %v4602_v53, %v4238_v33 }
 0x204   : > { %v1499_v0 = vpop.f32.mrf.mxu3  ;;  %2170 = vmatpush.msrb.mxu1 %v1627_v38  ;;  %v1456_v37 = vadd.f32 %v1455_v58, %v4148_v43  ;;  %v4738_v56 = vpop.f32.mrf.mxu0  ;;  %v1488_v58 = vadd.f32 %v4690_v4, %v4160_v49  ;;  %v1531_v4 = vmax.f32 %v1391_v51, 0.0  ;;  %v1549_v22 = vmax.f32 %v1482_v35, 0.0 }
 0x205   : > { %v1500_v27 = vadd.f32 %v1499_v0, %v4148_v43  ;;  %v4740_v12 = vpop.f32.mrf.mxu1  ;;  %2136 = vmatpush.msrb.mxu0 %v1610_v39  ;;  %v1353_v43 = vadd.f32 %v4664_v15, %v4184_v28  ;;  %v1394_v15 = vadd.f32 %v4646_v36, %v4208_v19  ;;  %v1563_v36 = vmax.f32 %v1397_v17, 0.0 }
 0x206   : > { %2171 = vmatpush.msrb.mxu1 %v1611_v41  ;;  %v1644_v57 = vmax.f32 %v1456_v37, 0.0  ;;  %v1444_v41 = vadd.f32 %v4688_v46, %v4160_v49  ;;  %v1596_v0 = vmax.f32 %v1447_v13, 0.0  ;;  %v1597_v37 = vmax.f32 %v1491_v48, 0.0  ;;  %v4840_v13 = vpop.permute.xlu1 %1680  ;;  %v4842_v48 = vpop.permute.xlu2 %1675 }
 0x207   : > { %v1645_v32 = vmax.f32 %v1500_v27, 0.0  ;;  %2137 = vmatpush.msrb.mxu0 %v1594_v16  ;;  %v1562_v10 = vmax.f32 %v1353_v43, 0.0  ;;  %v1547_v47 = vmax.f32 %v1394_v15, 0.0  ;;  %v1441_v27 = vadd.f32 %v4676_v31, %v4184_v28 }
 0x208   : > { %2172 = vmatpush.msrb.mxu1 %v1595_v25  ;;  %3298 = vmatmul.msk.f32.gmra.mxu0 %vm1688_vm2, %v4527_v30  ;;  %v1485_v46 = vadd.f32 %v4678_v8, %v4184_v28  ;;  %v1530_v49 = vmax.f32 %v1347_v26, 0.0  ;;  %v1580_v31 = vmax.f32 %v1444_v41, 0.0  ;;  %v1581_v24 = vmax.f32 %v1488_v58, 0.0 }
 0x209   : > { %3304 = vmatmul.msk.f32.gmra.mxu1 %vm1688_vm2, %v4527_v30  ;;  %2204 = vmatpush.msrb.mxu2 %v1644_v57  ;;  %v1514_v28 = vmax.f32 %v1344_v23, 0.0  ;;  %v1515_v8 = vmax.f32 %v1388_v14, 0.0  ;;  %v1564_v16 = vmax.f32 %v1441_v27, 0.0  ;;  %v1432_v57 = vadd.f32 %v4600_v45, %v4238_v33 }
 0x20a   : > { %2239 = vmatpush.msrb.mxu3 %v1645_v32  ;;  %3310 = vmatmul.msk.f32.gmra.mxu2 %vm1688_vm2, %v4527_v30  ;;  %v1565_v19 = vmax.f32 %v1485_v46, 0.0  ;;  %v1548_v32 = vmax.f32 %v1438_v3, 0.0  ;;  %v1532_v9 = vmax.f32 %v1435_v55, 0.0  ;;  %v1533_v43 = vmax.f32 %v1479_v54, 0.0 }
 0x20b   : > { %3316 = vmatmul.msk.f32.gmra.mxu3 %vm1688_vm2, %v4527_v30  ;;  %2138 = vmatpush.msrb.mxu0 %v1578_v1  ;;  %v1516_v17 = vmax.f32 %v1432_v57, 0.0  ;;  %v1517_v42 = vmax.f32 %v1476_v29, 0.0 }
 0x20c   : > { %2173 = vmatpush.msrb.mxu1 %v1579_v60  ;;  %2205 = vmatpush.msrb.mxu2 %v1628_v59  ;;  %v4768_v52 = vpop.f32.mrf.mxu2  ;;  %v4770_v62 = vpop.f32.mrf.mxu3 }
 0x20d   : > { %2240 = vmatpush.msrb.mxu3 %v1629_v34  ;;  %2139 = vmatpush.msrb.mxu0 %v1562_v10  ;;  %v4776_v38 = vpop.f32.mrf.mxu0  ;;  %v4778_v39 = vpop.f32.mrf.mxu1 }
 0x20e   : > { %2174 = vmatpush.msrb.mxu1 %v1563_v36  ;;  %2206 = vmatpush.msrb.mxu2 %v1612_v5  ;;  %v4866_v14 = vpop.permute.xlu1 %1665  ;;  %v4868_v27 = vpop.permute.xlu2 %1660 }
 0x20f   : > { %2241 = vmatpush.msrb.mxu3 %v1613_v40  ;;  %2140 = vmatpush.msrb.mxu0 %v1546_v7  ;;  %v1728_v46 = vadd.f32 %v4776_v38, %v4866_v14 }
 0x210   : > { %2175 = vmatpush.msrb.mxu1 %v1547_v47  ;;  %2207 = vmatpush.msrb.mxu2 %v1596_v0 }
 0x211   : > { %2242 = vmatpush.msrb.mxu3 %v1597_v37  ;;  %3299 = vmatmul.msk.f32.gmra.mxu0 %vm1688_vm2, %v4540_v6 }
 0x212   : > { %3305 = vmatmul.msk.f32.gmra.mxu1 %vm1688_vm2, %v4540_v6  ;;  %3311 = vmatmul.msk.f32.gmra.mxu2 %vm1688_vm2, %v4540_v6 }
 0x213   : > { %3317 = vmatmul.msk.f32.gmra.mxu3 %vm1688_vm2, %v4540_v6  ;;  %2141 = vmatpush.msrb.mxu0 %v1530_v49 }
 0x214   : > { %2176 = vmatpush.msrb.mxu1 %v1531_v4  ;;  %2208 = vmatpush.msrb.mxu2 %v1580_v31  ;;  %v4808_v21 = vpop.f32.mrf.mxu2  ;;  %v4810_v25 = vpop.f32.mrf.mxu3  ;;  %v1763_v31 = vadd.f32 %v4778_v39, %v4866_v14 }
 0x215   : > { %2243 = vmatpush.msrb.mxu3 %v1581_v24  ;;  %2142 = vmatpush.msrb.mxu0 %v1514_v28  ;;  %v1730_v18 = vpop.f32.mrf.mxu0  ;;  %v1765_v61 = vpop.f32.mrf.mxu1 }
 0x216   : > { %2177 = vmatpush.msrb.mxu1 %v1515_v8  ;;  %2209 = vmatpush.msrb.mxu2 %v1564_v16  ;;  %v1725_v8 = vadd.f32 %v4738_v56, %v4868_v27 }
 0x217   : > { %2244 = vmatpush.msrb.mxu3 %v1565_v19  ;;  %v1760_v19 = vadd.f32 %v4740_v12, %v4868_v27 }
 0x218   : > { %2210 = vmatpush.msrb.mxu2 %v1548_v32  ;;  %v2267_v56 = vmax.f32 %v1725_v8, 0.0 }
 0x219   : > { %2245 = vmatpush.msrb.mxu3 %v1549_v22  ;;  %3318 = vmatmul.msk.f32.vlgmr.msrb.gmra.mxu0 %vm1688_vm2, %v4451_v20  ;;  %v2268_v22 = vmax.f32 %v1760_v19, 0.0 }
 0x21a   : > { %3324 = vmatmul.msk.f32.vlgmr.msrb.gmra.mxu1 %vm1688_vm2, %v4451_v20  ;;  %2211 = vmatpush.msrb.mxu2 %v1532_v9  ;;  %v1798_v9 = vadd.f32 %v4808_v21, %v4866_v14 }
 0x21b   : > { %2246 = vmatpush.msrb.mxu3 %v1533_v43 }
 0x21c   : > { %2212 = vmatpush.msrb.mxu2 %v1516_v17  ;;  %v4820_v33 = vpop.f32.mrf.mxu2  ;;  %v4822_v45 = vpop.f32.mrf.mxu3 }
 0x21d   : > { %2247 = vmatpush.msrb.mxu3 %v1517_v42  ;;  %3330 = vmatmul.msk.f32.vlgmr.msrb.gmra.mxu2 %vm1688_vm2, %v4451_v20  ;;  %v1733_v53 = vpop.f32.mrf.mxu0  ;;  %v1768_v2 = vpop.f32.mrf.mxu1 }
 0x21e   : > { %3336 = vmatmul.msk.f32.vlgmr.msrb.gmra.mxu3 %vm1688_vm2, %v4451_v20  ;;  %v4838_v20 = vpop.permute.xlu0 %1685  ;;  %v1734_v51 = vadd.f32 %v1733_v53, %v4842_v48  ;;  %v1769_v7 = vadd.f32 %v1768_v2, %v4842_v48 }
 0x220   : > { %v2315_v49 = vmax.f32 %v1734_v51, 0.0  ;;  %v2316_v4 = vmax.f32 %v1769_v7, 0.0 }
 0x221   : > { %3319 = vmatmul.msk.f32.gmra.mxu0 %vm1688_vm2, %v4472_v63 }
 0x222   : > { %3325 = vmatmul.msk.f32.gmra.mxu1 %vm1688_vm2, %v4472_v63 }
 0x224   : > { %v1803_v50 = vpop.f32.mrf.mxu2  ;;  %v4832_v15 = vpop.f32.mrf.mxu3 }
 0x225   : > { %3331 = vmatmul.msk.f32.gmra.mxu2 %vm1688_vm2, %v4472_v63  ;;  %v1736_v1 = vpop.f32.mrf.mxu0  ;;  %v1771_v60 = vpop.f32.mrf.mxu1 }
 0x226   : > { %3337 = vmatmul.msk.f32.gmra.mxu3 %vm1688_vm2, %v4472_v63  ;;  %v1737_v36 = vadd.f32 %v1736_v1, %v4840_v13  ;;  %v1772_v5 = vadd.f32 %v1771_v60, %v4840_v13  ;;  %v4858_v58 = vpop.permute.xlu0 %1670 }
 0x227   : > { %v1766_v0 = vadd.f32 %v1765_v61, %v4858_v58  ;;  %v2284_v61 = vmax.f32 %v1763_v31, 0.0  ;;  %v1801_v29 = vadd.f32 %v4820_v33, %v4858_v58  ;;  %v1839_v33 = vadd.f32 %v4832_v15, %v4842_v48 }
 0x228   : > { %v2331_v37 = vmax.f32 %v1737_v36, 0.0  ;;  %v2332_v23 = vmax.f32 %v1772_v5, 0.0  ;;  %v2285_v15 = vmax.f32 %v1798_v9, 0.0 }
 0x229   : > { %3320 = vmatmul.msk.f32.gmra.mxu0 %vm1688_vm2, %v4493_v11  ;;  %v2300_v54 = vmax.f32 %v1766_v0, 0.0  ;;  %v2301_v1 = vmax.f32 %v1801_v29, 0.0 }
 0x22a   : > { %3326 = vmatmul.msk.f32.gmra.mxu1 %vm1688_vm2, %v4493_v11 }
 0x22c   : > { %v1806_v59 = vpop.f32.mrf.mxu2  ;;  %v1841_v34 = vpop.f32.mrf.mxu3 }
 0x22d   : > { %3332 = vmatmul.msk.f32.gmra.mxu2 %vm1688_vm2, %v4493_v11  ;;  %v1739_v63 = vpop.f32.mrf.mxu0  ;;  %v1774_v10 = vpop.f32.mrf.mxu1  ;;  %v1807_v16 = vadd.f32 %v1806_v59, %v4840_v13  ;;  %v1842_v12 = vadd.f32 %v1841_v34, %v4840_v13  ;;  %v1836_v59 = vadd.f32 %v4822_v45, %v4858_v58  ;;  %v2318_v34 = vmax.f32 %v1839_v33, 0.0 }
 0x22e   : > { %3338 = vmatmul.msk.f32.gmra.mxu3 %vm1688_vm2, %v4493_v11  ;;  %v1740_v40 = vadd.f32 %v1739_v63, %v4838_v20  ;;  %v1775_v26 = vadd.f32 %v1774_v10, %v4838_v20  ;;  %v1731_v11 = vadd.f32 %v1730_v18, %v4858_v58  ;;  %v1804_v18 = vadd.f32 %v1803_v50, %v4842_v48 }
 0x22f   : > { %v2333_v32 = vmax.f32 %v1807_v16, 0.0  ;;  %v1795_v50 = vadd.f32 %v4768_v52, %v4868_v27  ;;  %v2334_v60 = vmax.f32 %v1842_v12, 0.0  ;;  %v1833_v63 = vadd.f32 %v4810_v25, %v4866_v14 }
 0x230   : > { %v2347_v47 = vmax.f32 %v1740_v40, 0.0  ;;  %v2348_v41 = vmax.f32 %v1775_v26, 0.0  ;;  %v2299_v55 = vmax.f32 %v1731_v11, 0.0  ;;  %v2317_v43 = vmax.f32 %v1804_v18, 0.0 }
 0x231   : > { %3321 = vmatmul.msk.f32.gmra.mxu0 %vm1688_vm2, %v4510_v44  ;;  %v1830_v52 = vadd.f32 %v4770_v62, %v4868_v27  ;;  %v2302_v10 = vmax.f32 %v1836_v59, 0.0  ;;  %v2286_v40 = vmax.f32 %v1833_v63, 0.0  ;;  %v4936_v62 = vld [vmem:[%s5191_s5] sm:$0x1] }
 0x232   : > { %3327 = vmatmul.msk.f32.gmra.mxu1 %vm1688_vm2, %v4510_v44  ;;  %2385 = vmatpush.msra.mxu3 %v2347_v47 }
 0x233   : > { %2405 = vmatpush.msra.mxu1 %v2348_v41  ;;  %v2270_v26 = vmax.f32 %v1830_v52, 0.0 }
 0x234   : > { %v1809_v3 = vpop.f32.mrf.mxu2  ;;  %v1844_v35 = vpop.f32.mrf.mxu3  ;;  %2386 = vmatpush.msra.mxu3 %v2331_v37 }
 0x235   : > { %2406 = vmatpush.msra.mxu1 %v2332_v23  ;;  %3333 = vmatmul.msk.f32.gmra.mxu2 %vm1688_vm2, %v4510_v44  ;;  %v1810_v24 = vadd.f32 %v1809_v3, %v4838_v20  ;;  %v4879_v28 = vpop.f32.mrf.mxu0  ;;  %v4881_v38 = vpop.f32.mrf.mxu1  ;;  %v1845_v57 = vadd.f32 %v1844_v35, %v4838_v20 }
 0x236   : > { %3339 = vmatmul.msk.f32.gmra.mxu3 %vm1688_vm2, %v4510_v44  ;;  %v2283_v44 = vmax.f32 %v1728_v46, 0.0 }
 0x237   : > { %2387 = vmatpush.msra.mxu3 %v2315_v49  ;;  %2407 = vmatpush.msra.mxu1 %v2316_v4  ;;  %v2349_v39 = vmax.f32 %v1810_v24, 0.0  ;;  %v2350_v53 = vmax.f32 %v1845_v57, 0.0 }
 0x239   : > { %2388 = vmatpush.msra.mxu3 %v2299_v55  ;;  %2408 = vmatpush.msra.mxu1 %v2300_v54 }
 0x23a   : > { %3322 = vmatmul.msk.f32.gmra.mxu0 %vm1688_vm2, %v4527_v30  ;;  %3328 = vmatmul.msk.f32.gmra.mxu1 %vm1688_vm2, %v4527_v30 }
 0x23b   : > { %2425 = vmatpush.msra.mxu2 %v2349_v39  ;;  %2389 = vmatpush.msra.mxu3 %v2283_v44 }
 0x23c   : > { %2409 = vmatpush.msra.mxu1 %v2284_v61  ;;  %v4899_v17 = vpop.f32.mrf.mxu2 }
 0x23d   : > { %2426 = vmatpush.msra.mxu2 %v2333_v32  ;;  %v4901_v42 = vpop.f32.mrf.mxu3  ;;  %2390 = vmatpush.msra.mxu3 %v2267_v56  ;;  %v4909_v2 = vpop.f32.mrf.mxu0 }
 0x23e   : > { %3334 = vmatmul.msk.f32.gmra.mxu2 %vm1688_vm2, %v4527_v30  ;;  %3340 = vmatmul.msk.f32.gmra.mxu3 %vm1688_vm2, %v4527_v30  ;;  %v4911_v21 = vpop.f32.mrf.mxu1  ;;  %v2269_v30 = vmax.f32 %v1795_v50, 0.0  ;;  %v1868_v61 = vadd.f32 %v4909_v2, %v4866_v14  ;;  %v1900_v50 = vadd.f32 %v4881_v38, %v4868_v27 }
 0x23f   : > { %2410 = vmatpush.msra.mxu1 %v2268_v22  ;;  %2427 = vmatpush.msra.mxu2 %v2317_v43  ;;  %v1903_v57 = vadd.f32 %v4911_v21, %v4866_v14  ;;  %v1865_v21 = vadd.f32 %v4879_v28, %v4868_v27 }
 0x240   : > { %2445 = vmatpush.msrb.mxu3 %v2350_v53  ;;  %v2287_v63 = vmax.f32 %v1868_v61, 0.0 }
 0x241   : > { %2428 = vmatpush.msra.mxu2 %v2301_v1  ;;  %v2288_v52 = vmax.f32 %v1903_v57, 0.0 }
 0x242   : > { %2446 = vmatpush.msrb.mxu3 %v2334_v60  ;;  %3323 = vmatmul.msk.f32.gmra.mxu0 %vm1688_vm2, %v4540_v6 }
 0x243   : > { %3329 = vmatmul.msk.f32.gmra.mxu1 %vm1688_vm2, %v4540_v6  ;;  %2429 = vmatpush.msra.mxu2 %v2285_v15 }
 0x244   : > { %2447 = vmatpush.msrb.mxu3 %v2318_v34  ;;  %v4925_v45 = vpop.f32.mrf.mxu2 }
 0x245   : > { %2430 = vmatpush.msra.mxu2 %v2269_v30  ;;  %v4927_v36 = vpop.f32.mrf.mxu3  ;;  %v1870_v25 = vpop.f32.mrf.mxu0 }
 0x246   : > { %3335 = vmatmul.msk.f32.gmra.mxu2 %vm1688_vm2, %v4540_v6  ;;  %3341 = vmatmul.msk.f32.gmra.mxu3 %vm1688_vm2, %v4540_v6  ;;  %v1905_v5 = vpop.f32.mrf.mxu1  ;;  %v1871_v39 = vadd.f32 %v1870_v25, %v4858_v58 }
 0x247   : > { %2448 = vmatpush.msrb.mxu3 %v2302_v10  ;;  %v1906_v19 = vadd.f32 %v1905_v5, %v4858_v58  ;;  %v2271_v5 = vmax.f32 %v1865_v21, 0.0 }
 0x248   : > { %v2303_v1 = vmax.f32 %v1871_v39, 0.0 }
 0x249   : > { %2449 = vmatpush.msrb.mxu3 %v2286_v40  ;;  %v2304_v60 = vmax.f32 %v1906_v19, 0.0  ;;  %v2272_v40 = vmax.f32 %v1900_v50, 0.0 }
 0x24b   : > { %2450 = vmatpush.msrb.mxu3 %v2270_v26  ;;  %3343 = vmatmul.msk.f32.vlgmr.msra.gmra.mxu1 %vm2371_vm3, %v4936_v62  ;;  %v1938_v26 = vadd.f32 %v4925_v45, %v4866_v14 }
 0x24c   : > { %v1940_v51 = vpop.f32.mrf.mxu2 }
 0x24d   : > { %v1975_v7 = vpop.f32.mrf.mxu3  ;;  %v1873_v6 = vpop.f32.mrf.mxu0  ;;  %v1941_v10 = vadd.f32 %v1940_v51, %v4858_v58 }
 0x24e   : > { %3342 = vmatmul.msk.f32.vlgmr.msra.gmra.mxu3 %vm2371_vm3, %v4936_v62  ;;  %3344 = vmatmul.msk.f32.vlgmr.msra.gmra.mxu2 %vm2371_vm3, %v4936_v62  ;;  %v1908_v47 = vpop.f32.mrf.mxu1  ;;  %v1874_v8 = vadd.f32 %v1873_v6, %v4842_v48  ;;  %v1976_v28 = vadd.f32 %v1975_v7, %v4858_v58  ;;  %v1973_v6 = vadd.f32 %v4927_v36, %v4866_v14 }
 0x24f   : > { %v1909_v55 = vadd.f32 %v1908_v47, %v4842_v48  ;;  %v2305_v45 = vmax.f32 %v1941_v10, 0.0 }
 0x250   : > { %v2319_v56 = vmax.f32 %v1874_v8, 0.0 }
 0x251   : > { %v2320_v29 = vmax.f32 %v1909_v55, 0.0 }
 0x255   : > { %v1943_v41 = vpop.f32.mrf.mxu2  ;;  %v1876_v0 = vpop.f32.mrf.mxu0 }
 0x256   : > { %3345 = vmatmul.msk.f32.vlgmr.msrb.gmra.mxu3 %vm2371_vm3, %v4936_v62  ;;  %v1978_v11 = vpop.f32.mrf.mxu3  ;;  %v1911_v37 = vpop.f32.mrf.mxu1  ;;  %v1877_v3 = vadd.f32 %v1876_v0, %v4840_v13  ;;  %v1944_v15 = vadd.f32 %v1943_v41, %v4842_v48  ;;  %v1970_v0 = vadd.f32 %v4901_v42, %v4868_v27 }
 0x257   : > { %v1912_v35 = vadd.f32 %v1911_v37, %v4840_v13  ;;  %v1979_v59 = vadd.f32 %v1978_v11, %v4842_v48  ;;  %v1935_v11 = vadd.f32 %v4899_v17, %v4868_v27  ;;  %v2306_v37 = vmax.f32 %v1976_v28, 0.0 }
 0x258   : > { %v2335_v44 = vmax.f32 %v1877_v3, 0.0  ;;  %v2321_v47 = vmax.f32 %v1944_v15, 0.0 }
 0x259   : > { %v2336_v18 = vmax.f32 %v1912_v35, 0.0  ;;  %v2322_v41 = vmax.f32 %v1979_v59, 0.0  ;;  %v2273_v17 = vmax.f32 %v1935_v11, 0.0 }
 0x25d   : > { %v1946_v23 = vpop.f32.mrf.mxu2  ;;  %v1879_v49 = vpop.f32.mrf.mxu0 }
 0x25e   : > { %v1981_v46 = vpop.f32.mrf.mxu3  ;;  %v1914_v4 = vpop.f32.mrf.mxu1  ;;  %v1880_v31 = vadd.f32 %v1879_v49, %v4838_v20  ;;  %v1947_v22 = vadd.f32 %v1946_v23, %v4840_v13  ;;  %v2290_v49 = vmax.f32 %v1973_v6, 0.0 }
 0x25f   : > { %v1915_v24 = vadd.f32 %v1914_v4, %v4838_v20  ;;  %v1982_v9 = vadd.f32 %v1981_v46, %v4840_v13  ;;  %v2289_v46 = vmax.f32 %v1938_v26, 0.0  ;;  %v2274_v4 = vmax.f32 %v1970_v0, 0.0 }
 0x260   : > { %v2351_v54 = vmax.f32 %v1880_v31, 0.0  ;;  %v2337_v25 = vmax.f32 %v1947_v22, 0.0 }
 0x261   : > { %v2352_v16 = vmax.f32 %v1915_v24, 0.0  ;;  %v2338_v38 = vmax.f32 %v1982_v9, 0.0 }
 0x262   : > { %2465 = vmatpush.msra.mxu0 %v2351_v54 }
 0x263   : > { %2485 = vmatpush.msrb.mxu1 %v2352_v16 }
 0x264   : > { %2466 = vmatpush.msra.mxu0 %v2335_v44 }
 0x265   : > { %v1949_v32 = vpop.f32.mrf.mxu2  ;;  %2486 = vmatpush.msrb.mxu1 %v2336_v18  ;;  %v4962_v53 = vpop.f32.mrf.mxu0 }
 0x266   : > { %v1984_v12 = vpop.f32.mrf.mxu3  ;;  %v1950_v43 = vadd.f32 %v1949_v32, %v4838_v20  ;;  %v4964_v2 = vpop.f32.mrf.mxu1  ;;  %2467 = vmatpush.msra.mxu0 %v2319_v56  ;;  %v2005_v6 = vadd.f32 %v4962_v53, %v4868_v27 }
 0x267   : > { %v1985_v33 = vadd.f32 %v1984_v12, %v4838_v20  ;;  %2487 = vmatpush.msrb.mxu1 %v2320_v29 }
 0x268   : > { %v2353_v34 = vmax.f32 %v1950_v43, 0.0  ;;  %2468 = vmatpush.msra.mxu0 %v2303_v1 }
 0x269   : > { %v2354_v30 = vmax.f32 %v1985_v33, 0.0  ;;  %2488 = vmatpush.msrb.mxu1 %v2304_v60 }
 0x26a   : > { %2505 = vmatpush.msrb.mxu2 %v2353_v34  ;;  %2469 = vmatpush.msra.mxu0 %v2287_v63 }
 0x26b   : > { %2525 = vmatpush.msra.mxu3 %v2354_v30  ;;  %2489 = vmatpush.msrb.mxu1 %v2288_v52 }
 0x26c   : > { %2506 = vmatpush.msrb.mxu2 %v2337_v25  ;;  %2470 = vmatpush.msra.mxu0 %v2271_v5 }
 0x26d   : > { %2526 = vmatpush.msra.mxu3 %v2338_v38  ;;  %v4978_v51 = vpop.f32.mrf.mxu2  ;;  %2490 = vmatpush.msrb.mxu1 %v2272_v40  ;;  %v2007_v36 = vpop.f32.mrf.mxu0 }
 0x26e   : > { %v4980_v7 = vpop.f32.mrf.mxu3  ;;  %2507 = vmatpush.msrb.mxu2 %v2321_v47  ;;  %v2042_v23 = vpop.f32.mrf.mxu1  ;;  %3346 = vmatmul.msk.f32.vlgmr.msra.gmra.mxu0 %vm2371_vm3, %v4936_v62  ;;  %v2008_v59 = vadd.f32 %v2007_v36, %v4866_v14  ;;  %v2040_v47 = vadd.f32 %v4964_v2, %v4868_v27 }
 0x26f   : > { %2527 = vmatpush.msra.mxu3 %v2322_v41  ;;  %3347 = vmatmul.msk.f32.vlgmr.msrb.gmra.mxu1 %vm2371_vm3, %v4936_v62  ;;  %v2043_v34 = vadd.f32 %v2042_v23, %v4866_v14 }
 0x270   : > { %2508 = vmatpush.msrb.mxu2 %v2305_v45  ;;  %v2291_v23 = vmax.f32 %v2008_v59, 0.0 }
 0x271   : > { %2528 = vmatpush.msra.mxu3 %v2306_v37 }
 0x272   : > { %2509 = vmatpush.msrb.mxu2 %v2289_v46  ;;  %v2292_v46 = vmax.f32 %v2043_v34, 0.0 }
 0x273   : > { %2529 = vmatpush.msra.mxu3 %v2290_v49 }
 0x274   : > { %2510 = vmatpush.msrb.mxu2 %v2273_v17 }
 0x275   : > { %2530 = vmatpush.msra.mxu3 %v2274_v4  ;;  %v4990_v42 = vpop.f32.mrf.mxu2  ;;  %3348 = vmatmul.msk.f32.vlgmr.msrb.gmra.mxu2 %vm2371_vm3, %v4936_v62  ;;  %v2010_v35 = vpop.f32.mrf.mxu0  ;;  %v2275_v4 = vmax.f32 %v2005_v6, 0.0 }
 0x276   : > { %v4992_v3 = vpop.f32.mrf.mxu3  ;;  %3349 = vmatmul.msk.f32.vlgmr.msra.gmra.mxu3 %vm2371_vm3, %v4936_v62  ;;  %v2045_v31 = vpop.f32.mrf.mxu1  ;;  %v2011_v50 = vadd.f32 %v2010_v35, %v4858_v58  ;;  %v2276_v35 = vmax.f32 %v2040_v47, 0.0 }
 0x277   : > { %v2046_v1 = vadd.f32 %v2045_v31, %v4858_v58  ;;  %v2078_v31 = vadd.f32 %v4990_v42, %v4866_v14 }
 0x278   : > { %v2307_v41 = vmax.f32 %v2011_v50, 0.0 }
 0x279   : > { %v2308_v11 = vmax.f32 %v2046_v1, 0.0 }
 0x27d   : > { %v2080_v24 = vpop.f32.mrf.mxu2  ;;  %v2013_v55 = vpop.f32.mrf.mxu0 }
 0x27e   : > { %v2115_v8 = vpop.f32.mrf.mxu3  ;;  %v2048_v54 = vpop.f32.mrf.mxu1  ;;  %v2014_v9 = vadd.f32 %v2013_v55, %v4842_v48  ;;  %v2081_v49 = vadd.f32 %v2080_v24, %v4858_v58  ;;  %v2113_v55 = vadd.f32 %v4992_v3, %v4866_v14  ;;  %v2075_v24 = vadd.f32 %v4978_v51, %v4868_v27 }
 0x27f   : > { %v2049_v43 = vadd.f32 %v2048_v54, %v4842_v48  ;;  %v2116_v53 = vadd.f32 %v2115_v8, %v4858_v58  ;;  %v2110_v8 = vadd.f32 %v4980_v7, %v4868_v27  ;;  %v2293_v3 = vmax.f32 %v2078_v31, 0.0 }
 0x280   : > { %v2323_v30 = vmax.f32 %v2014_v9, 0.0  ;;  %v2277_v7 = vmax.f32 %v2075_v24, 0.0 }
 0x281   : > { %v2324_v63 = vmax.f32 %v2049_v43, 0.0 }
 0x285   : > { %v2083_v16 = vpop.f32.mrf.mxu2  ;;  %v2016_v19 = vpop.f32.mrf.mxu0 }
 0x286   : > { %v2118_v39 = vpop.f32.mrf.mxu3  ;;  %v2051_v44 = vpop.f32.mrf.mxu1  ;;  %v2017_v29 = vadd.f32 %v2016_v19, %v4840_v13  ;;  %v2084_v0 = vadd.f32 %v2083_v16, %v4842_v48  ;;  %v2310_v19 = vmax.f32 %v2116_v53, 0.0 }
 0x287   : > { %v2052_v32 = vadd.f32 %v2051_v44, %v4840_v13  ;;  %v2119_v45 = vadd.f32 %v2118_v39, %v4842_v48  ;;  %v2309_v39 = vmax.f32 %v2081_v49, 0.0 }
 0x288   : > { %v2339_v60 = vmax.f32 %v2017_v29, 0.0  ;;  %v2325_v54 = vmax.f32 %v2084_v0, 0.0 }
 0x289   : > { %v2340_v15 = vmax.f32 %v2052_v32, 0.0  ;;  %v2326_v16 = vmax.f32 %v2119_v45, 0.0 }
 0x28d   : > { %v2086_v18 = vpop.f32.mrf.mxu2 }
 0x28e   : > { %v2121_v61 = vpop.f32.mrf.mxu3  ;;  %v2019_v57 = vpop.f32.mrf.mxu0  ;;  %v2087_v28 = vadd.f32 %v2086_v18, %v4840_v13  ;;  %v2294_v18 = vmax.f32 %v2113_v55, 0.0 }
 0x28f   : > { %v2054_v56 = vpop.f32.mrf.mxu1  ;;  %v2020_v12 = vadd.f32 %v2019_v57, %v4838_v20  ;;  %v2122_v25 = vadd.f32 %v2121_v61, %v4840_v13  ;;  %v2278_v57 = vmax.f32 %v2110_v8, 0.0 }
 0x290   : > { %v2055_v22 = vadd.f32 %v2054_v56, %v4838_v20  ;;  %v2341_v17 = vmax.f32 %v2087_v28, 0.0 }
 0x291   : > { %v2355_v33 = vmax.f32 %v2020_v12, 0.0  ;;  %v2342_v2 = vmax.f32 %v2122_v25, 0.0 }
 0x292   : > { %v2356_v21 = vmax.f32 %v2055_v22, 0.0 }
 0x293   : > { %2545 = vmatpush.msrb.mxu0 %v2355_v33 }
 0x294   : > { %2565 = vmatpush.msra.mxu1 %v2356_v21 }
 0x295   : > { %v2089_v52 = vpop.f32.mrf.mxu2  ;;  %2546 = vmatpush.msrb.mxu0 %v2339_v60 }
 0x296   : > { %v2124_v10 = vpop.f32.mrf.mxu3  ;;  %2566 = vmatpush.msra.mxu1 %v2340_v15  ;;  %v2090_v38 = vadd.f32 %v2089_v52, %v4838_v20  ;;  %v5012_v40 = vpop.f32.mrf.mxu0 }
 0x297   : > { %v2125_v5 = vadd.f32 %v2124_v10, %v4838_v20  ;;  %v5014_v26 = vpop.f32.mrf.mxu1  ;;  %2547 = vmatpush.msrb.mxu0 %v2323_v30  ;;  %v2145_v53 = vadd.f32 %v5012_v40, %v4868_v27 }
 0x298   : > { %2567 = vmatpush.msra.mxu1 %v2324_v63  ;;  %v2357_v37 = vmax.f32 %v2090_v38, 0.0 }
 0x299   : > { %v2358_v36 = vmax.f32 %v2125_v5, 0.0  ;;  %2548 = vmatpush.msrb.mxu0 %v2307_v41 }
 0x29a   : > { %2568 = vmatpush.msra.mxu1 %v2308_v11  ;;  %2585 = vmatpush.msra.mxu2 %v2357_v37  ;;  %v2368_v37 = vpop.permute.xlu0 %2367 }
 0x29b   : > { %2605 = vmatpush.msrb.mxu3 %v2358_v36  ;;  %2549 = vmatpush.msrb.mxu0 %v2291_v23  ;;  %v5057_v23 = vperm.slane %v2368_v37, 0 }
 0x29c   : > { %2569 = vmatpush.msra.mxu1 %v2292_v46  ;;  %2586 = vmatpush.msra.mxu2 %v2341_v17 }
 0x29d   : > { %2606 = vmatpush.msrb.mxu3 %v2342_v2  ;;  %2550 = vmatpush.msrb.mxu0 %v2275_v4  ;;  %v2180_v4 = vadd.f32 %v5014_v26, %v4868_v27 }
 0x29e   : > { %2570 = vmatpush.msra.mxu1 %v2276_v35  ;;  %2587 = vmatpush.msra.mxu2 %v2325_v54  ;;  %v2147_v42 = vpop.f32.mrf.mxu0 }
 0x29f   : > { %2607 = vmatpush.msrb.mxu3 %v2326_v16  ;;  %v2182_v44 = vpop.f32.mrf.mxu1  ;;  %3350 = vmatmul.msk.f32.vlgmr.msrb.gmra.mxu0 %vm2371_vm3, %v4936_v62  ;;  %v2148_v11 = vadd.f32 %v2147_v42, %v4866_v14 }
 0x2a0   : > { %3351 = vmatmul.msk.f32.vlgmr.msra.gmra.mxu1 %vm2371_vm3, %v4936_v62  ;;  %v5036_v61 = vpop.f32.mrf.mxu2  ;;  %2588 = vmatpush.msra.mxu2 %v2309_v39  ;;  %v2183_v46 = vadd.f32 %v2182_v44, %v4866_v14 }
 0x2a1   : > { %v5038_v51 = vpop.f32.mrf.mxu3  ;;  %2608 = vmatpush.msrb.mxu3 %v2310_v19  ;;  %v2295_v35 = vmax.f32 %v2148_v11, 0.0 }
 0x2a2   : > { %2589 = vmatpush.msra.mxu2 %v2293_v3  ;;  %v2296_v19 = vmax.f32 %v2183_v46, 0.0 }
 0x2a3   : > { %2609 = vmatpush.msrb.mxu3 %v2294_v18 }
 0x2a4   : > { %2590 = vmatpush.msra.mxu2 %v2277_v7  ;;  %v2279_v7 = vmax.f32 %v2145_v53, 0.0 }
 0x2a5   : > { %2610 = vmatpush.msrb.mxu3 %v2278_v57  ;;  %3352 = vmatmul.msk.f32.vlgmr.msra.gmra.mxu2 %vm2371_vm3, %v4936_v62  ;;  %v2280_v57 = vmax.f32 %v2180_v4, 0.0 }
 0x2a6   : > { %3353 = vmatmul.msk.f32.vlgmr.msrb.gmra.mxu3 %vm2371_vm3, %v4936_v62  ;;  %v2150_v56 = vpop.f32.mrf.mxu0 }
 0x2a7   : > { %v2185_v29 = vpop.f32.mrf.mxu1  ;;  %v2151_v47 = vadd.f32 %v2150_v56, %v4858_v58 }
 0x2a8   : > { %v5044_v32 = vpop.f32.mrf.mxu2  ;;  %v2186_v0 = vadd.f32 %v2185_v29, %v4858_v58 }
 0x2a9   : > { %v5046_v12 = vpop.f32.mrf.mxu3  ;;  %v2311_v17 = vmax.f32 %v2151_v47, 0.0 }
 0x2aa   : > { %v2312_v31 = vmax.f32 %v2186_v0, 0.0 }
 0x2ae   : > { %v2153_v22 = vpop.f32.mrf.mxu0 }
 0x2af   : > { %v2188_v9 = vpop.f32.mrf.mxu1  ;;  %v2154_v25 = vadd.f32 %v2153_v22, %v4842_v48  ;;  %v2253_v22 = vadd.f32 %v5046_v12, %v4866_v14 }
 0x2b0   : > { %v2220_v43 = vpop.f32.mrf.mxu2  ;;  %v2189_v5 = vadd.f32 %v2188_v9, %v4842_v48 }
 0x2b1   : > { %v2255_v33 = vpop.f32.mrf.mxu3  ;;  %v2327_v36 = vmax.f32 %v2154_v25, 0.0 }
 0x2b2   : > { %v2328_v49 = vmax.f32 %v2189_v5, 0.0  ;;  %v2256_v56 = vadd.f32 %v2255_v33, %v4858_v58 }
 0x2b7   : > { %v2156_v21 = vpop.f32.mrf.mxu0  ;;  %v2191_v50 = vpop.f32.mrf.mxu1 }
 0x2b8   : > { %v2223_v1 = vpop.f32.mrf.mxu2  ;;  %v2157_v59 = vadd.f32 %v2156_v21, %v4840_v13  ;;  %v2192_v63 = vadd.f32 %v2191_v50, %v4840_v13 }
 0x2b9   : > { %v2258_v60 = vpop.f32.mrf.mxu3  ;;  %v2224_v26 = vadd.f32 %v2223_v1, %v4842_v48 }
 0x2ba   : > { %v2343_v41 = vmax.f32 %v2157_v59, 0.0  ;;  %v2344_v45 = vmax.f32 %v2192_v63, 0.0  ;;  %v2259_v44 = vadd.f32 %v2258_v60, %v4842_v48  ;;  %v2218_v48 = vadd.f32 %v5044_v32, %v4866_v14 }
 0x2bb   : > { %v2329_v9 = vmax.f32 %v2224_v26, 0.0  ;;  %v2314_v14 = vmax.f32 %v2256_v56, 0.0  ;;  %v2298_v60 = vmax.f32 %v2253_v22, 0.0  ;;  %v2730_v56 = vld [vmem:[%s5193_s7 + $0x8] sm:$0xff] }
 0x2bc   : > { %v2330_v21 = vmax.f32 %v2259_v44, 0.0 }
 0x2bf   : > { %v2159_v15 = vpop.f32.mrf.mxu0 }
 0x2c0   : > { %v2160_v34 = vadd.f32 %v2159_v15, %v4838_v20  ;;  %v2194_v30 = vpop.f32.mrf.mxu1 }
 0x2c1   : > { %v2226_v52 = vpop.f32.mrf.mxu2  ;;  %v2261_v10 = vpop.f32.mrf.mxu3  ;;  %v2195_v28 = vadd.f32 %v2194_v30, %v4838_v20 }
 0x2c2   : > { %v2359_v38 = vmax.f32 %v2160_v34, 0.0  ;;  %v2227_v24 = vadd.f32 %v2226_v52, %v4840_v13  ;;  %v2262_v8 = vadd.f32 %v2261_v10, %v4840_v13  ;;  %v2221_v13 = vadd.f32 %v2220_v43, %v4858_v58 }
 0x2c3   : > { %v2360_v6 = vmax.f32 %v2195_v28, 0.0  ;;  %v2215_v43 = vadd.f32 %v5036_v61, %v4868_v27  ;;  %v2250_v58 = vadd.f32 %v5038_v51, %v4868_v27  ;;  %v2297_v61 = vmax.f32 %v2218_v48, 0.0 }
 0x2c4   : > { %2625 = vmatpush.msra.mxu0 %v2359_v38  ;;  %v2346_v29 = vmax.f32 %v2262_v8, 0.0  ;;  %v2313_v32 = vmax.f32 %v2221_v13, 0.0 }
 0x2c5   : > { %2645 = vmatpush.msrb.mxu1 %v2360_v6  ;;  %v2281_v51 = vmax.f32 %v2215_v43, 0.0  ;;  %v2282_v59 = vmax.f32 %v2250_v58, 0.0 }
 0x2c6   : > { %2626 = vmatpush.msra.mxu0 %v2343_v41 }
 0x2c7   : > { %2646 = vmatpush.msrb.mxu1 %v2344_v45 }
 0x2c8   : > { %v2412_v2 = vpop.f32.mrf.mxu1  ;;  %2627 = vmatpush.msra.mxu0 %v2327_v36 }
 0x2c9   : > { %v2229_v55 = vpop.f32.mrf.mxu2  ;;  %v2264_v54 = vpop.f32.mrf.mxu3  ;;  %v2413_v16 = vadd.f32 %v2412_v2, %v5057_v23  ;;  %2647 = vmatpush.msrb.mxu1 %v2328_v49 }
 0x2ca   : > { %v2230_v39 = vadd.f32 %v2229_v55, %v4838_v20  ;;  %v2265_v40 = vadd.f32 %v2264_v54, %v4838_v20  ;;  %2628 = vmatpush.msra.mxu0 %v2311_v17  ;;  %v2345_v20 = vmax.f32 %v2227_v24, 0.0 }
 0x2cb   : > { %v2696_v42 = vmax.f32 %v2413_v16, 0.0  ;;  %2648 = vmatpush.msrb.mxu1 %v2312_v31 }
 0x2cc   : > { %v2361_v3 = vmax.f32 %v2230_v39, 0.0  ;;  %v2362_v18 = vmax.f32 %v2265_v40, 0.0  ;;  %2629 = vmatpush.msra.mxu0 %v2295_v35 }
 0x2cd   : > { %2712 = vst [vmem:[#allocation2 + $0x1] sm:$0x1] %v2696_v42  ;;  %2649 = vmatpush.msrb.mxu1 %v2296_v19 }
 0x2ce   : > { %2665 = vmatpush.msrb.mxu2 %v2361_v3  ;;  %2685 = vmatpush.msra.mxu3 %v2362_v18 }
 0x2cf   : > { %2630 = vmatpush.msra.mxu0 %v2279_v7  ;;  %2650 = vmatpush.msrb.mxu1 %v2280_v57  ;;  %v2729_v57 = vld [vmem:[%s5193_s7] sm:$0xff] }
 0x2d0   : > { %2666 = vmatpush.msrb.mxu2 %v2345_v20  ;;  %2686 = vmatpush.msra.mxu3 %v2346_v29  ;;  %v2732_v20 = vld [vmem:[%s5193_s7 + $0x18] sm:$0xff] }
 0x2d1   : > { %v2392_v33 = vpop.f32.mrf.mxu3  ;;  %v2432_v50 = vpop.f32.mrf.mxu2  ;;  %3354 = vmatmul.msk.f32.vlgmr.msra.gmra.mxu0 %vm2371_vm3, %v4936_v62  ;;  %3355 = vmatmul.msk.f32.vlgmr.msrb.gmra.mxu1 %vm2371_vm3, %v4936_v62 }
 0x2d2   : > { %v2393_v12 = vadd.f32 %v2392_v33, %v5057_v23  ;;  %v2433_v1 = vadd.f32 %v2432_v50, %v5057_v23  ;;  %2667 = vmatpush.msrb.mxu2 %v2329_v9  ;;  %2687 = vmatpush.msra.mxu3 %v2330_v21  ;;  %v2755_v9 = vpop.permute.xlu1 %2754  ;;  %v2750_v21 = vpop.permute.xlu2 %2749 }
 0x2d3   : > { %v2745_v50 = vpop.permute.xlu0 %2744 }
 0x2d4   : > { %v2695_v15 = vmax.f32 %v2393_v12, 0.0  ;;  %v2697_v27 = vmax.f32 %v2433_v1, 0.0  ;;  %2668 = vmatpush.msrb.mxu2 %v2313_v32  ;;  %2688 = vmatpush.msra.mxu3 %v2314_v14 }
 0x2d6   : > { %2711 = vst [vmem:[#allocation2] sm:$0x1] %v2695_v15  ;;  %2669 = vmatpush.msrb.mxu2 %v2297_v61  ;;  %2689 = vmatpush.msra.mxu3 %v2298_v60 }
 0x2d7   : > { %2713 = vst [vmem:[#allocation2 + $0x2] sm:$0x1] %v2697_v27  ;;  %v2803_v27 = vld [vmem:[%s5195_s9] sm:$0xff] }
 0x2d8   : > { %2670 = vmatpush.msrb.mxu2 %v2281_v51  ;;  %2690 = vmatpush.msra.mxu3 %v2282_v59  ;;  %v2804_v51 = vld [vmem:[%s5195_s9 + $0x8] sm:$0xff]  ;;  %v2805_v59 = vld [vmem:[%s5195_s9 + $0x10] sm:$0xff] }
 0x2d9   : > { %v2452_v34 = vpop.f32.mrf.mxu3  ;;  %3356 = vmatmul.msk.f32.vlgmr.msrb.gmra.mxu2 %vm2371_vm3, %v4936_v62  ;;  %3357 = vmatmul.msk.f32.vlgmr.msra.gmra.mxu3 %vm2371_vm3, %v4936_v62 }
 0x2da   : > { %v2453_v30 = vadd.f32 %v2452_v34, %v5057_v23  ;;  %v2740_v12 = vpop.permute.xlu1 %2739  ;;  %v2806_v34 = vld [vmem:[%s5195_s9 + $0x18] sm:$0xff] }
 0x2dc   : > { %v2698_v63 = vmax.f32 %v2453_v30, 0.0 }
 0x2de   : > { %2714 = vst [vmem:[#allocation2 + $0x3] sm:$0x1] %v2698_v63 }
 0x2eb   : > { %v2472_v52 = vpop.f32.mrf.mxu0 }
 0x2ec   : > { %v2492_v10 = vpop.f32.mrf.mxu1  ;;  %v2473_v28 = vadd.f32 %v2472_v52, %v5057_v23 }
 0x2ed   : > { %v2493_v25 = vadd.f32 %v2492_v10, %v5057_v23  ;;  %v2829_v10 = vpop.permute.xlu2 %2828 }
 0x2ee   : > { %v2699_v38 = vmax.f32 %v2473_v28, 0.0  ;;  %v2824_v28 = vpop.permute.xlu0 %2823 }
 0x2ef   : > { %v2700_v5 = vmax.f32 %v2493_v25, 0.0 }
 0x2f0   : > { %2715 = vst [vmem:[#allocation2 + $0x4] sm:$0x1] %v2699_v38 }
 0x2f1   : > { %2716 = vst [vmem:[#allocation2 + $0x5] sm:$0x1] %v2700_v5 }
 0x2f8   : > { %v2512_v6 = vpop.f32.mrf.mxu2 }
 0x2f9   : > { %v2532_v47 = vpop.f32.mrf.mxu3  ;;  %v2513_v41 = vadd.f32 %v2512_v6, %v5057_v23  ;;  %v2819_v6 = vpop.permute.xlu1 %2818 }
 0x2fa   : > { %v2533_v62 = vadd.f32 %v2532_v47, %v5057_v23 }
 0x2fb   : > { %v2701_v11 = vmax.f32 %v2513_v41, 0.0 }
 0x2fc   : > { %v2702_v0 = vmax.f32 %v2533_v62, 0.0  ;;  %v2814_v62 = vpop.permute.xlu2 %2813 }
 0x2fd   : > { %2717 = vst [vmem:[#allocation2 + $0x6] sm:$0x1] %v2701_v11 }
 0x2fe   : > { %2718 = vst [vmem:[#allocation2 + $0x7] sm:$0x1] %v2702_v0 }
 0x305   : > { %v2727_v13 = vld [vmem:[#allocation2] sm:$0xff] }
 0x31c   : > { %v2552_v45 = vpop.f32.mrf.mxu0 }
 0x31d   : > { %v2572_v37 = vpop.f32.mrf.mxu1  ;;  %v2553_v36 = vadd.f32 %v2552_v45, %v5057_v23 }
 0x31e   : > { %v2573_v46 = vadd.f32 %v2572_v37, %v5057_v23 }
 0x31f   : > { %v2703_v49 = vmax.f32 %v2553_v36, 0.0  ;;  %v2877_v36 = vld [vmem:[%s5197_s11] sm:$0xff] }
 0x320   : > { %v2704_v53 = vmax.f32 %v2573_v46, 0.0  ;;  %v2878_v46 = vld [vmem:[%s5197_s11 + $0x8] sm:$0xff] }
 0x321   : > { %2719 = vst [vmem:[#allocation2 + $0x8] sm:$0x1] %v2703_v49  ;;  %v2879_v49 = vld [vmem:[%s5197_s11 + $0x10] sm:$0xff] }
 0x322   : > { %2720 = vst [vmem:[#allocation2 + $0x9] sm:$0x1] %v2704_v53  ;;  %v2880_v53 = vld [vmem:[%s5197_s11 + $0x18] sm:$0xff] }
 0x328   : > { %v2592_v17 = vpop.f32.mrf.mxu2 }
 0x329   : > { %v2612_v2 = vpop.f32.mrf.mxu3  ;;  %v2593_v4 = vadd.f32 %v2592_v17, %v5057_v23 }
 0x32a   : > { %v2613_v35 = vadd.f32 %v2612_v2, %v5057_v23 }
 0x32b   : > { %v2705_v31 = vmax.f32 %v2593_v4, 0.0  ;;  %v2903_v4 = vpop.permute.xlu0 %2902 }
 0x32c   : > { %v2706_v55 = vmax.f32 %v2613_v35, 0.0  ;;  %v2898_v35 = vpop.permute.xlu1 %2897 }
 0x32d   : > { %2721 = vst [vmem:[#allocation2 + $0xa] sm:$0x1] %v2705_v31 }
 0x32e   : > { %2722 = vst [vmem:[#allocation2 + $0xb] sm:$0x1] %v2706_v55 }
 0x34e   : > { %v2632_v54 = vpop.f32.mrf.mxu0  ;;  %v2652_v16 = vpop.f32.mrf.mxu1 }
 0x34f   : > { %v2633_v24 = vadd.f32 %v2632_v54, %v5057_v23  ;;  %v2653_v8 = vadd.f32 %v2652_v16, %v5057_v23  ;;  %v2893_v54 = vpop.permute.xlu2 %2892 }
 0x351   : > { %v2707_v39 = vmax.f32 %v2633_v24, 0.0  ;;  %v2708_v40 = vmax.f32 %v2653_v8, 0.0  ;;  %v2888_v24 = vpop.permute.xlu0 %2887 }
 0x353   : > { %2723 = vst [vmem:[#allocation2 + $0xc] sm:$0x1] %v2707_v39 }
 0x354   : > { %2724 = vst [vmem:[#allocation2 + $0xd] sm:$0x1] %v2708_v40 }
 0x35c   : > { %v2672_v19 = vpop.f32.mrf.mxu2  ;;  %v2692_v42 = vpop.f32.mrf.mxu3 }
 0x35d   : > { %v2673_v26 = vadd.f32 %v2672_v19, %v5057_v23  ;;  %v2693_v44 = vadd.f32 %v2692_v42, %v5057_v23  ;;  %v2731_v23 = vld [vmem:[%s5193_s7 + $0x10] sm:$0xff] }
 0x35f   : > { %v2709_v3 = vmax.f32 %v2673_v26, 0.0  ;;  %v2710_v18 = vmax.f32 %v2693_v44, 0.0 }
 0x361   : > { %2725 = vst [vmem:[#allocation2 + $0xe] sm:$0x1] %v2709_v3 }
 0x362   : > { %2726 = vst [vmem:[#allocation2 + $0xf] sm:$0x1] %v2710_v18 }
 0x369   : > { %v2728_v7 = vld [vmem:[#allocation2 + $0x8] sm:$0xff] }
 0x36a   : > { %2784 = vmatpush.msrb.mxu0 %v2728_v7 }
 0x36c   : > { %2785 = vmatpush.msrb.mxu0 %v2727_v13 }
 0x36d   : > { %3358 = vmatmul.msk.f32.vlgmr.msrb.gmra.mxu0 %vm2757_vm4, %v2729_v57 }
 0x375   : > { %3359 = vmatmul.msk.f32.gmra.mxu0 %vm2757_vm4, %v2730_v56 }
 0x37d   : > { %3360 = vmatmul.msk.f32.gmra.mxu0 %vm2757_vm4, %v2731_v23 }
 0x385   : > { %3361 = vmatmul.msk.f32.gmra.mxu0 %vm2757_vm4, %v2732_v20 }
 0x3ea   : > { %v2787_v29 = vpop.f32.mrf.mxu0 }
 0x3eb   : > { %v2788_v1 = vadd.f32 %v2787_v29, %v2740_v12 }
 0x3ed   : > { %v2799_v15 = vmax.f32 %v2788_v1, 0.0 }
 0x3f2   : > { %v2790_v48 = vpop.f32.mrf.mxu0 }
 0x3f3   : > { %v2791_v32 = vadd.f32 %v2790_v48, %v2745_v50  ;;  %v2966_v50 = vld [vmem:[%s5199_s13] sm:$0xf] }
 0x3f5   : > { %v2800_v60 = vmax.f32 %v2791_v32, 0.0  ;;  %v2971_v32 = vpop.permute.xlu1 %2970 }
 0x3fa   : > { %v2793_v22 = vpop.f32.mrf.mxu0 }
 0x3fb   : > { %v2794_v58 = vadd.f32 %v2793_v22, %v2750_v21 }
 0x3fd   : > { %v2801_v61 = vmax.f32 %v2794_v58, 0.0 }
 0x402   : > { %v2796_v43 = vpop.f32.mrf.mxu0 }
 0x403   : > { %v2797_v33 = vadd.f32 %v2796_v43, %v2755_v9 }
 0x405   : > { %v2802_v14 = vmax.f32 %v2797_v33, 0.0 }
 0x407   : > { %2856 = vmatpush.msra.mxu1 %v2802_v14 }
 0x409   : > { %2857 = vmatpush.msra.mxu1 %v2801_v61 }
 0x40b   : > { %2858 = vmatpush.msra.mxu1 %v2800_v60 }
 0x40d   : > { %2859 = vmatpush.msra.mxu1 %v2799_v15 }
 0x40e   : > { %3362 = vmatmul.msk.f32.vlgmr.msra.gmra.mxu1 %vm2831_vm5, %v2803_v27 }
 0x416   : > { %3363 = vmatmul.msk.f32.gmra.mxu1 %vm2831_vm5, %v2804_v51 }
 0x41e   : > { %3364 = vmatmul.msk.f32.gmra.mxu1 %vm2831_vm5, %v2805_v59 }
 0x426   : > { %3365 = vmatmul.msk.f32.gmra.mxu1 %vm2831_vm5, %v2806_v34 }
 0x48b   : > { %v2861_v30 = vpop.f32.mrf.mxu1 }
 0x48c   : > { %v2862_v11 = vadd.f32 %v2861_v30, %v2814_v62 }
 0x48e   : > { %v2873_v37 = vmax.f32 %v2862_v11, 0.0 }
 0x493   : > { %v2864_v63 = vpop.f32.mrf.mxu1 }
 0x494   : > { %v2865_v47 = vadd.f32 %v2864_v63, %v2819_v6 }
 0x496   : > { %v2874_v45 = vmax.f32 %v2865_v47, 0.0 }
 0x49b   : > { %v2867_v52 = vpop.f32.mrf.mxu1 }
 0x49c   : > { %v2868_v38 = vadd.f32 %v2867_v52, %v2824_v28 }
 0x49e   : > { %v2875_v0 = vmax.f32 %v2868_v38, 0.0 }
 0x4a3   : > { %v2870_v25 = vpop.f32.mrf.mxu1 }
 0x4a4   : > { %v2871_v5 = vadd.f32 %v2870_v25, %v2829_v10 }
 0x4a6   : > { %v2876_v41 = vmax.f32 %v2871_v5, 0.0 }
 0x4a8   : > { %2929 = vmatpush.msra.mxu2 %v2876_v41 }
 0x4aa   : > { %2930 = vmatpush.msra.mxu2 %v2875_v0 }
 0x4ac   : > { %2931 = vmatpush.msra.mxu2 %v2874_v45 }
 0x4ae   : > { %2932 = vmatpush.msra.mxu2 %v2873_v37 }
 0x4af   : > { %3366 = vmatmul.msk.f32.vlgmr.msra.gmra.mxu2 %vm2831_vm5, %v2877_v36 }
 0x4b7   : > { %3367 = vmatmul.msk.f32.gmra.mxu2 %vm2831_vm5, %v2878_v46 }
 0x4bf   : > { %3368 = vmatmul.msk.f32.gmra.mxu2 %vm2831_vm5, %v2879_v49 }
 0x4c7   : > { %3369 = vmatmul.msk.f32.gmra.mxu2 %vm2831_vm5, %v2880_v53 }
 0x532   : > { %v2934_v17 = vpop.f32.mrf.mxu2 }
 0x533   : > { %v2935_v8 = vadd.f32 %v2934_v17, %v2888_v24 }
 0x535   : > { %v2946_v42 = vadd.f32 3.0, %v2935_v8 }
 0x537   : > { %v2950_v7 = vmax.f32 %v2946_v42, 0.0 }
 0x539   : > { %v2954_v20 = vmin.f32 %v2950_v7, 6.0 }
 0x53a   : > { %v2937_v2 = vpop.f32.mrf.mxu2 }
 0x53b   : > { %v2938_v16 = vadd.f32 %v2937_v2, %v2893_v54  ;;  %v2958_v21 = vmul.f32 %v2954_v20, %v2935_v8 }
 0x53d   : > { %v2947_v40 = vadd.f32 3.0, %v2938_v16  ;;  %v2962_v33 = vmul.f32 0.16666667, %v2958_v21 }
 0x53f   : > { %v2951_v3 = vmax.f32 %v2947_v40, 0.0 }
 0x541   : > { %v2955_v56 = vmin.f32 %v2951_v3, 6.0 }
 0x542   : > { %v2940_v31 = vpop.f32.mrf.mxu2 }
 0x543   : > { %v2941_v55 = vadd.f32 %v2940_v31, %v2898_v35  ;;  %v2959_v22 = vmul.f32 %v2955_v56, %v2938_v16 }
 0x545   : > { %v2948_v39 = vadd.f32 3.0, %v2941_v55  ;;  %v2963_v58 = vmul.f32 0.16666667, %v2959_v22 }
 0x547   : > { %v2952_v26 = vmax.f32 %v2948_v39, 0.0 }
 0x549   : > { %v2956_v57 = vmin.f32 %v2952_v26, 6.0 }
 0x54a   : > { %v2943_v19 = vpop.f32.mrf.mxu2 }
 0x54b   : > { %v2944_v44 = vadd.f32 %v2943_v19, %v2903_v4  ;;  %v2960_v29 = vmul.f32 %v2956_v57, %v2941_v55 }
 0x54d   : > { %v2949_v18 = vadd.f32 3.0, %v2944_v44  ;;  %v2964_v43 = vmul.f32 0.16666667, %v2960_v29 }
 0x54f   : > { %v2953_v13 = vmax.f32 %v2949_v18, 0.0 }
 0x551   : > { %v2957_v23 = vmin.f32 %v2953_v13, 6.0 }
 0x553   : > { %v2961_v48 = vmul.f32 %v2957_v23, %v2944_v44 }
 0x555   : > { %v2965_v9 = vmul.f32 0.16666667, %v2961_v48 }
 0x557   : > { %2988 = vmatpush.msrb.mxu3 %v2965_v9 }
 0x559   : > { %2989 = vmatpush.msrb.mxu3 %v2964_v43 }
 0x55b   : > { %2990 = vmatpush.msrb.mxu3 %v2963_v58 }
 0x55d   : > { %2991 = vmatpush.msrb.mxu3 %v2962_v33 }
 0x55e   : > { %3370 = vmatmul.msk.f32.vlgmr.msrb.gmra.mxu3 %vm2831_vm5, %v2966_v50 }
 0x5e1   : > { %v2993_v14 = vpop.f32.mrf.mxu3 }
 0x5e2   : > { %v2994_v12 = vadd.f32 %v2993_v14, %v2971_v32 }
 0x5e4   : > { %3421 = vtanh.f32 %v2994_v12 }
 0x5ea   : > { %v3422_v1 = vpop.eup %3421 }
 0x5eb   : > { %2997 = vst [vmem:[%s608_s17] sm:$0xf] %v3422_v1 }
 0x5ec   : > { %3450 = shalt.err (!%p3447_p5)
}
 0x5ed   : > { %3378 = dma.vmem_to_hbm [thread:$0]  (%p3609_p6), %s3012_s1, 64, %s3014_s18, %s2999_s6  }
 0x5ee PF: > { %p3384_p7 = scmp.ge.s32.totalorder %s3485_s23, 2  ;;  %s3025_s16 = sand.u32 1, %s3473_s20  }
 0x5ef   : > { %s3026_s3 = scalar_lea.sflag [#allocation6], %s3025_s16 }
 0x5f0   : > { %p3381_p9 = pnand %p3384_p7, %p3613_p8 }
 0x5f2   : > { %p3382_p10 = pneg %p3381_p9 }
 0x5f4   : > { %3468 = dma.done.wait (%p3382_p10), %s3026_s3, 64  }
 0x5f5   : > { %3470 = vsyncadd (%p3382_p10), %s3026_s3, 4294967232  ;;  %s5217_s2 = sld [smem:[#allocation8_spill]]  ;;  %p27_p11 = scmp.ge.s32.totalorder %s3594_s25, 6  }
 0x5f6   : > { %s5218_s20 = smov %s3477_s21  ;;  %s5219_s21 = smov %s3481_s22 }
 0x5f7   : > { %s5221_s23 = smov %s3594_s25  ;;  %29 = sbr.rel (!%p27_p11) target bundleno = 9 (0x9), region = 143 }
 0x5fb   : > { %s5220_s22 = smov %s5217_s2 }
 0x5fc   :  { %3032 = vsyncpa [#allocation6], 1 }
 0x5fd   :  { %3034 = vsyncpa [#allocation6 + $0x1], 1 }

</bundles_post_ra>
